<compile_context>
chip_gen: v5e
topology: v5e:2x2
jax: 0.10.0
libtpu: 0.0.40
codegen_flags: <defaults>
</compile_context>

<pallas_src>
import numpy as np
import jax
import jax.numpy as jnp
from jax import lax
from jax.experimental import pallas as pl
from jax.experimental.pallas import tpu as pltpu


def _residual_block_kernel(x_ref, w1_ref, w2_ref, s1_ref, b1_ref, s2_ref, b2_ref,
                           o_ref, xpad_ref, mid_ref):
    """Fused residual block for one sample (batch dim squeezed by BlockSpec).

    x_ref   : (H, W, C)      unpadded NHWC input block (matmul dtype)
    w1_ref  : (9*C, C)       conv1 weights, (ky,kx,cin)-major rows
    w2_ref  : (9*C, C)       conv2 weights
    s*/b*   : (1, C) f32     fused BN scale / shift
    o_ref   : (H, W, C) f32  output block
    xpad_ref: (H+2, W+2, C)  VMEM scratch, halo-padded input
    mid_ref : (H+2, W+2, C)  VMEM scratch, halo-padded intermediate
    """
    H, W, C = x_ref.shape
    f32 = jnp.float32

    # Zero only the 1-element halo border of the padded scratch buffers; the
    # interiors are fully overwritten every step.  Doing it per step keeps each
    # grid iteration self-contained (safe under "parallel" partitioning).
    for ref in (xpad_ref, mid_ref):
        zrow = jnp.zeros((1, W + 2, C), ref.dtype)
        zcol = jnp.zeros((H + 2, 1, C), ref.dtype)
        ref[0:1, :, :] = zrow
        ref[H + 1:H + 2, :, :] = zrow
        ref[:, 0:1, :] = zcol
        ref[:, W + 1:W + 2, :] = zcol

    x = x_ref[...]
    # Halo padding done in VMEM (no padded copy materialized in HBM).
    xpad_ref[1:H + 1, 1:W + 1, :] = x

    def conv3x3(src_ref, w_ref):
        # im2col staged in registers: one (H*W, 9C) x (9C, C) MXU matmul with
        # contraction K = 9*C instead of nine K=C matmuls.
        taps = [src_ref[ky:ky + H, kx:kx + W, :].reshape(H * W, C)
                for ky in range(3) for kx in range(3)]
        patches = jnp.concatenate(taps, axis=-1)                  # (H*W, 9C)
        return jnp.dot(patches, w_ref[...], preferred_element_type=f32)

    # conv1 -> fused BN1 -> ReLU  (elementwise math in f32 on the VPU)
    y1 = conv3x3(xpad_ref, w1_ref) * s1_ref[...] + b1_ref[...]
    y1 = jnp.maximum(y1, 0.0)
    mid_ref[1:H + 1, 1:W + 1, :] = y1.reshape(H, W, C).astype(mid_ref.dtype)

    # conv2 -> fused BN2 -> + residual (pre-BN input) -> ReLU
    y2 = conv3x3(mid_ref, w2_ref) * s2_ref[...] + b2_ref[...]
    out = jnp.maximum(y2.reshape(H, W, C) + x.astype(f32), 0.0)
    o_ref[...] = out.astype(o_ref.dtype)


def residual_block_forward(x_nchw, w1_oihw, w2_oihw, bn1, bn2,
                           eps=1e-5, matmul_dtype=jnp.float32):
    """Layout/BN folding glue; the hot path runs in the fused Pallas kernel."""
    N, C, H, W = x_nchw.shape
    # TODO(synk): in a full network keep activations NHWC end-to-end to avoid
    #             this boundary transpose (the PyTorch module is NCHW).
    x = jnp.transpose(x_nchw, (0, 2, 3, 1)).astype(matmul_dtype)   # NCHW -> NHWC

    def to_mat(w_oihw):
        # OIHW -> HWIO -> (9*C, C), rows ordered (ky, kx, cin) to match im2col.
        return jnp.transpose(w_oihw, (2, 3, 1, 0)).reshape(9 * C, C).astype(matmul_dtype)

    w1 = to_mat(w1_oihw)
    w2 = to_mat(w2_oihw)

    def fuse_bn(gamma, beta, mean, var):
        s = (gamma / jnp.sqrt(var + eps)).astype(jnp.float32)
        sh = (beta - mean * s).astype(jnp.float32)
        return s.reshape(1, C), sh.reshape(1, C)

    s1, sh1 = fuse_bn(*bn1)
    s2, sh2 = fuse_bn(*bn2)

    itemsize = jnp.dtype(matmul_dtype).itemsize
    # Per-step VMEM footprint: double-buffered input/output blocks + weights +
    # BN params + the two padded scratch buffers; generous headroom for the
    # in-kernel im2col temporaries.  Capped at v7x's 64 MiB physical VMEM.
    blk_bytes = (2 * H * W * C * itemsize            # input block x2 buffers
                 + 2 * H * W * C * 4                 # f32 output block x2
                 + 2 * 2 * 9 * C * C * itemsize      # both weight matrices x2
                 + 2 * 4 * C * 4                     # BN scale/shift x2
                 + 2 * (H + 2) * (W + 2) * C * itemsize)
    vmem_limit = int(min(64 * 1024 * 1024, max(8 * 1024 * 1024, 4 * blk_bytes)))

    flops = 2 * (2 * N * H * W * (9 * C) * C)        # two 3x3 convs as matmuls
    bytes_accessed = int(N * H * W * C * itemsize + N * H * W * C * 4
                         + 2 * 9 * C * C * itemsize + 4 * C * 4)

    # TODO(synk): for large H*W (real ResNet stages) additionally tile rows with
    #             a 2-row halo via manual make_async_copy double-buffering; at
    #             these shapes one sample per grid step fits VMEM comfortably.
    out_nhwc = pl.pallas_call(
        _residual_block_kernel,
        out_shape=jax.ShapeDtypeStruct((N, H, W, C), jnp.float32),
        grid_spec=pltpu.PrefetchScalarGridSpec(
            num_scalar_prefetch=0,
            grid=(N,),
            in_specs=[
                pl.BlockSpec((None, H, W, C), lambda n: (n, 0, 0, 0)),   # x
                pl.BlockSpec((9 * C, C), lambda n: (0, 0)),              # w1
                pl.BlockSpec((9 * C, C), lambda n: (0, 0)),              # w2
                pl.BlockSpec((1, C), lambda n: (0, 0)),                  # s1
                pl.BlockSpec((1, C), lambda n: (0, 0)),                  # b1
                pl.BlockSpec((1, C), lambda n: (0, 0)),                  # s2
                pl.BlockSpec((1, C), lambda n: (0, 0)),                  # b2
            ],
            out_specs=pl.BlockSpec((None, H, W, C), lambda n: (n, 0, 0, 0)),
            scratch_shapes=[
                pltpu.VMEM((H + 2, W + 2, C), matmul_dtype),   # padded input
                pltpu.VMEM((H + 2, W + 2, C), matmul_dtype),   # padded intermediate
            ],
        ),
        compiler_params=pltpu.CompilerParams(
            dimension_semantics=("parallel",),
            vmem_limit_bytes=vmem_limit,
        ),
        cost_estimate=pl.CostEstimate(flops=flops, transcendentals=0,
                                      bytes_accessed=bytes_accessed),
    )(x, w1, w2, s1, sh1, s2, sh2)

    return jnp.transpose(out_nhwc, (0, 3, 1, 2))                  # NHWC -> NCHW


def residual_block_reference(x_nchw, w1, w2, bn1, bn2, eps=1e-5):
    """Plain-JAX reference matching the PyTorch forward (inference-mode BN)."""
    def conv(x, w):
        return lax.conv_general_dilated(
            x, w, window_strides=(1, 1), padding=((1, 1), (1, 1)),
            dimension_numbers=('NCHW', 'OIHW', 'NCHW'))

    def bn(x, params):
        g, b, m, v = params
        return ((x - m[None, :, None, None]) / jnp.sqrt(v[None, :, None, None] + eps)
                * g[None, :, None, None] + b[None, :, None, None])

    out = jnp.maximum(bn(conv(x_nchw, w1), bn1), 0.0)
    out = bn(conv(out, w2), bn2)
    return jnp.maximum(out + x_nchw, 0.0)


if __name__ == "__main__":
    # Small shapes consistent with ResidualBlock(in_channels=C, out_channels=C, stride=1)
    N, C, H, W = 2, 8, 16, 16

    key = jax.random.PRNGKey(0)
    kx, kw1, kw2, kg1, kb1, km1, kv1, kg2, kb2, km2, kv2 = jax.random.split(key, 11)

    x = jax.random.normal(kx, (N, C, H, W), jnp.float32)
    # conv weights in PyTorch OIHW layout, bias=False
    w1 = 0.1 * jax.random.normal(kw1, (C, C, 3, 3), jnp.float32)
    w2 = 0.1 * jax.random.normal(kw2, (C, C, 3, 3), jnp.float32)
    # BatchNorm params (gamma, beta, running_mean, running_var), var > 0
    bn1 = (1.0 + 0.1 * jax.random.normal(kg1, (C,), jnp.float32),
           0.1 * jax.random.normal(kb1, (C,), jnp.float32),
           0.1 * jax.random.normal(km1, (C,), jnp.float32),
           0.5 + jax.random.uniform(kv1, (C,), jnp.float32))
    bn2 = (1.0 + 0.1 * jax.random.normal(kg2, (C,), jnp.float32),
           0.1 * jax.random.normal(kb2, (C,), jnp.float32),
           0.1 * jax.random.normal(km2, (C,), jnp.float32),
           0.5 + jax.random.uniform(kv2, (C,), jnp.float32))

    ref = jax.block_until_ready(residual_block_reference(x, w1, w2, bn1, bn2))

    # f32 path: must match the reference tightly.
    out = jax.block_until_ready(residual_block_forward(x, w1, w2, bn1, bn2))
    assert out.shape == (N, C, H, W) and out.dtype == jnp.float32
    np.testing.assert_allclose(np.asarray(out), np.asarray(ref), rtol=1e-4, atol=1e-4)

    # bf16 matmul-operand fast path (f32 accumulation / f32 VPU math): loose
    # sanity check that the reduced-precision path is numerically reasonable.
    out_bf16 = jax.block_until_ready(
        residual_block_forward(x, w1, w2, bn1, bn2, matmul_dtype=jnp.bfloat16))
    np.testing.assert_allclose(np.asarray(out_bf16), np.asarray(ref),
                               rtol=1e-1, atol=1e-1)

    print("KERNEL_OK")
</pallas_src>

<mosaic_0001>
module attributes {stable_mosaic.version = 11 : i64} {
  func.func @_residual_block_kernel(%arg0: i32, %arg1: memref<1x16x16x8xf32, #tpu.memory_space<vmem>>, %arg2: memref<72x8xf32, #tpu.memory_space<vmem>>, %arg3: memref<72x8xf32, #tpu.memory_space<vmem>>, %arg4: memref<1x8xf32, #tpu.memory_space<vmem>>, %arg5: memref<1x8xf32, #tpu.memory_space<vmem>>, %arg6: memref<1x8xf32, #tpu.memory_space<vmem>>, %arg7: memref<1x8xf32, #tpu.memory_space<vmem>>, %arg8: memref<1x16x16x8xf32, #tpu.memory_space<vmem>>, %arg9: memref<18x18x8xf32, #tpu.memory_space<vmem>>, %arg10: memref<18x18x8xf32, #tpu.memory_space<vmem>>) attributes {dimension_semantics = [#tpu.dimension_semantics<parallel>], iteration_bounds = array<i64: 2>, scalar_prefetch = 0 : i64, scratch_operands = 2 : i64, tpu.core_type = #tpu.core_type<tc>, window_params = [{transform_indices = @transform_0, window_bounds = array<i64: 1, 16, 16, 8>}, {pipeline_mode = #tpu.pipeline_mode<synchronous>, transform_indices = @transform_1, window_bounds = array<i64: 72, 8>}, {pipeline_mode = #tpu.pipeline_mode<synchronous>, transform_indices = @transform_2, window_bounds = array<i64: 72, 8>}, {pipeline_mode = #tpu.pipeline_mode<synchronous>, transform_indices = @transform_3, window_bounds = array<i64: 1, 8>}, {pipeline_mode = #tpu.pipeline_mode<synchronous>, transform_indices = @transform_4, window_bounds = array<i64: 1, 8>}, {pipeline_mode = #tpu.pipeline_mode<synchronous>, transform_indices = @transform_5, window_bounds = array<i64: 1, 8>}, {pipeline_mode = #tpu.pipeline_mode<synchronous>, transform_indices = @transform_6, window_bounds = array<i64: 1, 8>}, {transform_indices = @transform_7, window_bounds = array<i64: 1, 16, 16, 8>}]} {
    %cst = arith.constant 0.000000e+00 : f32
    %0 = vector.broadcast %cst : f32 to vector<1x18x8xf32>
    %cst_0 = arith.constant 0.000000e+00 : f32
    %1 = vector.broadcast %cst_0 : f32 to vector<18x1x8xf32>
    %c0 = arith.constant 0 : index
    %c0_1 = arith.constant 0 : index
    %c0_2 = arith.constant 0 : index
    %2 = vector.load %arg9[%c0, %c0_1, %c0_2] : memref<18x18x8xf32, #tpu.memory_space<vmem>>, vector<1x18x8xf32>
    tpu.vector_store %arg9[%c0, %c0_1, %c0_2], %0 {strides = array<i32>} : memref<18x18x8xf32, #tpu.memory_space<vmem>>, vector<1x18x8xf32>,
    %c17 = arith.constant 17 : index
    %c0_3 = arith.constant 0 : index
    %c0_4 = arith.constant 0 : index
    %3 = vector.load %arg9[%c17, %c0_3, %c0_4] : memref<18x18x8xf32, #tpu.memory_space<vmem>>, vector<1x18x8xf32>
    tpu.vector_store %arg9[%c17, %c0_3, %c0_4], %0 {strides = array<i32>} : memref<18x18x8xf32, #tpu.memory_space<vmem>>, vector<1x18x8xf32>,
    %c0_5 = arith.constant 0 : index
    %c0_6 = arith.constant 0 : index
    %c0_7 = arith.constant 0 : index
    %4 = vector.load %arg9[%c0_5, %c0_6, %c0_7] : memref<18x18x8xf32, #tpu.memory_space<vmem>>, vector<18x1x8xf32>
    tpu.vector_store %arg9[%c0_5, %c0_6, %c0_7], %1 {strides = array<i32>} : memref<18x18x8xf32, #tpu.memory_space<vmem>>, vector<18x1x8xf32>,
    %c0_8 = arith.constant 0 : index
    %c17_9 = arith.constant 17 : index
    %c0_10 = arith.constant 0 : index
    %5 = vector.load %arg9[%c0_8, %c17_9, %c0_10] : memref<18x18x8xf32, #tpu.memory_space<vmem>>, vector<18x1x8xf32>
    tpu.vector_store %arg9[%c0_8, %c17_9, %c0_10], %1 {strides = array<i32>} : memref<18x18x8xf32, #tpu.memory_space<vmem>>, vector<18x1x8xf32>,
    %cst_11 = arith.constant 0.000000e+00 : f32
    %6 = vector.broadcast %cst_11 : f32 to vector<1x18x8xf32>
    %cst_12 = arith.constant 0.000000e+00 : f32
    %7 = vector.broadcast %cst_12 : f32 to vector<18x1x8xf32>
    %c0_13 = arith.constant 0 : index
    %c0_14 = arith.constant 0 : index
    %c0_15 = arith.constant 0 : index
    %8 = vector.load %arg10[%c0_13, %c0_14, %c0_15] : memref<18x18x8xf32, #tpu.memory_space<vmem>>, vector<1x18x8xf32>
    tpu.vector_store %arg10[%c0_13, %c0_14, %c0_15], %6 {strides = array<i32>} : memref<18x18x8xf32, #tpu.memory_space<vmem>>, vector<1x18x8xf32>,
    %c17_16 = arith.constant 17 : index
    %c0_17 = arith.constant 0 : index
    %c0_18 = arith.constant 0 : index
    %9 = vector.load %arg10[%c17_16, %c0_17, %c0_18] : memref<18x18x8xf32, #tpu.memory_space<vmem>>, vector<1x18x8xf32>
    tpu.vector_store %arg10[%c17_16, %c0_17, %c0_18], %6 {strides = array<i32>} : memref<18x18x8xf32, #tpu.memory_space<vmem>>, vector<1x18x8xf32>,
    %c0_19 = arith.constant 0 : index
    %c0_20 = arith.constant 0 : index
    %c0_21 = arith.constant 0 : index
    %10 = vector.load %arg10[%c0_19, %c0_20, %c0_21] : memref<18x18x8xf32, #tpu.memory_space<vmem>>, vector<18x1x8xf32>
    tpu.vector_store %arg10[%c0_19, %c0_20, %c0_21], %7 {strides = array<i32>} : memref<18x18x8xf32, #tpu.memory_space<vmem>>, vector<18x1x8xf32>,
    %c0_22 = arith.constant 0 : index
    %c17_23 = arith.constant 17 : index
    %c0_24 = arith.constant 0 : index
    %11 = vector.load %arg10[%c0_22, %c17_23, %c0_24] : memref<18x18x8xf32, #tpu.memory_space<vmem>>, vector<18x1x8xf32>
    tpu.vector_store %arg10[%c0_22, %c17_23, %c0_24], %7 {strides = array<i32>} : memref<18x18x8xf32, #tpu.memory_space<vmem>>, vector<18x1x8xf32>,
    %c0_25 = arith.constant 0 : index
    %c0_26 = arith.constant 0 : index
    %c0_27 = arith.constant 0 : index
    %c0_28 = arith.constant 0 : index
    %12 = vector.load %arg1[%c0_25, %c0_26, %c0_27, %c0_28] : memref<1x16x16x8xf32, #tpu.memory_space<vmem>>, vector<1x16x16x8xf32>
    %13 = vector.shape_cast %12 : vector<1x16x16x8xf32> to vector<16x16x8xf32>
    %c1 = arith.constant 1 : index
    %c1_29 = arith.constant 1 : index
    %c0_30 = arith.constant 0 : index
    %14 = vector.load %arg9[%c1, %c1_29, %c0_30] : memref<18x18x8xf32, #tpu.memory_space<vmem>>, vector<16x16x8xf32>
    tpu.vector_store %arg9[%c1, %c1_29, %c0_30], %13 {strides = array<i32>} : memref<18x18x8xf32, #tpu.memory_space<vmem>>, vector<16x16x8xf32>,
    %c0_31 = arith.constant 0 : index
    %c0_32 = arith.constant 0 : index
    %c0_33 = arith.constant 0 : index
    %15 = vector.load %arg9[%c0_31, %c0_32, %c0_33] : memref<18x18x8xf32, #tpu.memory_space<vmem>>, vector<16x16x8xf32>
    %16 = vector.shape_cast %15 : vector<16x16x8xf32> to vector<256x8xf32>
    %c0_34 = arith.constant 0 : index
    %c1_35 = arith.constant 1 : index
    %c0_36 = arith.constant 0 : index
    %17 = vector.load %arg9[%c0_34, %c1_35, %c0_36] : memref<18x18x8xf32, #tpu.memory_space<vmem>>, vector<16x16x8xf32>
    %18 = vector.shape_cast %17 : vector<16x16x8xf32> to vector<256x8xf32>
    %c0_37 = arith.constant 0 : index
    %c2 = arith.constant 2 : index
    %c0_38 = arith.constant 0 : index
    %19 = vector.load %arg9[%c0_37, %c2, %c0_38] : memref<18x18x8xf32, #tpu.memory_space<vmem>>, vector<16x16x8xf32>
    %20 = vector.shape_cast %19 : vector<16x16x8xf32> to vector<256x8xf32>
    %c1_39 = arith.constant 1 : index
    %c0_40 = arith.constant 0 : index
    %c0_41 = arith.constant 0 : index
    %21 = vector.load %arg9[%c1_39, %c0_40, %c0_41] : memref<18x18x8xf32, #tpu.memory_space<vmem>>, vector<16x16x8xf32>
    %22 = vector.shape_cast %21 : vector<16x16x8xf32> to vector<256x8xf32>
    %c1_42 = arith.constant 1 : index
    %c1_43 = arith.constant 1 : index
    %c0_44 = arith.constant 0 : index
    %23 = vector.load %arg9[%c1_42, %c1_43, %c0_44] : memref<18x18x8xf32, #tpu.memory_space<vmem>>, vector<16x16x8xf32>
    %24 = vector.shape_cast %23 : vector<16x16x8xf32> to vector<256x8xf32>
    %c1_45 = arith.constant 1 : index
    %c2_46 = arith.constant 2 : index
    %c0_47 = arith.constant 0 : index
    %25 = vector.load %arg9[%c1_45, %c2_46, %c0_47] : memref<18x18x8xf32, #tpu.memory_space<vmem>>, vector<16x16x8xf32>
    %26 = vector.shape_cast %25 : vector<16x16x8xf32> to vector<256x8xf32>
    %c2_48 = arith.constant 2 : index
    %c0_49 = arith.constant 0 : index
    %c0_50 = arith.constant 0 : index
    %27 = vector.load %arg9[%c2_48, %c0_49, %c0_50] : memref<18x18x8xf32, #tpu.memory_space<vmem>>, vector<16x16x8xf32>
    %28 = vector.shape_cast %27 : vector<16x16x8xf32> to vector<256x8xf32>
    %c2_51 = arith.constant 2 : index
    %c1_52 = arith.constant 1 : index
    %c0_53 = arith.constant 0 : index
    %29 = vector.load %arg9[%c2_51, %c1_52, %c0_53] : memref<18x18x8xf32, #tpu.memory_space<vmem>>, vector<16x16x8xf32>
    %30 = vector.shape_cast %29 : vector<16x16x8xf32> to vector<256x8xf32>
    %c2_54 = arith.constant 2 : index
    %c2_55 = arith.constant 2 : index
    %c0_56 = arith.constant 0 : index
    %31 = vector.load %arg9[%c2_54, %c2_55, %c0_56] : memref<18x18x8xf32, #tpu.memory_space<vmem>>, vector<16x16x8xf32>
    %32 = vector.shape_cast %31 : vector<16x16x8xf32> to vector<256x8xf32>
    %33 = tpu.concatenate %16, %18, %20, %22, %24, %26, %28, %30, %32 in 1 : vector<256x8xf32>, vector<256x8xf32>, vector<256x8xf32>, vector<256x8xf32>, vector<256x8xf32>, vector<256x8xf32>, vector<256x8xf32>, vector<256x8xf32>, vector<256x8xf32> -> vector<256x72xf32>
    %c0_57 = arith.constant 0 : index
    %c0_58 = arith.constant 0 : index
    %34 = vector.load %arg2[%c0_57, %c0_58] : memref<72x8xf32, #tpu.memory_space<vmem>>, vector<72x8xf32>
    %cst_59 = arith.constant dense<0.000000e+00> : vector<256x8xf32>
    %35 = tpu.matmul %33, %34, %cst_59 {dimension_numbers = #tpu.dot_dimension_numbers<[1], [0], [0], [1], [0, 0, 1, 1], [], []>} : vector<256x72xf32>, vector<72x8xf32>, vector<256x8xf32> -> vector<256x8xf32>
    %c0_60 = arith.constant 0 : index
    %c0_61 = arith.constant 0 : index
    %36 = vector.load %arg4[%c0_60, %c0_61] : memref<1x8xf32, #tpu.memory_space<vmem>>, vector<1x8xf32>
    %37 = vector.broadcast %36 : vector<1x8xf32> to vector<256x8xf32>
    %38 = arith.mulf %35, %37 : vector<256x8xf32>
    %c0_62 = arith.constant 0 : index
    %c0_63 = arith.constant 0 : index
    %39 = vector.load %arg5[%c0_62, %c0_63] : memref<1x8xf32, #tpu.memory_space<vmem>>, vector<1x8xf32>
    %40 = vector.broadcast %39 : vector<1x8xf32> to vector<256x8xf32>
    %41 = arith.addf %38, %40 : vector<256x8xf32>
    %cst_64 = arith.constant 0.000000e+00 : f32
    %42 = vector.broadcast %cst_64 : f32 to vector<256x8xf32>
    %43 = arith.maximumf %41, %42 : vector<256x8xf32>
    %44 = vector.shape_cast %43 : vector<256x8xf32> to vector<16x16x8xf32>
    %c1_65 = arith.constant 1 : index
    %c1_66 = arith.constant 1 : index
    %c0_67 = arith.constant 0 : index
    %45 = vector.load %arg10[%c1_65, %c1_66, %c0_67] : memref<18x18x8xf32, #tpu.memory_space<vmem>>, vector<16x16x8xf32>
    tpu.vector_store %arg10[%c1_65, %c1_66, %c0_67], %44 {strides = array<i32>} : memref<18x18x8xf32, #tpu.memory_space<vmem>>, vector<16x16x8xf32>,
    %c0_68 = arith.constant 0 : index
    %c0_69 = arith.constant 0 : index
    %c0_70 = arith.constant 0 : index
    %46 = vector.load %arg10[%c0_68, %c0_69, %c0_70] : memref<18x18x8xf32, #tpu.memory_space<vmem>>, vector<16x16x8xf32>
    %47 = vector.shape_cast %46 : vector<16x16x8xf32> to vector<256x8xf32>
    %c0_71 = arith.constant 0 : index
    %c1_72 = arith.constant 1 : index
    %c0_73 = arith.constant 0 : index
    %48 = vector.load %arg10[%c0_71, %c1_72, %c0_73] : memref<18x18x8xf32, #tpu.memory_space<vmem>>, vector<16x16x8xf32>
    %49 = vector.shape_cast %48 : vector<16x16x8xf32> to vector<256x8xf32>
    %c0_74 = arith.constant 0 : index
    %c2_75 = arith.constant 2 : index
    %c0_76 = arith.constant 0 : index
    %50 = vector.load %arg10[%c0_74, %c2_75, %c0_76] : memref<18x18x8xf32, #tpu.memory_space<vmem>>, vector<16x16x8xf32>
    %51 = vector.shape_cast %50 : vector<16x16x8xf32> to vector<256x8xf32>
    %c1_77 = arith.constant 1 : index
    %c0_78 = arith.constant 0 : index
    %c0_79 = arith.constant 0 : index
    %52 = vector.load %arg10[%c1_77, %c0_78, %c0_79] : memref<18x18x8xf32, #tpu.memory_space<vmem>>, vector<16x16x8xf32>
    %53 = vector.shape_cast %52 : vector<16x16x8xf32> to vector<256x8xf32>
    %c1_80 = arith.constant 1 : index
    %c1_81 = arith.constant 1 : index
    %c0_82 = arith.constant 0 : index
    %54 = vector.load %arg10[%c1_80, %c1_81, %c0_82] : memref<18x18x8xf32, #tpu.memory_space<vmem>>, vector<16x16x8xf32>
    %55 = vector.shape_cast %54 : vector<16x16x8xf32> to vector<256x8xf32>
    %c1_83 = arith.constant 1 : index
    %c2_84 = arith.constant 2 : index
    %c0_85 = arith.constant 0 : index
    %56 = vector.load %arg10[%c1_83, %c2_84, %c0_85] : memref<18x18x8xf32, #tpu.memory_space<vmem>>, vector<16x16x8xf32>
    %57 = vector.shape_cast %56 : vector<16x16x8xf32> to vector<256x8xf32>
    %c2_86 = arith.constant 2 : index
    %c0_87 = arith.constant 0 : index
    %c0_88 = arith.constant 0 : index
    %58 = vector.load %arg10[%c2_86, %c0_87, %c0_88] : memref<18x18x8xf32, #tpu.memory_space<vmem>>, vector<16x16x8xf32>
    %59 = vector.shape_cast %58 : vector<16x16x8xf32> to vector<256x8xf32>
    %c2_89 = arith.constant 2 : index
    %c1_90 = arith.constant 1 : index
    %c0_91 = arith.constant 0 : index
    %60 = vector.load %arg10[%c2_89, %c1_90, %c0_91] : memref<18x18x8xf32, #tpu.memory_space<vmem>>, vector<16x16x8xf32>
    %61 = vector.shape_cast %60 : vector<16x16x8xf32> to vector<256x8xf32>
    %c2_92 = arith.constant 2 : index
    %c2_93 = arith.constant 2 : index
    %c0_94 = arith.constant 0 : index
    %62 = vector.load %arg10[%c2_92, %c2_93, %c0_94] : memref<18x18x8xf32, #tpu.memory_space<vmem>>, vector<16x16x8xf32>
    %63 = vector.shape_cast %62 : vector<16x16x8xf32> to vector<256x8xf32>
    %64 = tpu.concatenate %47, %49, %51, %53, %55, %57, %59, %61, %63 in 1 : vector<256x8xf32>, vector<256x8xf32>, vector<256x8xf32>, vector<256x8xf32>, vector<256x8xf32>, vector<256x8xf32>, vector<256x8xf32>, vector<256x8xf32>, vector<256x8xf32> -> vector<256x72xf32>
    %c0_95 = arith.constant 0 : index
    %c0_96 = arith.constant 0 : index
    %65 = vector.load %arg3[%c0_95, %c0_96] : memref<72x8xf32, #tpu.memory_space<vmem>>, vector<72x8xf32>
    %cst_97 = arith.constant dense<0.000000e+00> : vector<256x8xf32>
    %66 = tpu.matmul %64, %65, %cst_97 {dimension_numbers = #tpu.dot_dimension_numbers<[1], [0], [0], [1], [0, 0, 1, 1], [], []>} : vector<256x72xf32>, vector<72x8xf32>, vector<256x8xf32> -> vector<256x8xf32>
    %c0_98 = arith.constant 0 : index
    %c0_99 = arith.constant 0 : index
    %67 = vector.load %arg6[%c0_98, %c0_99] : memref<1x8xf32, #tpu.memory_space<vmem>>, vector<1x8xf32>
    %68 = vector.broadcast %67 : vector<1x8xf32> to vector<256x8xf32>
    %69 = arith.mulf %66, %68 : vector<256x8xf32>
    %c0_100 = arith.constant 0 : index
    %c0_101 = arith.constant 0 : index
    %70 = vector.load %arg7[%c0_100, %c0_101] : memref<1x8xf32, #tpu.memory_space<vmem>>, vector<1x8xf32>
    %71 = vector.broadcast %70 : vector<1x8xf32> to vector<256x8xf32>
    %72 = arith.addf %69, %71 : vector<256x8xf32>
    %73 = vector.shape_cast %72 : vector<256x8xf32> to vector<16x16x8xf32>
    %74 = arith.addf %73, %13 : vector<16x16x8xf32>
    %cst_102 = arith.constant 0.000000e+00 : f32
    %75 = vector.broadcast %cst_102 : f32 to vector<16x16x8xf32>
    %76 = arith.maximumf %74, %75 : vector<16x16x8xf32>
    %c0_103 = arith.constant 0 : index
    %c0_104 = arith.constant 0 : index
    %c0_105 = arith.constant 0 : index
    %c0_106 = arith.constant 0 : index
    %77 = vector.load %arg8[%c0_103, %c0_104, %c0_105, %c0_106] : memref<1x16x16x8xf32, #tpu.memory_space<vmem>>, vector<1x16x16x8xf32>
    %78 = vector.shape_cast %77 : vector<1x16x16x8xf32> to vector<16x16x8xf32>
    %79 = vector.shape_cast %76 : vector<16x16x8xf32> to vector<1x16x16x8xf32>
    tpu.vector_store %arg8[%c0_103, %c0_104, %c0_105, %c0_106], %79 {strides = array<i32>} : memref<1x16x16x8xf32, #tpu.memory_space<vmem>>, vector<1x16x16x8xf32>,
    return
  }
  func.func @transform_0(%arg0: i32) -> (i32, i32, i32, i32) {
    %c0_i32 = arith.constant 0 : i32
    %c0_i32_0 = arith.constant 0 : i32
    %c0_i32_1 = arith.constant 0 : i32
    %c0_i32_2 = arith.constant 0 : i32
    return %arg0, %c0_i32, %c0_i32_0, %c0_i32_1 : i32, i32, i32, i32
  }
  func.func @transform_1(%arg0: i32) -> (i32, i32) {
    %c0_i32 = arith.constant 0 : i32
    %c0_i32_0 = arith.constant 0 : i32
    %c0_i32_1 = arith.constant 0 : i32
    return %c0_i32, %c0_i32_0 : i32, i32
  }
  func.func @transform_2(%arg0: i32) -> (i32, i32) {
    %c0_i32 = arith.constant 0 : i32
    %c0_i32_0 = arith.constant 0 : i32
    %c0_i32_1 = arith.constant 0 : i32
    return %c0_i32, %c0_i32_0 : i32, i32
  }
  func.func @transform_3(%arg0: i32) -> (i32, i32) {
    %c0_i32 = arith.constant 0 : i32
    %c0_i32_0 = arith.constant 0 : i32
    %c0_i32_1 = arith.constant 0 : i32
    return %c0_i32, %c0_i32_0 : i32, i32
  }
  func.func @transform_4(%arg0: i32) -> (i32, i32) {
    %c0_i32 = arith.constant 0 : i32
    %c0_i32_0 = arith.constant 0 : i32
    %c0_i32_1 = arith.constant 0 : i32
    return %c0_i32, %c0_i32_0 : i32, i32
  }
  func.func @transform_5(%arg0: i32) -> (i32, i32) {
    %c0_i32 = arith.constant 0 : i32
    %c0_i32_0 = arith.constant 0 : i32
    %c0_i32_1 = arith.constant 0 : i32
    return %c0_i32, %c0_i32_0 : i32, i32
  }
  func.func @transform_6(%arg0: i32) -> (i32, i32) {
    %c0_i32 = arith.constant 0 : i32
    %c0_i32_0 = arith.constant 0 : i32
    %c0_i32_1 = arith.constant 0 : i32
    return %c0_i32, %c0_i32_0 : i32, i32
  }
  func.func @transform_7(%arg0: i32) -> (i32, i32, i32, i32) {
    %c0_i32 = arith.constant 0 : i32
    %c0_i32_0 = arith.constant 0 : i32
    %c0_i32_1 = arith.constant 0 : i32
    %c0_i32_2 = arith.constant 0 : i32
    return %arg0, %c0_i32, %c0_i32_0, %c0_i32_1 : i32, i32, i32, i32
  }
}

</mosaic_0001>

<bundles_post_ra>
// kernel: tpu_custom_call.1
= control target key start
LH: loop header
LB: loop body
LE: loop exit
PB: predicated region body
PF: predicated region fallthrough
CT: control target
= control target key end

     0   :  { %s4591_s24 = smov 0   ;;  %s8201_s0 = inlined_call_operand.vmem [shape: f32[2,16,16,8], index: 0, kind: input, shape index: {}]   ;;  %s8202_s1 = inlined_call_operand.vmem [shape: f32[72,8], index: 1, kind: input, shape index: {}]   ;;  %s8203_s2 = inlined_call_operand.vmem [shape: f32[72,8], index: 2, kind: input, shape index: {}]   ;;  %s8204_s3 = inlined_call_operand.vmem [shape: f32[1,8], index: 3, kind: input, shape index: {}]   ;;  %s8205_s4 = inlined_call_operand.vmem [shape: f32[1,8], index: 4, kind: input, shape index: {}]   ;;  %s8206_s5 = inlined_call_operand.vmem [shape: f32[1,8], index: 5, kind: input, shape index: {}]   ;;  %s8207_s6 = inlined_call_operand.vmem [shape: f32[1,8], index: 6, kind: input, shape index: {}]   ;;  %s8208_s7 = inlined_call_operand.vmem [shape: f32[2,16,16,8], index: 7, kind: output, shape index: {}]  }
   0x1 LB: > { %s4375_s25 = sadd.s32 4294967295, %s4540_s24   ;;  %p4379_p0 = scmp.ge.s32.totalorder %s4540_s24, 1  ;;  %s4540_s24 = sphi %s4591_s24, %s17_s24  }
   0x2   : > { %p237_p1 = scmp.lt.s32.totalorder %s4540_s24, 3 }
   0x4   : > { %p238_p2 = pnand %p4379_p0, %p237_p1 }
   0x6   : > { %241 = sbr.rel (%p238_p2) target bundleno = 1880 (0x758), region = 48 }
   0xb   : > { %vm279_vm0 = vcmask 64512   ;;  %p269_p3 = scmp.lt.s32.totalorder %s4375_s25, 1  ;;  %v4542_v0 = vmov 0.0   ;;  %vm282_vm1 = vcmask 58368   ;;  %s4543_s30 = smov 8   ;;  %vm288_vm2 = vcmask 57344  }
   0xc   : > { %280 = vst.msk [vmem:[#allocation2] sm:$0xff] %vm279_vm0, %v4542_v0  ;;  %s4544_s8 = smov 16   ;;  %s4545_s9 = smov 24   ;;  %vm1778_vm3 = vcmask 130048   ;;  %vm1811_vm4 = vcmask 195584   ;;  %vm1877_vm5 = vcmask 326656  }
   0xd   : > { %281 = vst.msk [vmem:[#allocation2 + $0x8] sm:$0xff] %vm279_vm0, %v4542_v0  ;;  %s8938_s25 = smov (!%p269_p3, %s4375_s25), 1  ;;  %s4546_s10 = smov 32   ;;  %vm1844_vm6 = vcmask 261120   ;;  %vm1910_vm7 = vcmask 392192   ;;  %vm1976_vm8 = vcmask 523264  }
   0xe   : > { %285 = vst.msk [vmem:[#allocation2 + $0x198] sm:$0xff] %vm279_vm0, %v4542_v0  ;;  %s4450_s26 = sshll.u32 %s8938_s25, 8  ;;  %s4547_s11 = smov 40   ;;  %vm1943_vm9 = vcmask 457728   ;;  %vm2018_vm10 = vcmask 588800  }
   0xf   : > { %286 = vst.msk [vmem:[#allocation2 + $0x1a0] sm:$0xff] %vm279_vm0, %v4542_v0  ;;  %s4617_s29 = scalar_lea.vmem %s8201_s0, %s4450_s26  ;;  %s4548_s12 = smov 48  }
  0x10   : > { %325 = vst.msk [vmem:[#allocation3] sm:$0xff] %vm279_vm0, %v4542_v0  ;;  %v4622_v1 = vld [vmem:[%s4617_s29 + $0x10] sm:$0xff]  ;;  %v4627_v2 = vld [vmem:[%s4617_s29] sm:$0xff]  ;;  %v4639_v4 = vld [vmem:[%s4617_s29 + $0x18] sm:$0xff]  ;;  %s4549_s13 = smov 56   ;;  %s4550_s14 = smov 64  }
  0x11   : > { %326 = vst.msk [vmem:[#allocation3 + $0x8] sm:$0xff] %vm279_vm0, %v4542_v0  ;;  %v4643_v5 = vld [vmem:[%s4617_s29 + $0x8] sm:$0xff]  ;;  %v4647_v6 = vld [vmem:[%s4617_s29 + $0x20] sm:$0xff]  ;;  %v4652_v7 = vld [vmem:[%s4617_s29 + $0x30] sm:$0xff]  ;;  %s7911_s16 = scalar_lea.vmem %s8208_s7, %s4450_s26 }
  0x12   : > { %8291 = vst [vmem:[#allocation4_spill] sm:$0xff] %v4622_v1  ;;  %v4659_v9 = vld [vmem:[%s4617_s29 + $0x28] sm:$0xff]  ;;  %v4668_v11 = vld [vmem:[%s4617_s29 + $0x38] sm:$0xff]  ;;  %v4681_v14 = vld [vmem:[%s4617_s29 + $0x40] sm:$0xff] }
  0x13   : > { %329 = vst.msk [vmem:[#allocation3 + $0x198] sm:$0xff] %vm279_vm0, %v4542_v0  ;;  %v4675_v13 = vld [vmem:[%s4617_s29 + $0x48] sm:$0xff]  ;;  %v4686_v15 = vld [vmem:[%s4617_s29 + $0x50] sm:$0xff]  ;;  %v4691_v16 = vld [vmem:[%s4617_s29 + $0x60] sm:$0xff] }
  0x14   : > { %8292 = vst [vmem:[#allocation5_spill] sm:$0xff] %v4627_v2  ;;  %v465_v3 = vld [vmem:[#allocation2 + $0x1] sm:$0xff]  ;;  %v4698_v18 = vld [vmem:[%s4617_s29 + $0x58] sm:$0xff]  ;;  %v4719_v23 = vld [vmem:[%s4617_s29 + $0x70] sm:$0xff] }
  0x15   : > { %330 = vst.msk [vmem:[#allocation3 + $0x1a0] sm:$0xff] %vm279_vm0, %v4542_v0  ;;  %754 = vrot.lane.b32.xlu0 %v465_v3, %s4543_s30  ;;  %v4705_v20 = vld [vmem:[%s4617_s29 + $0x68] sm:$0xff]  ;;  %v4712_v22 = vld [vmem:[%s4617_s29 + $0x78] sm:$0xff]  ;;  %v4726_v24 = vld [vmem:[%s4617_s29 + $0x80] sm:$0xff] }
  0x16   : > { %403 = vst.msk [vmem:[#allocation2 + $0x31] sm:$0xff] %vm279_vm0, %v4622_v1  ;;  %v4733_v25 = vld [vmem:[%s4617_s29 + $0x90] sm:$0xff]  ;;  %v4738_v26 = vld [vmem:[%s4617_s29 + $0x88] sm:$0xff]  ;;  %v4743_v27 = vld [vmem:[%s4617_s29 + $0x98] sm:$0xff] }
  0x17   : > { %401 = vst.msk [vmem:[#allocation2 + $0x19] sm:$0xff] %vm279_vm0, %v4627_v2  ;;  %v4760_v31 = vld [vmem:[%s4617_s29 + $0xa8] sm:$0xff]  ;;  %v4763_v32 = vld [vmem:[%s4617_s29 + $0xa0] sm:$0xff]  ;;  %v4774_v33 = vld [vmem:[%s4617_s29 + $0xb0] sm:$0xff] }
  0x18   : > { %283 = vst.msk [vmem:[#allocation2 + $0x10] sm:$0x3] %vm282_vm1, %v4542_v0  ;;  %v4787_v37 = vld [vmem:[%s4617_s29 + $0xc0] sm:$0xff]  ;;  %v4790_v38 = vld [vmem:[%s4617_s29 + $0xb8] sm:$0xff]  ;;  %v4801_v39 = vld [vmem:[%s4617_s29 + $0xc8] sm:$0xff] }
  0x19   : > { %287 = vst.msk [vmem:[#allocation2 + $0x1a8] sm:$0x3] %vm282_vm1, %v4542_v0  ;;  %v4814_v43 = vld [vmem:[%s4617_s29 + $0xd8] sm:$0xff]  ;;  %v4817_v44 = vld [vmem:[%s4617_s29 + $0xd0] sm:$0xff]  ;;  %v4828_v45 = vld [vmem:[%s4617_s29 + $0xe0] sm:$0xff] }
  0x1a   : > { %8293 = vst [vmem:[#allocation6_spill] sm:$0xff] %v4639_v4  ;;  %v4841_v49 = vld [vmem:[%s4617_s29 + $0xe8] sm:$0xff] }
  0x1b   : > { %327 = vst.msk [vmem:[#allocation3 + $0x10] sm:$0x3] %vm282_vm1, %v4542_v0  ;;  %v497_v62 = vld [vmem:[#allocation2 + $0x2] sm:$0xff] }
  0x1c   : > { %8294 = vst [vmem:[#allocation7_spill] sm:$0xff] %v4643_v5 }
  0x1d   : > { %331 = vst.msk [vmem:[#allocation3 + $0x1a8] sm:$0x3] %vm282_vm1, %v4542_v0  ;;  %v4654_v8 = vld [vmem:[#allocation2 + $0x31] sm:$0xff] }
  0x1e   : > { %8295 = vst [vmem:[#allocation8_spill] sm:$0xff] %v4647_v6  ;;  %762 = vrot.lane.b32.xlu2 %v4654_v8, %s4543_s30  ;;  %v4663_v10 = vld [vmem:[#allocation2 + $0x19] sm:$0xff] }
  0x1f   : > { %404 = vst.msk [vmem:[#allocation2 + $0x39] sm:$0xff] %vm279_vm0, %v4639_v4  ;;  %758 = vrot.lane.b32.xlu1 %v4663_v10, %s4543_s30  ;;  %v466_v12 = vld [vmem:[#allocation2 + $0x9] sm:$0xff] }
  0x20   : > { %8296 = vst [vmem:[#allocation9_spill] sm:$0xff] %v4652_v7  ;;  %756 = vrot.lane.b32.xlu0 %v466_v12, %s4543_s30 }
  0x21   : > { %402 = vst.msk [vmem:[#allocation2 + $0x21] sm:$0xff] %vm279_vm0, %v4643_v5 }
  0x22   : > { %8297 = vst [vmem:[#allocation10_spill] sm:$0xff] %v4659_v9 }
  0x23   : > { %405 = vst.msk [vmem:[#allocation2 + $0x49] sm:$0xff] %vm279_vm0, %v4647_v6 }
  0x24   : > { %8298 = vst [vmem:[#allocation11_spill] sm:$0xff] %v4668_v11 }
  0x25   : > { %407 = vst.msk [vmem:[#allocation2 + $0x61] sm:$0xff] %vm279_vm0, %v4652_v7 }
  0x26   : > { %8299 = vst [vmem:[#allocation12_spill] sm:$0xff] %v4675_v13  ;;  %v4693_v17 = vld [vmem:[#allocation2 + $0x39] sm:$0xff] }
  0x27   : > { %406 = vst.msk [vmem:[#allocation2 + $0x51] sm:$0xff] %vm279_vm0, %v4659_v9  ;;  %764 = vrot.lane.b32.xlu2 %v4693_v17, %s4543_s30 }
  0x28   : > { %8300 = vst [vmem:[#allocation13_spill] sm:$0xff] %v4681_v14  ;;  %v4700_v19 = vld [vmem:[#allocation2 + $0x21] sm:$0xff] }
  0x29   : > { %408 = vst.msk [vmem:[#allocation2 + $0x69] sm:$0xff] %vm279_vm0, %v4668_v11  ;;  %760 = vrot.lane.b32.xlu1 %v4700_v19, %s4543_s30 }
  0x2a   : > { %8301 = vst [vmem:[#allocation14_spill] sm:$0xff] %v4686_v15  ;;  %v4707_v21 = vld [vmem:[#allocation2 + $0x49] sm:$0xff] }
  0x2b   : > { %410 = vst.msk [vmem:[#allocation2 + $0x81] sm:$0xff] %vm279_vm0, %v4675_v13  ;;  %766 = vrot.lane.b32.xlu0 %v4707_v21, %s4543_s30 }
  0x2c   : > { %8302 = vst [vmem:[#allocation15_spill] sm:$0xff] %v4691_v16  ;;  %v4745_v28 = vld [vmem:[#allocation2 + $0x61] sm:$0xff] }
  0x2d   : > { %409 = vst.msk [vmem:[#allocation2 + $0x79] sm:$0xff] %vm279_vm0, %v4681_v14 }
  0x2e   : > { %8303 = vst [vmem:[#allocation16_spill] sm:$0xff] %v4698_v18  ;;  %v4749_v29 = vld [vmem:[#allocation2 + $0x51] sm:$0xff] }
  0x2f   : > { %411 = vst.msk [vmem:[#allocation2 + $0x91] sm:$0xff] %vm279_vm0, %v4686_v15  ;;  %770 = vrot.lane.b32.xlu2 %v4745_v28, %s4543_s30 }
  0x30   : > { %8304 = vst [vmem:[#allocation17_spill] sm:$0xff] %v4705_v20  ;;  %v4753_v30 = vld [vmem:[#allocation2 + $0x69] sm:$0xff] }
  0x31   : > { %413 = vst.msk [vmem:[#allocation2 + $0xa9] sm:$0xff] %vm279_vm0, %v4691_v16  ;;  %768 = vrot.lane.b32.xlu1 %v4749_v29, %s4543_s30 }
  0x32   : > { %8305 = vst [vmem:[#allocation18_spill] sm:$0xff] %v4712_v22  ;;  %v4778_v34 = vld [vmem:[#allocation2 + $0x81] sm:$0xff] }
  0x33   : > { %412 = vst.msk [vmem:[#allocation2 + $0x99] sm:$0xff] %vm279_vm0, %v4698_v18  ;;  %772 = vrot.lane.b32.xlu0 %v4753_v30, %s4543_s30  ;;  %v5053_v18 = vld [vmem:[#allocation2 + $0x62] sm:$0xff] }
  0x34   : > { %8306 = vst [vmem:[#allocation19_spill] sm:$0xff] %v4719_v23  ;;  %v4780_v35 = vld [vmem:[#allocation2 + $0x79] sm:$0xff] }
  0x35   : > { %414 = vst.msk [vmem:[#allocation2 + $0xb1] sm:$0xff] %vm279_vm0, %v4705_v20 }
  0x36   : > { %8307 = vst [vmem:[#allocation20_spill] sm:$0xff] %v4726_v24  ;;  %v4782_v36 = vld [vmem:[#allocation2 + $0x91] sm:$0xff] }
  0x37   : > { %416 = vst.msk [vmem:[#allocation2 + $0xc9] sm:$0xff] %vm279_vm0, %v4712_v22  ;;  %776 = vrot.lane.b32.xlu2 %v4778_v34, %s4543_s30 }
  0x38   : > { %8308 = vst [vmem:[#allocation21_spill] sm:$0xff] %v4733_v25  ;;  %v4805_v40 = vld [vmem:[#allocation2 + $0xa9] sm:$0xff] }
  0x39   : > { %415 = vst.msk [vmem:[#allocation2 + $0xc1] sm:$0xff] %vm279_vm0, %v4719_v23  ;;  %774 = vrot.lane.b32.xlu1 %v4780_v35, %s4543_s30  ;;  %v5019_v23 = vld [vmem:[#allocation2 + $0x4a] sm:$0xff] }
  0x3a   : > { %8309 = vst [vmem:[#allocation22_spill] sm:$0xff] %v4738_v26  ;;  %v4807_v41 = vld [vmem:[#allocation2 + $0x99] sm:$0xff] }
  0x3b   : > { %417 = vst.msk [vmem:[#allocation2 + $0xd9] sm:$0xff] %vm279_vm0, %v4726_v24  ;;  %778 = vrot.lane.b32.xlu0 %v4782_v36, %s4543_s30 }
  0x3c   : > { %8310 = vst [vmem:[#allocation23_spill] sm:$0xff] %v4743_v27  ;;  %v4809_v42 = vld [vmem:[#allocation2 + $0xb1] sm:$0xff] }
  0x3d   : > { %419 = vst.msk [vmem:[#allocation2 + $0xf1] sm:$0xff] %vm279_vm0, %v4733_v25  ;;  %v5111_v7 = vld [vmem:[#allocation2 + $0xaa] sm:$0xff] }
  0x3e   : > { %418 = vst.msk [vmem:[#allocation2 + $0xe1] sm:$0xff] %vm279_vm0, %v4738_v26  ;;  %v4832_v46 = vld [vmem:[#allocation2 + $0xc9] sm:$0xff] }
  0x3f   : > { %420 = vst.msk [vmem:[#allocation2 + $0xf9] sm:$0xff] %vm279_vm0, %v4743_v27  ;;  %782 = vrot.lane.b32.xlu2 %v4805_v40, %s4543_s30 }
  0x40   : > { %8311 = vst [vmem:[#allocation24_spill] sm:$0xff] %v4760_v31  ;;  %v4834_v47 = vld [vmem:[#allocation2 + $0xc1] sm:$0xff] }
  0x41   : > { %8312 = vst [vmem:[#allocation25_spill] sm:$0xff] %v4763_v32  ;;  %780 = vrot.lane.b32.xlu1 %v4807_v41, %s4543_s30 }
  0x42   : > { %422 = vst.msk [vmem:[#allocation2 + $0x111] sm:$0xff] %vm279_vm0, %v4760_v31  ;;  %v4836_v48 = vld [vmem:[#allocation2 + $0xd9] sm:$0xff]  ;;  %v5113_v31 = vld [vmem:[#allocation2 + $0xc2] sm:$0xff] }
  0x43   : > { %421 = vst.msk [vmem:[#allocation2 + $0x109] sm:$0xff] %vm279_vm0, %v4763_v32  ;;  %784 = vrot.lane.b32.xlu0 %v4809_v42, %s4543_s30 }
  0x44   : > { %8313 = vst [vmem:[#allocation26_spill] sm:$0xff] %v4774_v33  ;;  %v4853_v50 = vld [vmem:[#allocation2 + $0xf1] sm:$0xff] }
  0x45   : > { %423 = vst.msk [vmem:[#allocation2 + $0x121] sm:$0xff] %vm279_vm0, %v4774_v33  ;;  %v4857_v51 = vld [vmem:[#allocation2 + $0xe1] sm:$0xff] }
  0x46   : > { %8314 = vst [vmem:[#allocation27_spill] sm:$0xff] %v4787_v37  ;;  %v4861_v52 = vld [vmem:[#allocation2 + $0xf9] sm:$0xff] }
  0x47   : > { %8315 = vst [vmem:[#allocation28_spill] sm:$0xff] %v4790_v38  ;;  %788 = vrot.lane.b32.xlu2 %v4832_v46, %s4543_s30  ;;  %v5127_v6 = vld [vmem:[#allocation2 + $0xda] sm:$0xff]  ;;  %v5147_v24 = vld [vmem:[#allocation2 + $0xf2] sm:$0xff] }
  0x48   : > { %425 = vst.msk [vmem:[#allocation2 + $0x139] sm:$0xff] %vm279_vm0, %v4787_v37 }
  0x49   : > { %424 = vst.msk [vmem:[#allocation2 + $0x129] sm:$0xff] %vm279_vm0, %v4790_v38  ;;  %786 = vrot.lane.b32.xlu1 %v4834_v47, %s4543_s30  ;;  %v4881_v53 = vld [vmem:[#allocation2 + $0x111] sm:$0xff] }
  0x4a   : > { %8316 = vst [vmem:[#allocation29_spill] sm:$0xff] %v4801_v39  ;;  %v4885_v54 = vld [vmem:[#allocation2 + $0x109] sm:$0xff] }
  0x4b   : > { %426 = vst.msk [vmem:[#allocation2 + $0x141] sm:$0xff] %vm279_vm0, %v4801_v39  ;;  %790 = vrot.lane.b32.xlu0 %v4836_v48, %s4543_s30  ;;  %v5081_v39 = vld [vmem:[#allocation2 + $0x92] sm:$0xff]  ;;  %v5149_v2 = vld [vmem:[#allocation2 + $0x10a] sm:$0xff] }
  0x4c   : > { %8317 = vst [vmem:[#allocation30_spill] sm:$0xff] %v4814_v43  ;;  %v4889_v55 = vld [vmem:[#allocation2 + $0x121] sm:$0xff] }
  0x4d   : > { %8318 = vst [vmem:[#allocation31_spill] sm:$0xff] %v4817_v44 }
  0x4e   : > { %428 = vst.msk [vmem:[#allocation2 + $0x159] sm:$0xff] %vm279_vm0, %v4814_v43  ;;  %v5057_v43 = vld [vmem:[#allocation2 + $0x7a] sm:$0xff] }
  0x4f   : > { %427 = vst.msk [vmem:[#allocation2 + $0x151] sm:$0xff] %vm279_vm0, %v4817_v44  ;;  %794 = vrot.lane.b32.xlu2 %v4853_v50, %s4543_s30  ;;  %v4909_v56 = vld [vmem:[#allocation2 + $0x139] sm:$0xff] }
  0x50   : > { %8319 = vst [vmem:[#allocation32_spill] sm:$0xff] %v4828_v45  ;;  %v4913_v57 = vld [vmem:[#allocation2 + $0x129] sm:$0xff] }
  0x51   : > { %429 = vst.msk [vmem:[#allocation2 + $0x169] sm:$0xff] %vm279_vm0, %v4828_v45  ;;  %792 = vrot.lane.b32.xlu1 %v4857_v51, %s4543_s30 }
  0x52   : > { %8320 = vst [vmem:[#allocation33_spill] sm:$0xff] %v4841_v49  ;;  %v4917_v58 = vld [vmem:[#allocation2 + $0x141] sm:$0xff] }
  0x53   : > { %430 = vst.msk [vmem:[#allocation2 + $0x171] sm:$0xff] %vm279_vm0, %v4841_v49  ;;  %796 = vrot.lane.b32.xlu0 %v4861_v52, %s4543_s30 }
  0x54   : > { %307 = vst.msk [vmem:[#allocation2 + $0x11] sm:$0x1] %vm288_vm2, %v4542_v0 }
  0x55   : > { %289 = vst.msk [vmem:[#allocation2] sm:$0x1] %vm288_vm2, %v4542_v0  ;;  %v4937_v59 = vld [vmem:[#allocation2 + $0x159] sm:$0xff] }
  0x56   : > { %290 = vst.msk [vmem:[#allocation2 + $0x18] sm:$0x1] %vm288_vm2, %v4542_v0  ;;  %v4941_v60 = vld [vmem:[#allocation2 + $0x151] sm:$0xff] }
  0x57   : > { %291 = vst.msk [vmem:[#allocation2 + $0x30] sm:$0x1] %vm288_vm2, %v4542_v0  ;;  %800 = vrot.lane.b32.xlu2 %v4881_v53, %s4543_s30 }
  0x58   : > { %292 = vst.msk [vmem:[#allocation2 + $0x48] sm:$0x1] %vm288_vm2, %v4542_v0  ;;  %v4945_v61 = vld [vmem:[#allocation2 + $0x169] sm:$0xff] }
  0x59   : > { %293 = vst.msk [vmem:[#allocation2 + $0x60] sm:$0x1] %vm288_vm2, %v4542_v0  ;;  %798 = vrot.lane.b32.xlu1 %v4885_v54, %s4543_s30 }
  0x5a   : > { %294 = vst.msk [vmem:[#allocation2 + $0x78] sm:$0x1] %vm288_vm2, %v4542_v0  ;;  %v4967_v63 = vld [vmem:[#allocation2 + $0x171] sm:$0xff] }
  0x5b   : > { %295 = vst.msk [vmem:[#allocation2 + $0x90] sm:$0x1] %vm288_vm2, %v4542_v0  ;;  %802 = vrot.lane.b32.xlu0 %v4889_v55, %s4543_s30  ;;  %v498_v3 = vld [vmem:[#allocation2 + $0xa] sm:$0xff] }
  0x5c   : > { %296 = vst.msk [vmem:[#allocation2 + $0xa8] sm:$0x1] %vm288_vm2, %v4542_v0 }
  0x5d   : > { %297 = vst.msk [vmem:[#allocation2 + $0xc0] sm:$0x1] %vm288_vm2, %v4542_v0 }
  0x5e   : > { %298 = vst.msk [vmem:[#allocation2 + $0xd8] sm:$0x1] %vm288_vm2, %v4542_v0 }
  0x5f   : > { %299 = vst.msk [vmem:[#allocation2 + $0xf0] sm:$0x1] %vm288_vm2, %v4542_v0  ;;  %806 = vrot.lane.b32.xlu2 %v4909_v56, %s4543_s30 }
  0x60   : > { %300 = vst.msk [vmem:[#allocation2 + $0x108] sm:$0x1] %vm288_vm2, %v4542_v0 }
  0x61   : > { %301 = vst.msk [vmem:[#allocation2 + $0x120] sm:$0x1] %vm288_vm2, %v4542_v0  ;;  %804 = vrot.lane.b32.xlu1 %v4913_v57, %s4543_s30 }
  0x62   : > { %302 = vst.msk [vmem:[#allocation2 + $0x138] sm:$0x1] %vm288_vm2, %v4542_v0 }
  0x63   : > { %303 = vst.msk [vmem:[#allocation2 + $0x150] sm:$0x1] %vm288_vm2, %v4542_v0  ;;  %808 = vrot.lane.b32.xlu0 %v4917_v58, %s4543_s30 }
  0x64   : > { %304 = vst.msk [vmem:[#allocation2 + $0x168] sm:$0x1] %vm288_vm2, %v4542_v0 }
  0x65   : > { %305 = vst.msk [vmem:[#allocation2 + $0x180] sm:$0x1] %vm288_vm2, %v4542_v0 }
  0x66   : > { %306 = vst.msk [vmem:[#allocation2 + $0x198] sm:$0x1] %vm288_vm2, %v4542_v0 }
  0x67   : > { %308 = vst.msk [vmem:[#allocation2 + $0x29] sm:$0x1] %vm288_vm2, %v4542_v0  ;;  %812 = vrot.lane.b32.xlu2 %v4937_v59, %s4543_s30 }
  0x68   : > { %309 = vst.msk [vmem:[#allocation2 + $0x41] sm:$0x1] %vm288_vm2, %v4542_v0 }
  0x69   : > { %310 = vst.msk [vmem:[#allocation2 + $0x59] sm:$0x1] %vm288_vm2, %v4542_v0  ;;  %810 = vrot.lane.b32.xlu1 %v4941_v60, %s4543_s30 }
  0x6a   : > { %311 = vst.msk [vmem:[#allocation2 + $0x71] sm:$0x1] %vm288_vm2, %v4542_v0 }
  0x6b   : > { %312 = vst.msk [vmem:[#allocation2 + $0x89] sm:$0x1] %vm288_vm2, %v4542_v0  ;;  %814 = vrot.lane.b32.xlu0 %v4945_v61, %s4543_s30 }
  0x6c   : > { %313 = vst.msk [vmem:[#allocation2 + $0xa1] sm:$0x1] %vm288_vm2, %v4542_v0 }
  0x6d   : > { %314 = vst.msk [vmem:[#allocation2 + $0xb9] sm:$0x1] %vm288_vm2, %v4542_v0 }
  0x6e   : > { %315 = vst.msk [vmem:[#allocation2 + $0xd1] sm:$0x1] %vm288_vm2, %v4542_v0  ;;  %v4989_v12 = vld [vmem:[#allocation2 + $0x22] sm:$0xff] }
  0x6f   : > { %316 = vst.msk [vmem:[#allocation2 + $0xe9] sm:$0x1] %vm288_vm2, %v4542_v0  ;;  %882 = vrot.lane.b32.xlu2 %v497_v62, %s4544_s8  ;;  %v4993_v62 = vld [vmem:[#allocation2 + $0x1a] sm:$0xff] }
  0x70   : > { %317 = vst.msk [vmem:[#allocation2 + $0x101] sm:$0x1] %vm288_vm2, %v4542_v0  ;;  %v5023_v20 = vld [vmem:[#allocation2 + $0x3a] sm:$0xff]  ;;  %v5027_v49 = vld [vmem:[#allocation2 + $0x52] sm:$0xff] }
  0x71   : > { %318 = vst.msk [vmem:[#allocation2 + $0x119] sm:$0x1] %vm288_vm2, %v4542_v0  ;;  %816 = vrot.lane.b32.xlu1 %v4967_v63, %s4543_s30  ;;  %v5049_v45 = vld [vmem:[#allocation2 + $0x6a] sm:$0xff] }
  0x72   : > { %319 = vst.msk [vmem:[#allocation2 + $0x131] sm:$0x1] %vm288_vm2, %v4542_v0  ;;  %v5085_v13 = vld [vmem:[#allocation2 + $0x82] sm:$0xff] }
  0x73   : > { %320 = vst.msk [vmem:[#allocation2 + $0x149] sm:$0x1] %vm288_vm2, %v4542_v0  ;;  %884 = vrot.lane.b32.xlu0 %v498_v3, %s4544_s8  ;;  %v4997_v3 = vld [vmem:[#allocation2 + $0x32] sm:$0xff]  ;;  %v5089_v37 = vld [vmem:[#allocation2 + $0x9a] sm:$0xff] }
  0x74   : > { %321 = vst.msk [vmem:[#allocation2 + $0x161] sm:$0x1] %vm288_vm2, %v4542_v0  ;;  %v5109_v33 = vld [vmem:[#allocation2 + $0xb2] sm:$0xff] }
  0x75   : > { %322 = vst.msk [vmem:[#allocation2 + $0x179] sm:$0x1] %vm288_vm2, %v4542_v0  ;;  %v5129_v27 = vld [vmem:[#allocation2 + $0xca] sm:$0xff] }
  0x76   : > { %323 = vst.msk [vmem:[#allocation2 + $0x191] sm:$0x1] %vm288_vm2, %v4542_v0  ;;  %v5131_v4 = vld [vmem:[#allocation2 + $0xe2] sm:$0xff] }
  0x77   : > { %324 = vst.msk [vmem:[#allocation2 + $0x1a9] sm:$0x1] %vm288_vm2, %v4542_v0  ;;  %888 = vrot.lane.b32.xlu2 %v4989_v12, %s4544_s8  ;;  %v5145_v5 = vld [vmem:[#allocation2 + $0xfa] sm:$0xff] }
  0x78   : > { %332 = vst.msk [vmem:[#allocation3] sm:$0x1] %vm288_vm2, %v4542_v0  ;;  %v5011_v22 = vpop.permute.xlu2 %762 }
  0x79   : > { %333 = vst.msk [vmem:[#allocation3 + $0x18] sm:$0x1] %vm288_vm2, %v4542_v0  ;;  %886 = vrot.lane.b32.xlu1 %v4993_v62, %s4544_s8 }
  0x7a   : > { %334 = vst.msk [vmem:[#allocation3 + $0x30] sm:$0x1] %vm288_vm2, %v4542_v0 }
  0x7b   : > { %335 = vst.msk [vmem:[#allocation3 + $0x48] sm:$0x1] %vm288_vm2, %v4542_v0  ;;  %890 = vrot.lane.b32.xlu0 %v4997_v3, %s4544_s8 }
  0x7c   : > { %336 = vst.msk [vmem:[#allocation3 + $0x60] sm:$0x1] %vm288_vm2, %v4542_v0 }
  0x7d   : > { %337 = vst.msk [vmem:[#allocation3 + $0x78] sm:$0x1] %vm288_vm2, %v4542_v0 }
  0x7e   : > { %338 = vst.msk [vmem:[#allocation3 + $0x90] sm:$0x1] %vm288_vm2, %v4542_v0 }
  0x7f   : > { %339 = vst.msk [vmem:[#allocation3 + $0xa8] sm:$0x1] %vm288_vm2, %v4542_v0  ;;  %894 = vrot.lane.b32.xlu2 %v5019_v23, %s4544_s8 }
  0x80   : > { %340 = vst.msk [vmem:[#allocation3 + $0xc0] sm:$0x1] %vm288_vm2, %v4542_v0 }
  0x81   : > { %341 = vst.msk [vmem:[#allocation3 + $0xd8] sm:$0x1] %vm288_vm2, %v4542_v0  ;;  %892 = vrot.lane.b32.xlu1 %v5023_v20, %s4544_s8  ;;  %v5041_v16 = vpop.permute.xlu2 %764 }
  0x82   : > { %342 = vst.msk [vmem:[#allocation3 + $0xf0] sm:$0x1] %vm288_vm2, %v4542_v0 }
  0x83   : > { %343 = vst.msk [vmem:[#allocation3 + $0x108] sm:$0x1] %vm288_vm2, %v4542_v0  ;;  %896 = vrot.lane.b32.xlu0 %v5027_v49, %s4544_s8 }
  0x84   : > { %8321 = vst [vmem:[#allocation34_spill] sm:$0xff] %v5011_v22  ;;  %v5185_v22 = vld [vmem:[#allocation2 + $0x152] sm:$0xff] }
  0x85   : > { %344 = vst.msk [vmem:[#allocation3 + $0x120] sm:$0x1] %vm288_vm2, %v4542_v0 }
  0x86   : > { %345 = vst.msk [vmem:[#allocation3 + $0x138] sm:$0x1] %vm288_vm2, %v4542_v0 }
  0x87   : > { %346 = vst.msk [vmem:[#allocation3 + $0x150] sm:$0x1] %vm288_vm2, %v4542_v0  ;;  %900 = vrot.lane.b32.xlu2 %v5049_v45, %s4544_s8  ;;  %v5075_v15 = vpop.permute.xlu0 %754 }
  0x88   : > { %347 = vst.msk [vmem:[#allocation3 + $0x168] sm:$0x1] %vm288_vm2, %v4542_v0 }
  0x89   : > { %348 = vst.msk [vmem:[#allocation3 + $0x180] sm:$0x1] %vm288_vm2, %v4542_v0  ;;  %898 = vrot.lane.b32.xlu1 %v5053_v18, %s4544_s8  ;;  %v5071_v44 = vpop.permute.xlu2 %770 }
  0x8a   : > { %349 = vst.msk [vmem:[#allocation3 + $0x198] sm:$0x1] %vm288_vm2, %v4542_v0 }
  0x8b   : > { %350 = vst.msk [vmem:[#allocation3 + $0x11] sm:$0x1] %vm288_vm2, %v4542_v0  ;;  %902 = vrot.lane.b32.xlu0 %v5057_v43, %s4544_s8 }
  0x8c   : > { %351 = vst.msk [vmem:[#allocation3 + $0x29] sm:$0x1] %vm288_vm2, %v4542_v0 }
  0x8d   : > { %8322 = vst [vmem:[#allocation35_spill] sm:$0xff] %v5041_v16  ;;  %v5183_v16 = vld [vmem:[#allocation2 + $0x13a] sm:$0xff] }
  0x8e   : > { %352 = vst.msk [vmem:[#allocation3 + $0x41] sm:$0x1] %vm288_vm2, %v4542_v0 }
  0x8f   : > { %353 = vst.msk [vmem:[#allocation3 + $0x59] sm:$0x1] %vm288_vm2, %v4542_v0  ;;  %906 = vrot.lane.b32.xlu2 %v5081_v39, %s4544_s8 }
  0x90   : > { %354 = vst.msk [vmem:[#allocation3 + $0x71] sm:$0x1] %vm288_vm2, %v4542_v0 }
  0x91   : > { %355 = vst.msk [vmem:[#allocation3 + $0x89] sm:$0x1] %vm288_vm2, %v4542_v0  ;;  %904 = vrot.lane.b32.xlu1 %v5085_v13, %s4544_s8  ;;  %v5103_v14 = vpop.permute.xlu2 %776  ;;  %v5105_v38 = vpop.permute.xlu1 %758 }
  0x92   : > { %356 = vst.msk [vmem:[#allocation3 + $0xa1] sm:$0x1] %vm288_vm2, %v4542_v0  ;;  %v5107_v11 = vpop.permute.xlu0 %756 }
  0x93   : > { %357 = vst.msk [vmem:[#allocation3 + $0xb9] sm:$0x1] %vm288_vm2, %v4542_v0  ;;  %908 = vrot.lane.b32.xlu0 %v5089_v37, %s4544_s8 }
  0x94   : > { %358 = vst.msk [vmem:[#allocation3 + $0xd1] sm:$0x1] %vm288_vm2, %v4542_v0 }
  0x95   : > { %359 = vst.msk [vmem:[#allocation3 + $0xe9] sm:$0x1] %vm288_vm2, %v4542_v0 }
  0x96   : > { %8323 = vst [vmem:[#allocation36_spill] sm:$0xff] %v5071_v44  ;;  %v5163_v44 = vld [vmem:[#allocation2 + $0x122] sm:$0xff] }
  0x97   : > { %360 = vst.msk [vmem:[#allocation3 + $0x101] sm:$0x1] %vm288_vm2, %v4542_v0  ;;  %912 = vrot.lane.b32.xlu2 %v5109_v33, %s4544_s8 }
  0x98   : > { %8324 = vst [vmem:[#allocation37_spill] sm:$0xff] %v5075_v15  ;;  %v436_v15 = vld [vmem:[#allocation2 + $0x20] sm:$0xff] }
  0x99   : > { %361 = vst.msk [vmem:[#allocation3 + $0x119] sm:$0x1] %vm288_vm2, %v4542_v0  ;;  %910 = vrot.lane.b32.xlu1 %v5111_v7, %s4544_s8 }
  0x9a   : > { %362 = vst.msk [vmem:[#allocation3 + $0x131] sm:$0x1] %vm288_vm2, %v4542_v0 }
  0x9b   : > { %363 = vst.msk [vmem:[#allocation3 + $0x149] sm:$0x1] %vm288_vm2, %v4542_v0  ;;  %914 = vrot.lane.b32.xlu0 %v5113_v31, %s4544_s8  ;;  %v5123_v9 = vpop.permute.xlu1 %760 }
  0x9c   : > { %364 = vst.msk [vmem:[#allocation3 + $0x161] sm:$0x1] %vm288_vm2, %v4542_v0 }
  0x9d   : > { %365 = vst.msk [vmem:[#allocation3 + $0x179] sm:$0x1] %vm288_vm2, %v4542_v0  ;;  %v5125_v32 = vpop.permute.xlu0 %766 }
  0x9e   : > { %366 = vst.msk [vmem:[#allocation3 + $0x191] sm:$0x1] %vm288_vm2, %v4542_v0 }
  0x9f   : > { %367 = vst.msk [vmem:[#allocation3 + $0x1a9] sm:$0x1] %vm288_vm2, %v4542_v0  ;;  %v5121_v0 = vpop.permute.xlu2 %782  ;;  %918 = vrot.lane.b32.xlu2 %v5127_v6, %s4544_s8 }
  0xa0   : > { %8325 = vst [vmem:[#allocation38_spill] sm:$0xff] %v5103_v14 }
  0xa1   : > { %8326 = vst [vmem:[#allocation39_spill] sm:$0xff] %v5105_v38  ;;  %916 = vrot.lane.b32.xlu1 %v5129_v27, %s4544_s8  ;;  %v5201_v38 = vld [vmem:[#allocation2 + $0x15a] sm:$0xff] }
  0xa2   : > { %8327 = vst [vmem:[#allocation40_spill] sm:$0xff] %v5107_v11  ;;  %v5203_v11 = vld [vmem:[#allocation2 + $0x172] sm:$0xff] }
  0xa3   : > { %8328 = vst [vmem:[#allocation41_spill] sm:$0xff] %v5121_v0  ;;  %920 = vrot.lane.b32.xlu0 %v5131_v4, %s4544_s8  ;;  %v5141_v1 = vpop.permute.xlu1 %768 }
  0xa4   : > { %8329 = vst [vmem:[#allocation42_spill] sm:$0xff] %v5123_v9  ;;  %v5199_v9 = vld [vmem:[#allocation2 + $0x16a] sm:$0xff] }
  0xa5   : > { %8330 = vst [vmem:[#allocation43_spill] sm:$0xff] %v5125_v32  ;;  %v5143_v26 = vpop.permute.xlu0 %772  ;;  %v5181_v32 = vld [vmem:[#allocation2 + $0x142] sm:$0xff] }
  0xa6   : > { %8332 = vst [vmem:[#allocation45_spill] sm:$0xff] %v5141_v1  ;;  %v5165_v1 = vld [vmem:[#allocation2 + $0x112] sm:$0xff] }
  0xa7   : > { %v5139_v25 = vpop.permute.xlu2 %788  ;;  %8333 = vst [vmem:[#allocation46_spill] sm:$0xff] %v5143_v26  ;;  %924 = vrot.lane.b32.xlu2 %v5145_v5, %s4544_s8 }
  0xa8   : > { %8331 = vst [vmem:[#allocation44_spill] sm:$0xff] %v5139_v25  ;;  %v5167_v25 = vld [vmem:[#allocation2 + $0x12a] sm:$0xff] }
  0xa9   : > { %922 = vrot.lane.b32.xlu1 %v5147_v24, %s4544_s8  ;;  %8340 = vst [vmem:[#allocation53_spill] sm:$0xff] %v5181_v32 }
  0xaa   : > { %8341 = vst [vmem:[#allocation54_spill] sm:$0xff] %v5185_v22 }
  0xab   : > { %926 = vrot.lane.b32.xlu0 %v5149_v2, %s4544_s8  ;;  %v5159_v14 = vpop.permute.xlu1 %774  ;;  %8345 = vst [vmem:[#allocation58_spill] sm:$0xff] %v5199_v9 }
  0xac   : > { %8335 = vst [vmem:[#allocation48_spill] sm:$0xff] %v5159_v14 }
  0xad   : > { %v5161_v26 = vpop.permute.xlu0 %778  ;;  %8346 = vst [vmem:[#allocation59_spill] sm:$0xff] %v5201_v38 }
  0xae   : > { %8336 = vst [vmem:[#allocation49_spill] sm:$0xff] %v5161_v26 }
  0xaf   : > { %v5157_v0 = vpop.permute.xlu2 %794  ;;  %930 = vrot.lane.b32.xlu2 %v5163_v44, %s4544_s8  ;;  %8347 = vst [vmem:[#allocation60_spill] sm:$0xff] %v5203_v11 }
  0xb0   : > { %8334 = vst [vmem:[#allocation47_spill] sm:$0xff] %v5157_v0 }
  0xb1   : > { %928 = vrot.lane.b32.xlu1 %v5165_v1, %s4544_s8 }
  0xb3   : > { %932 = vrot.lane.b32.xlu0 %v5167_v25, %s4544_s8  ;;  %v5177_v14 = vpop.permute.xlu1 %780 }
  0xb4   : > { %8338 = vst [vmem:[#allocation51_spill] sm:$0xff] %v5177_v14 }
  0xb5   : > { %v5179_v26 = vpop.permute.xlu0 %784 }
  0xb6   : > { %8339 = vst [vmem:[#allocation52_spill] sm:$0xff] %v5179_v26 }
  0xb7   : > { %v5175_v0 = vpop.permute.xlu2 %800  ;;  %936 = vrot.lane.b32.xlu2 %v5181_v32, %s4544_s8  ;;  %v437_v32 = vld [vmem:[#allocation2 + $0x30] sm:$0xff] }
  0xb8   : > { %8337 = vst [vmem:[#allocation50_spill] sm:$0xff] %v5175_v0 }
  0xb9   : > { %934 = vrot.lane.b32.xlu1 %v5183_v16, %s4544_s8 }
  0xbb   : > { %938 = vrot.lane.b32.xlu0 %v5185_v22, %s4544_s8  ;;  %v5195_v14 = vpop.permute.xlu1 %786  ;;  %v435_v22 = vld [vmem:[#allocation2 + $0x18] sm:$0xff] }
  0xbc   : > { %8343 = vst [vmem:[#allocation56_spill] sm:$0xff] %v5195_v14 }
  0xbd   : > { %v5197_v26 = vpop.permute.xlu0 %790 }
  0xbe   : > { %8344 = vst [vmem:[#allocation57_spill] sm:$0xff] %v5197_v26 }
  0xbf   : > { %v5193_v0 = vpop.permute.xlu2 %806  ;;  %942 = vrot.lane.b32.xlu2 %v5199_v9, %s4544_s8 }
  0xc0   : > { %8342 = vst [vmem:[#allocation55_spill] sm:$0xff] %v5193_v0 }
  0xc1   : > { %940 = vrot.lane.b32.xlu1 %v5201_v38, %s4544_s8 }
  0xc3   : > { %944 = vrot.lane.b32.xlu0 %v5203_v11, %s4544_s8  ;;  %v5213_v14 = vpop.permute.xlu1 %792 }
  0xc4   : > { %8349 = vst [vmem:[#allocation62_spill] sm:$0xff] %v5213_v14  ;;  %v438_v14 = vld [vmem:[#allocation2 + $0x38] sm:$0xff] }
  0xc5   : > { %v5215_v26 = vpop.permute.xlu0 %796 }
  0xc6   : > { %8350 = vst [vmem:[#allocation63_spill] sm:$0xff] %v5215_v26  ;;  %v5230_v26 = vld [vmem:[#allocation2 + $0x50] sm:$0xff] }
  0xc7   : > { %v5211_v0 = vpop.permute.xlu2 %812  ;;  %1012 = vrot.lane.b32.xlu2 %v436_v15, %s4545_s9  ;;  %8355 = vst [vmem:[#allocation68_spill] sm:$0xff] %v5230_v26 }
  0xc8   : > { %8348 = vst [vmem:[#allocation61_spill] sm:$0xff] %v5211_v0  ;;  %v5226_v0 = vld [vmem:[#allocation2 + $0x48] sm:$0xff] }
  0xc9   : > { %1010 = vrot.lane.b32.xlu1 %v435_v22, %s4545_s9  ;;  %8354 = vst [vmem:[#allocation67_spill] sm:$0xff] %v5226_v0 }
  0xcb   : > { %1014 = vrot.lane.b32.xlu0 %v437_v32, %s4545_s9  ;;  %v5222_v38 = vpop.permute.xlu1 %798 }
  0xcc   : > { %8352 = vst [vmem:[#allocation65_spill] sm:$0xff] %v5222_v38  ;;  %v441_v38 = vld [vmem:[#allocation2 + $0x60] sm:$0xff] }
  0xcd   : > { %v5224_v11 = vpop.permute.xlu0 %802 }
  0xce   : > { %8353 = vst [vmem:[#allocation66_spill] sm:$0xff] %v5224_v11  ;;  %v5241_v11 = vld [vmem:[#allocation2 + $0x68] sm:$0xff] }
  0xcf   : > { %v5220_v9 = vpop.permute.xlu2 %882  ;;  %1018 = vrot.lane.b32.xlu2 %v5226_v0, %s4545_s9  ;;  %8359 = vst [vmem:[#allocation72_spill] sm:$0xff] %v5241_v11  ;;  %v5294_v0 = vld [vmem:[%s4617_s29 + $0xf8] sm:$0xff] }
  0xd0   : > { %8351 = vst [vmem:[#allocation64_spill] sm:$0xff] %v5220_v9  ;;  %v5245_v9 = vld [vmem:[#allocation2 + $0x78] sm:$0xff] }
  0xd1   : > { %1016 = vrot.lane.b32.xlu1 %v438_v14, %s4545_s9  ;;  %8360 = vst [vmem:[#allocation73_spill] sm:$0xff] %v5245_v9 }
  0xd2   : > { %8376 = vst [vmem:[#allocation89_spill] sm:$0xff] %v5294_v0 }
  0xd3   : > { %1020 = vrot.lane.b32.xlu0 %v5230_v26, %s4545_s9  ;;  %v5237_v22 = vpop.permute.xlu1 %804  ;;  %v444_v26 = vld [vmem:[#allocation2 + $0x80] sm:$0xff]  ;;  %432 = vst.msk [vmem:[#allocation2 + $0x189] sm:$0xff] %vm279_vm0, %v5294_v0 }
  0xd4   : > { %8357 = vst [vmem:[#allocation70_spill] sm:$0xff] %v5237_v22 }
  0xd5   : > { %v5239_v32 = vpop.permute.xlu0 %808 }
  0xd6   : > { %8358 = vst [vmem:[#allocation71_spill] sm:$0xff] %v5239_v32  ;;  %v5256_v32 = vld [vmem:[#allocation2 + $0x90] sm:$0xff] }
  0xd7   : > { %v5235_v15 = vpop.permute.xlu2 %888  ;;  %1024 = vrot.lane.b32.xlu2 %v5241_v11, %s4545_s9  ;;  %8364 = vst [vmem:[#allocation77_spill] sm:$0xff] %v5256_v32  ;;  %v5260_v11 = vld [vmem:[#allocation2 + $0x98] sm:$0xff] }
  0xd8   : > { %8356 = vst [vmem:[#allocation69_spill] sm:$0xff] %v5235_v15 }
  0xd9   : > { %1022 = vrot.lane.b32.xlu1 %v441_v38, %s4545_s9  ;;  %8365 = vst [vmem:[#allocation78_spill] sm:$0xff] %v5260_v11 }
  0xdb   : > { %1026 = vrot.lane.b32.xlu0 %v5245_v9, %s4545_s9  ;;  %v5252_v15 = vpop.permute.xlu1 %810  ;;  %v447_v9 = vld [vmem:[#allocation2 + $0xa8] sm:$0xff] }
  0xdc   : > { %8362 = vst [vmem:[#allocation75_spill] sm:$0xff] %v5252_v15 }
  0xdd   : > { %v5254_v22 = vpop.permute.xlu0 %814 }
  0xde   : > { %8363 = vst [vmem:[#allocation76_spill] sm:$0xff] %v5254_v22 }
  0xdf   : > { %v5250_v14 = vpop.permute.xlu2 %894  ;;  %1030 = vrot.lane.b32.xlu2 %v5256_v32, %s4545_s9  ;;  %v5275_v32 = vld [vmem:[#allocation2 + $0xc0] sm:$0xff] }
  0xe0   : > { %8361 = vst [vmem:[#allocation74_spill] sm:$0xff] %v5250_v14  ;;  %v5271_v14 = vld [vmem:[#allocation2 + $0xb0] sm:$0xff] }
  0xe1   : > { %1028 = vrot.lane.b32.xlu1 %v444_v26, %s4545_s9  ;;  %8369 = vst [vmem:[#allocation82_spill] sm:$0xff] %v5271_v14 }
  0xe2   : > { %8370 = vst [vmem:[#allocation83_spill] sm:$0xff] %v5275_v32 }
  0xe3   : > { %1032 = vrot.lane.b32.xlu0 %v5260_v11, %s4545_s9  ;;  %v5267_v15 = vpop.permute.xlu1 %816  ;;  %v450_v11 = vld [vmem:[#allocation2 + $0xc8] sm:$0xff] }
  0xe4   : > { %8367 = vst [vmem:[#allocation80_spill] sm:$0xff] %v5267_v15 }
  0xe5   : > { %v5269_v22 = vpop.permute.xlu0 %884 }
  0xe6   : > { %8368 = vst [vmem:[#allocation81_spill] sm:$0xff] %v5269_v22  ;;  %v5286_v22 = vld [vmem:[#allocation2 + $0xd8] sm:$0xff] }
  0xe7   : > { %v5265_v38 = vpop.permute.xlu2 %900  ;;  %1036 = vrot.lane.b32.xlu2 %v5271_v14, %s4545_s9  ;;  %8374 = vst [vmem:[#allocation87_spill] sm:$0xff] %v5286_v22  ;;  %v5291_v14 = vld [vmem:[%s4617_s29 + $0xf0] sm:$0xff] }
  0xe8   : > { %8366 = vst [vmem:[#allocation79_spill] sm:$0xff] %v5265_v38 }
  0xe9   : > { %1034 = vrot.lane.b32.xlu1 %v447_v9, %s4545_s9  ;;  %8375 = vst [vmem:[#allocation88_spill] sm:$0xff] %v5291_v14  ;;  %v5296_v9 = vld [vmem:[#allocation2 + $0xe0] sm:$0xff] }
  0xea   : > { %431 = vst.msk [vmem:[#allocation2 + $0x181] sm:$0xff] %vm279_vm0, %v5291_v14 }
  0xeb   : > { %1038 = vrot.lane.b32.xlu0 %v5275_v32, %s4545_s9  ;;  %v5282_v38 = vpop.permute.xlu1 %886  ;;  %v453_v32 = vld [vmem:[#allocation2 + $0xf0] sm:$0xff] }
  0xec   : > { %8372 = vst [vmem:[#allocation85_spill] sm:$0xff] %v5282_v38 }
  0xed   : > { %v5284_v15 = vpop.permute.xlu0 %890 }
  0xee   : > { %8373 = vst [vmem:[#allocation86_spill] sm:$0xff] %v5284_v15 }
  0xef   : > { %v5280_v26 = vpop.permute.xlu2 %906  ;;  %1042 = vrot.lane.b32.xlu2 %v5286_v22, %s4545_s9  ;;  %v5311_v22 = vld [vmem:[#allocation2 + $0xf8] sm:$0xff] }
  0xf0   : > { %8371 = vst [vmem:[#allocation84_spill] sm:$0xff] %v5280_v26 }
  0xf1   : > { %1040 = vrot.lane.b32.xlu1 %v450_v11, %s4545_s9  ;;  %8380 = vst [vmem:[#allocation93_spill] sm:$0xff] %v5311_v22  ;;  %v5315_v11 = vld [vmem:[#allocation2 + $0x108] sm:$0xff] }
  0xf2   : > { %8381 = vst [vmem:[#allocation94_spill] sm:$0xff] %v5315_v11 }
  0xf3   : > { %1044 = vrot.lane.b32.xlu0 %v5296_v9, %s4545_s9  ;;  %v5307_v15 = vpop.permute.xlu1 %892 }
  0xf4   : > { %8378 = vst [vmem:[#allocation91_spill] sm:$0xff] %v5307_v15  ;;  %v456_v15 = vld [vmem:[#allocation2 + $0x110] sm:$0xff] }
  0xf5   : > { %v5309_v38 = vpop.permute.xlu0 %896 }
  0xf6   : > { %8379 = vst [vmem:[#allocation92_spill] sm:$0xff] %v5309_v38  ;;  %v5326_v38 = vld [vmem:[#allocation2 + $0x120] sm:$0xff] }
  0xf7   : > { %v5303_v26 = vpop.permute.xlu2 %912  ;;  %1048 = vrot.lane.b32.xlu2 %v5311_v22, %s4545_s9  ;;  %8385 = vst [vmem:[#allocation98_spill] sm:$0xff] %v5326_v38  ;;  %v5330_v22 = vld [vmem:[#allocation2 + $0x128] sm:$0xff] }
  0xf8   : > { %8377 = vst [vmem:[#allocation90_spill] sm:$0xff] %v5303_v26 }
  0xf9   : > { %1046 = vrot.lane.b32.xlu1 %v453_v32, %s4545_s9  ;;  %8386 = vst [vmem:[#allocation99_spill] sm:$0xff] %v5330_v22 }
  0xfb   : > { %1050 = vrot.lane.b32.xlu0 %v5315_v11, %s4545_s9  ;;  %v5322_v0 = vpop.permute.xlu1 %898  ;;  %v5343_v11 = vld [vmem:[#allocation2 + $0x138] sm:$0xff] }
  0xfc   : > { %8383 = vst [vmem:[#allocation96_spill] sm:$0xff] %v5322_v0 }
  0xfd   : > { %v5324_v26 = vpop.permute.xlu0 %902  ;;  %8391 = vst [vmem:[#allocation104_spill] sm:$0xff] %v5343_v11 }
  0xfe   : > { %8384 = vst [vmem:[#allocation97_spill] sm:$0xff] %v5324_v26  ;;  %v5341_v26 = vld [vmem:[#allocation2 + $0x140] sm:$0xff] }
  0xff   : > { %v5320_v14 = vpop.permute.xlu2 %918  ;;  %1054 = vrot.lane.b32.xlu2 %v5326_v38, %s4545_s9  ;;  %8390 = vst [vmem:[#allocation103_spill] sm:$0xff] %v5341_v26  ;;  %v5347_v38 = vld [vmem:[#allocation2 + $0x150] sm:$0xff] }
 0x100   : > { %8382 = vst [vmem:[#allocation95_spill] sm:$0xff] %v5320_v14 }
 0x101   : > { %1052 = vrot.lane.b32.xlu1 %v456_v15, %s4545_s9  ;;  %8392 = vst [vmem:[#allocation105_spill] sm:$0xff] %v5347_v38 }
 0x103   : > { %1056 = vrot.lane.b32.xlu0 %v5330_v22, %s4545_s9  ;;  %v5337_v14 = vpop.permute.xlu1 %904  ;;  %v5361_v22 = vld [vmem:[#allocation2 + $0x158] sm:$0xff] }
 0x104   : > { %8388 = vst [vmem:[#allocation101_spill] sm:$0xff] %v5337_v14 }
 0x105   : > { %v5339_v0 = vpop.permute.xlu0 %908 }
 0x106   : > { %8389 = vst [vmem:[#allocation102_spill] sm:$0xff] %v5339_v0 }
 0x107   : > { %v5335_v32 = vpop.permute.xlu2 %924  ;;  %1060 = vrot.lane.b32.xlu2 %v5341_v26, %s4545_s9  ;;  %v5365_v26 = vld [vmem:[#allocation2 + $0x170] sm:$0xff] }
 0x108   : > { %8387 = vst [vmem:[#allocation100_spill] sm:$0xff] %v5335_v32  ;;  %v5359_v32 = vld [vmem:[#allocation2 + $0x168] sm:$0xff] }
 0x109   : > { %1058 = vrot.lane.b32.xlu1 %v5343_v11, %s4545_s9  ;;  %8396 = vst [vmem:[#allocation109_spill] sm:$0xff] %v5359_v32  ;;  %v5379_v11 = vld [vmem:[#allocation2 + $0x180] sm:$0xff] }
 0x10b   : > { %1062 = vrot.lane.b32.xlu0 %v5347_v38, %s4545_s9  ;;  %v5355_v14 = vpop.permute.xlu1 %910  ;;  %v5377_v38 = vld [vmem:[#allocation2 + $0x188] sm:$0xff] }
 0x10c   : > { %8394 = vst [vmem:[#allocation107_spill] sm:$0xff] %v5355_v14 }
 0x10d   : > { %v5357_v0 = vpop.permute.xlu0 %914  ;;  %8400 = vst [vmem:[#allocation113_spill] sm:$0xff] %v5377_v38 }
 0x10e   : > { %8395 = vst [vmem:[#allocation108_spill] sm:$0xff] %v5357_v0 }
 0x10f   : > { %v5353_v15 = vpop.permute.xlu2 %930  ;;  %1066 = vrot.lane.b32.xlu2 %v5359_v32, %s4545_s9 }
 0x110   : > { %8393 = vst [vmem:[#allocation106_spill] sm:$0xff] %v5353_v15 }
 0x111   : > { %1064 = vrot.lane.b32.xlu1 %v5361_v22, %s4545_s9 }
 0x113   : > { %1068 = vrot.lane.b32.xlu0 %v5365_v26, %s4545_s9  ;;  %v5373_v14 = vpop.permute.xlu1 %916 }
 0x114   : > { %8398 = vst [vmem:[#allocation111_spill] sm:$0xff] %v5373_v14 }
 0x115   : > { %v5375_v0 = vpop.permute.xlu0 %920 }
 0x116   : > { %8399 = vst [vmem:[#allocation112_spill] sm:$0xff] %v5375_v0 }
 0x117   : > { %v5371_v15 = vpop.permute.xlu2 %936  ;;  %1072 = vrot.lane.b32.xlu2 %v5377_v38, %s4545_s9 }
 0x118   : > { %8397 = vst [vmem:[#allocation110_spill] sm:$0xff] %v5371_v15 }
 0x119   : > { %1070 = vrot.lane.b32.xlu1 %v5379_v11, %s4545_s9 }
 0x11b   : > { %1138 = vrot.lane.b32.xlu0 %v4663_v10, %s4546_s10  ;;  %v5389_v15 = vpop.permute.xlu1 %922 }
 0x11c   : > { %8402 = vst [vmem:[#allocation115_spill] sm:$0xff] %v5389_v15  ;;  %v680_v15 = vld [vmem:[#allocation2 + $0x139] sm:$0xff] }
 0x11d   : > { %v5391_v14 = vpop.permute.xlu0 %926 }
 0x11e   : > { %8403 = vst [vmem:[#allocation116_spill] sm:$0xff] %v5391_v14 }
 0x11f   : > { %v5385_v32 = vpop.permute.xlu2 %942  ;;  %1142 = vrot.lane.b32.xlu2 %v4654_v8, %s4546_s10 }
 0x120   : > { %8401 = vst [vmem:[#allocation114_spill] sm:$0xff] %v5385_v32 }
 0x121   : > { %1140 = vrot.lane.b32.xlu1 %v4700_v19, %s4546_s10 }
 0x123   : > { %1144 = vrot.lane.b32.xlu0 %v4693_v17, %s4546_s10  ;;  %v5401_v32 = vpop.permute.xlu1 %928 }
 0x124   : > { %8404 = vst [vmem:[#allocation117_spill] sm:$0xff] %v5401_v32  ;;  %v645_v32 = vld [vmem:[#allocation2 + $0x110] sm:$0xff] }
 0x125   : > { %v5403_v38 = vpop.permute.xlu0 %932 }
 0x126   : > { %8405 = vst [vmem:[#allocation118_spill] sm:$0xff] %v5403_v38 }
 0x127   : > { %v5399_v0 = vpop.permute.xlu2 %1012  ;;  %1148 = vrot.lane.b32.xlu2 %v4749_v29, %s4546_s10 }
 0x129   : > { %1146 = vrot.lane.b32.xlu1 %v4707_v21, %s4546_s10 }
 0x12b   : > { %1150 = vrot.lane.b32.xlu0 %v4745_v28, %s4546_s10  ;;  %v5413_v10 = vpop.permute.xlu1 %934 }
 0x12c   : > { %8406 = vst [vmem:[#allocation119_spill] sm:$0xff] %v5413_v10  ;;  %v627_v10 = vld [vmem:[#allocation2 + $0x38] sm:$0xff] }
 0x12d   : > { %v5415_v17 = vpop.permute.xlu0 %938 }
 0x12e   : > { %8407 = vst [vmem:[#allocation120_spill] sm:$0xff] %v5415_v17 }
 0x12f   : > { %v5411_v8 = vpop.permute.xlu2 %1018  ;;  %1154 = vrot.lane.b32.xlu2 %v4780_v35, %s4546_s10 }
 0x131   : > { %1152 = vrot.lane.b32.xlu1 %v4753_v30, %s4546_s10 }
 0x133   : > { %1156 = vrot.lane.b32.xlu0 %v4778_v34, %s4546_s10  ;;  %v5425_v21 = vpop.permute.xlu1 %940 }
 0x134   : > { %8408 = vst [vmem:[#allocation121_spill] sm:$0xff] %v5425_v21 }
 0x135   : > { %v5427_v28 = vpop.permute.xlu0 %944 }
 0x136   : > { %8409 = vst [vmem:[#allocation122_spill] sm:$0xff] %v5427_v28  ;;  %v5515_v28 = vld [vmem:[#allocation2 + $0x189] sm:$0xff] }
 0x137   : > { %v5423_v19 = vpop.permute.xlu2 %1024  ;;  %1160 = vrot.lane.b32.xlu2 %v4807_v41, %s4546_s10 }
 0x139   : > { %1158 = vrot.lane.b32.xlu1 %v4782_v36, %s4546_s10 }
 0x13b   : > { %1162 = vrot.lane.b32.xlu0 %v4805_v40, %s4546_s10  ;;  %v5437_v30 = vpop.permute.xlu1 %1010 }
 0x13d   : > { %v5439_v34 = vpop.permute.xlu0 %1014 }
 0x13f   : > { %v5435_v29 = vpop.permute.xlu2 %1030  ;;  %1166 = vrot.lane.b32.xlu2 %v4834_v47, %s4546_s10 }
 0x140   : > { %8410 = vst [vmem:[#allocation123_spill] sm:$0xff] %v5435_v29  ;;  %v681_v29 = vld [vmem:[#allocation2 + $0x141] sm:$0xff] }
 0x141   : > { %1164 = vrot.lane.b32.xlu1 %v4809_v42, %s4546_s10 }
 0x143   : > { %1168 = vrot.lane.b32.xlu0 %v4832_v46, %s4546_s10  ;;  %v5449_v36 = vpop.permute.xlu1 %1016 }
 0x145   : > { %v5451_v40 = vpop.permute.xlu0 %1020 }
 0x147   : > { %v5447_v35 = vpop.permute.xlu2 %1036  ;;  %1172 = vrot.lane.b32.xlu2 %v4857_v51, %s4546_s10 }
 0x148   : > { %8411 = vst [vmem:[#allocation124_spill] sm:$0xff] %v5447_v35  ;;  %v642_v35 = vld [vmem:[#allocation2 + $0xf0] sm:$0xff] }
 0x149   : > { %1170 = vrot.lane.b32.xlu1 %v4836_v48, %s4546_s10 }
 0x14b   : > { %1174 = vrot.lane.b32.xlu0 %v4853_v50, %s4546_s10  ;;  %v5461_v42 = vpop.permute.xlu1 %1022 }
 0x14d   : > { %v5463_v46 = vpop.permute.xlu0 %1026 }
 0x14f   : > { %v5459_v41 = vpop.permute.xlu2 %1042  ;;  %1178 = vrot.lane.b32.xlu2 %v4885_v54, %s4546_s10 }
 0x151   : > { %1176 = vrot.lane.b32.xlu1 %v4861_v52, %s4546_s10 }
 0x153   : > { %1180 = vrot.lane.b32.xlu0 %v4881_v53, %s4546_s10  ;;  %v5473_v48 = vpop.permute.xlu1 %1028 }
 0x154   : > { %8413 = vst [vmem:[#allocation126_spill] sm:$0xff] %v5473_v48  ;;  %v704_v48 = vld [vmem:[#allocation2 + $0xda] sm:$0xff] }
 0x155   : > { %v5475_v50 = vpop.permute.xlu0 %1032 }
 0x156   : > { %8414 = vst [vmem:[#allocation127_spill] sm:$0xff] %v5475_v50  ;;  %v665_v50 = vld [vmem:[#allocation2 + $0x81] sm:$0xff] }
 0x157   : > { %v5471_v47 = vpop.permute.xlu2 %1048  ;;  %1184 = vrot.lane.b32.xlu2 %v4913_v57, %s4546_s10  ;;  %v5501_v57 = vld [vmem:[#allocation2 + $0x181] sm:$0xff] }
 0x158   : > { %8412 = vst [vmem:[#allocation125_spill] sm:$0xff] %v5471_v47  ;;  %v708_v47 = vld [vmem:[#allocation2 + $0x10a] sm:$0xff] }
 0x159   : > { %1182 = vrot.lane.b32.xlu1 %v4889_v55, %s4546_s10 }
 0x15b   : > { %1186 = vrot.lane.b32.xlu0 %v4909_v56, %s4546_s10  ;;  %v5485_v52 = vpop.permute.xlu1 %1034 }
 0x15c   : > { %8416 = vst [vmem:[#allocation129_spill] sm:$0xff] %v5485_v52 }
 0x15d   : > { %v5487_v53 = vpop.permute.xlu0 %1038 }
 0x15e   : > { %8417 = vst [vmem:[#allocation130_spill] sm:$0xff] %v5487_v53  ;;  %v633_v53 = vld [vmem:[#allocation2 + $0x80] sm:$0xff] }
 0x15f   : > { %v5483_v51 = vpop.permute.xlu2 %1054  ;;  %1190 = vrot.lane.b32.xlu2 %v4941_v60, %s4546_s10 }
 0x160   : > { %8415 = vst [vmem:[#allocation128_spill] sm:$0xff] %v5483_v51  ;;  %v8480_v51 = vld [vmem:[#allocation105_spill] sm:$0xff] }
 0x161   : > { %1188 = vrot.lane.b32.xlu1 %v4917_v58, %s4546_s10 }
 0x163   : > { %1192 = vrot.lane.b32.xlu0 %v4937_v59, %s4546_s10  ;;  %v5497_v55 = vpop.permute.xlu1 %1040 }
 0x164   : > { %8419 = vst [vmem:[#allocation132_spill] sm:$0xff] %v5497_v55  ;;  %v8449_v55 = vld [vmem:[#allocation67_spill] sm:$0xff] }
 0x165   : > { %v5499_v56 = vpop.permute.xlu0 %1044 }
 0x167   : > { %v5495_v54 = vpop.permute.xlu2 %1060  ;;  %1196 = vrot.lane.b32.xlu2 %v4967_v63, %s4546_s10 }
 0x168   : > { %8418 = vst [vmem:[#allocation131_spill] sm:$0xff] %v5495_v54 }
 0x169   : > { %1194 = vrot.lane.b32.xlu1 %v4945_v61, %s4546_s10 }
 0x16b   : > { %1198 = vrot.lane.b32.xlu0 %v5501_v57, %s4546_s10  ;;  %v5511_v59 = vpop.permute.xlu1 %1046 }
 0x16d   : > { %v5513_v60 = vpop.permute.xlu0 %1050 }
 0x16e   : > { %8421 = vst [vmem:[#allocation134_spill] sm:$0xff] %v5513_v60  ;;  %v679_v60 = vld [vmem:[#allocation2 + $0x129] sm:$0xff] }
 0x16f   : > { %v5509_v58 = vpop.permute.xlu2 %1066  ;;  %1266 = vrot.lane.b32.xlu2 %v4993_v62, %s4547_s11 }
 0x170   : > { %8420 = vst [vmem:[#allocation133_spill] sm:$0xff] %v5509_v58 }
 0x171   : > { %1200 = vrot.lane.b32.xlu1 %v5515_v28, %s4546_s10 }
 0x173   : > { %1268 = vrot.lane.b32.xlu0 %v4989_v12, %s4547_s11  ;;  %v5525_v63 = vpop.permute.xlu1 %1052 }
 0x174   : > { %8423 = vst [vmem:[#allocation136_spill] sm:$0xff] %v5525_v63  ;;  %v664_v63 = vld [vmem:[#allocation2 + $0x79] sm:$0xff] }
 0x175   : > { %v5527_v21 = vpop.permute.xlu0 %1056 }
 0x176   : > { %8424 = vst [vmem:[#allocation137_spill] sm:$0xff] %v5527_v21  ;;  %v639_v21 = vld [vmem:[#allocation2 + $0xc8] sm:$0xff] }
 0x177   : > { %v5523_v61 = vpop.permute.xlu2 %1072  ;;  %1272 = vrot.lane.b32.xlu2 %v5023_v20, %s4547_s11 }
 0x178   : > { %8422 = vst [vmem:[#allocation135_spill] sm:$0xff] %v5523_v61 }
 0x179   : > { %1270 = vrot.lane.b32.xlu1 %v4997_v3, %s4547_s11 }
 0x17b   : > { %1274 = vrot.lane.b32.xlu0 %v5019_v23, %s4547_s11  ;;  %v5537_v58 = vpop.permute.xlu1 %1058 }
 0x17c   : > { %8425 = vst [vmem:[#allocation138_spill] sm:$0xff] %v5537_v58  ;;  %v8453_v58 = vld [vmem:[#allocation72_spill] sm:$0xff] }
 0x17d   : > { %v5539_v12 = vpop.permute.xlu0 %1062 }
 0x17e   : > { %8426 = vst [vmem:[#allocation139_spill] sm:$0xff] %v5539_v12  ;;  %v5639_v12 = vld [vmem:[#allocation2 + $0x18a] sm:$0xff] }
 0x17f   : > { %v5535_v62 = vpop.permute.xlu2 %1142  ;;  %1278 = vrot.lane.b32.xlu2 %v5053_v18, %s4547_s11 }
 0x181   : > { %1276 = vrot.lane.b32.xlu1 %v5027_v49, %s4547_s11 }
 0x183   : > { %1280 = vrot.lane.b32.xlu0 %v5049_v45, %s4547_s11  ;;  %v5549_v3 = vpop.permute.xlu1 %1064 }
 0x184   : > { %8427 = vst [vmem:[#allocation140_spill] sm:$0xff] %v5549_v3  ;;  %v5637_v3 = vld [vmem:[#allocation2 + $0x182] sm:$0xff] }
 0x185   : > { %v5551_v23 = vpop.permute.xlu0 %1068 }
 0x186   : > { %8428 = vst [vmem:[#allocation141_spill] sm:$0xff] %v5551_v23  ;;  %v8441_v23 = vld [vmem:[#allocation54_spill] sm:$0xff] }
 0x187   : > { %v5547_v20 = vpop.permute.xlu2 %1148  ;;  %1284 = vrot.lane.b32.xlu2 %v5085_v13, %s4547_s11 }
 0x189   : > { %1282 = vrot.lane.b32.xlu1 %v5057_v43, %s4547_s11 }
 0x18b   : > { %1286 = vrot.lane.b32.xlu0 %v5081_v39, %s4547_s11  ;;  %v5561_v49 = vpop.permute.xlu1 %1070 }
 0x18c   : > { %8429 = vst [vmem:[#allocation142_spill] sm:$0xff] %v5561_v49  ;;  %v8440_v49 = vld [vmem:[#allocation59_spill] sm:$0xff] }
 0x18d   : > { %v5563_v45 = vpop.permute.xlu0 %1138 }
 0x18f   : > { %v5559_v18 = vpop.permute.xlu2 %1154  ;;  %1290 = vrot.lane.b32.xlu2 %v5111_v7, %s4547_s11 }
 0x191   : > { %1288 = vrot.lane.b32.xlu1 %v5089_v37, %s4547_s11 }
 0x193   : > { %1292 = vrot.lane.b32.xlu0 %v5109_v33, %s4547_s11  ;;  %v5573_v43 = vpop.permute.xlu1 %1140 }
 0x195   : > { %v5575_v39 = vpop.permute.xlu0 %1144 }
 0x197   : > { %v5571_v13 = vpop.permute.xlu2 %1160  ;;  %1296 = vrot.lane.b32.xlu2 %v5129_v27, %s4547_s11 }
 0x198   : > { %8430 = vst [vmem:[#allocation143_spill] sm:$0xff] %v5571_v13  ;;  %v662_v13 = vld [vmem:[#allocation2 + $0x61] sm:$0xff] }
 0x199   : > { %1294 = vrot.lane.b32.xlu1 %v5113_v31, %s4547_s11 }
 0x19b   : > { %1298 = vrot.lane.b32.xlu0 %v5127_v6, %s4547_s11  ;;  %v5585_v37 = vpop.permute.xlu1 %1146 }
 0x19d   : > { %v5587_v33 = vpop.permute.xlu0 %1150 }
 0x19f   : > { %v5583_v7 = vpop.permute.xlu2 %1166  ;;  %1302 = vrot.lane.b32.xlu2 %v5147_v24, %s4547_s11 }
 0x1a0   : > { %8431 = vst [vmem:[#allocation144_spill] sm:$0xff] %v5583_v7  ;;  %v8452_v7 = vld [vmem:[#allocation68_spill] sm:$0xff] }
 0x1a1   : > { %1300 = vrot.lane.b32.xlu1 %v5131_v4, %s4547_s11 }
 0x1a3   : > { %1304 = vrot.lane.b32.xlu0 %v5145_v5, %s4547_s11  ;;  %v5597_v31 = vpop.permute.xlu1 %1152 }
 0x1a5   : > { %v5599_v6 = vpop.permute.xlu0 %1156 }
 0x1a6   : > { %8432 = vst [vmem:[#allocation145_spill] sm:$0xff] %v5599_v6  ;;  %v701_v6 = vld [vmem:[#allocation2 + $0xb2] sm:$0xff] }
 0x1a7   : > { %v5595_v27 = vpop.permute.xlu2 %1172  ;;  %1308 = vrot.lane.b32.xlu2 %v5165_v1, %s4547_s11  ;;  %v8436_v1 = vld [vmem:[#allocation53_spill] sm:$0xff] }
 0x1a9   : > { %1306 = vrot.lane.b32.xlu1 %v5149_v2, %s4547_s11 }
 0x1ab   : > { %1310 = vrot.lane.b32.xlu0 %v5163_v44, %s4547_s11  ;;  %v5609_v4 = vpop.permute.xlu1 %1158 }
 0x1ac   : > { %8434 = vst [vmem:[#allocation147_spill] sm:$0xff] %v5609_v4  ;;  %v676_v4 = vld [vmem:[#allocation2 + $0x109] sm:$0xff] }
 0x1ad   : > { %v5611_v5 = vpop.permute.xlu0 %1162 }
 0x1ae   : > { %8435 = vst [vmem:[#allocation148_spill] sm:$0xff] %v5611_v5  ;;  %v8475_v5 = vld [vmem:[#allocation99_spill] sm:$0xff] }
 0x1af   : > { %v5607_v24 = vpop.permute.xlu2 %1178  ;;  %1314 = vrot.lane.b32.xlu2 %v5183_v16, %s4547_s11  ;;  %v8442_v16 = vld [vmem:[#allocation58_spill] sm:$0xff] }
 0x1b0   : > { %8433 = vst [vmem:[#allocation146_spill] sm:$0xff] %v5607_v24  ;;  %v677_v24 = vld [vmem:[#allocation2 + $0x111] sm:$0xff] }
 0x1b1   : > { %1312 = vrot.lane.b32.xlu1 %v5167_v25, %s4547_s11 }
 0x1b3   : > { %1316 = vrot.lane.b32.xlu0 %v8436_v1, %s4547_s11  ;;  %v5621_v2 = vpop.permute.xlu1 %1164 }
 0x1b4   : > { %8438 = vst [vmem:[#allocation149_spill] sm:$0xff] %v5621_v2 }
 0x1b5   : > { %v5623_v44 = vpop.permute.xlu0 %1168 }
 0x1b6   : > { %8439 = vst [vmem:[#allocation150_spill] sm:$0xff] %v5623_v44  ;;  %v626_v44 = vld [vmem:[#allocation2 + $0x30] sm:$0xff] }
 0x1b7   : > { %v5619_v61 = vpop.permute.xlu2 %1184  ;;  %1320 = vrot.lane.b32.xlu2 %v8440_v49, %s4547_s11  ;;  %v8445_v49 = vld [vmem:[#allocation60_spill] sm:$0xff] }
 0x1b8   : > { %8437 = vst [vmem:[#allocation53_spill] sm:$0xff] %v5619_v61  ;;  %v636_v61 = vld [vmem:[#allocation2 + $0xa8] sm:$0xff] }
 0x1b9   : > { %1318 = vrot.lane.b32.xlu1 %v8441_v23, %s4547_s11 }
 0x1bb   : > { %1322 = vrot.lane.b32.xlu0 %v8442_v16, %s4547_s11  ;;  %v5633_v25 = vpop.permute.xlu1 %1170 }
 0x1bd   : > { %v5635_v1 = vpop.permute.xlu0 %1174 }
 0x1be   : > { %8444 = vst [vmem:[#allocation54_spill] sm:$0xff] %v5635_v1 }
 0x1bf   : > { %v5631_v17 = vpop.permute.xlu2 %1190  ;;  %1326 = vrot.lane.b32.xlu2 %v5637_v3, %s4547_s11 }
 0x1c0   : > { %8443 = vst [vmem:[#allocation59_spill] sm:$0xff] %v5631_v17 }
 0x1c1   : > { %1324 = vrot.lane.b32.xlu1 %v8445_v49, %s4547_s11 }
 0x1c3   : > { %1328 = vrot.lane.b32.xlu0 %v5639_v12, %s4547_s11  ;;  %v5649_v16 = vpop.permute.xlu1 %1176 }
 0x1c4   : > { %8447 = vst [vmem:[#allocation60_spill] sm:$0xff] %v5649_v16  ;;  %v698_v16 = vld [vmem:[#allocation2 + $0x92] sm:$0xff] }
 0x1c5   : > { %v5651_v17 = vpop.permute.xlu0 %1180 }
 0x1c6   : > { %8448 = vst [vmem:[#allocation151_spill] sm:$0xff] %v5651_v17  ;;  %v661_v17 = vld [vmem:[#allocation2 + $0x51] sm:$0xff] }
 0x1c7   : > { %v5647_v23 = vpop.permute.xlu2 %1196  ;;  %1396 = vrot.lane.b32.xlu2 %v627_v10, %s4548_s12 }
 0x1c8   : > { %8446 = vst [vmem:[#allocation58_spill] sm:$0xff] %v5647_v23  ;;  %v630_v23 = vld [vmem:[#allocation2 + $0x60] sm:$0xff] }
 0x1c9   : > { %1394 = vrot.lane.b32.xlu1 %v626_v44, %s4548_s12 }
 0x1cb   : > { %1398 = vrot.lane.b32.xlu0 %v8449_v55, %s4548_s12  ;;  %v5659_v54 = vpop.permute.xlu1 %1182 }
 0x1cc   : > { %8450 = vst [vmem:[#allocation67_spill] sm:$0xff] %v5659_v54 }
 0x1cd   : > { %v5661_v38 = vpop.permute.xlu0 %1186 }
 0x1ce   : > { %8451 = vst [vmem:[#allocation152_spill] sm:$0xff] %v5661_v38  ;;  %v8456_v38 = vld [vmem:[#allocation73_spill] sm:$0xff] }
 0x1cf   : > { %v5657_v49 = vpop.permute.xlu2 %1266  ;;  %1402 = vrot.lane.b32.xlu2 %v630_v23, %s4548_s12  ;;  %v8457_v23 = vld [vmem:[#allocation77_spill] sm:$0xff] }
 0x1d1   : > { %1400 = vrot.lane.b32.xlu1 %v8452_v7, %s4548_s12 }
 0x1d3   : > { %1404 = vrot.lane.b32.xlu0 %v8453_v58, %s4548_s12  ;;  %v5670_v44 = vpop.permute.xlu1 %1188 }
 0x1d4   : > { %8454 = vst [vmem:[#allocation68_spill] sm:$0xff] %v5670_v44 }
 0x1d5   : > { %v5672_v55 = vpop.permute.xlu0 %1192 }
 0x1d6   : > { %8455 = vst [vmem:[#allocation72_spill] sm:$0xff] %v5672_v55  ;;  %v8460_v55 = vld [vmem:[#allocation78_spill] sm:$0xff] }
 0x1d7   : > { %v5668_v10 = vpop.permute.xlu2 %1272  ;;  %1408 = vrot.lane.b32.xlu2 %v633_v53, %s4548_s12  ;;  %v8461_v53 = vld [vmem:[#allocation82_spill] sm:$0xff] }
 0x1d9   : > { %1406 = vrot.lane.b32.xlu1 %v8456_v38, %s4548_s12 }
 0x1db   : > { %1410 = vrot.lane.b32.xlu0 %v8457_v23, %s4548_s12  ;;  %v5681_v7 = vpop.permute.xlu1 %1194 }
 0x1dc   : > { %8458 = vst [vmem:[#allocation73_spill] sm:$0xff] %v5681_v7 }
 0x1dd   : > { %v5683_v58 = vpop.permute.xlu0 %1198 }
 0x1de   : > { %8459 = vst [vmem:[#allocation77_spill] sm:$0xff] %v5683_v58  ;;  %v8464_v58 = vld [vmem:[#allocation83_spill] sm:$0xff] }
 0x1df   : > { %v5679_v2 = vpop.permute.xlu2 %1278  ;;  %1414 = vrot.lane.b32.xlu2 %v636_v61, %s4548_s12  ;;  %v8465_v61 = vld [vmem:[#allocation87_spill] sm:$0xff] }
 0x1e1   : > { %1412 = vrot.lane.b32.xlu1 %v8460_v55, %s4548_s12 }
 0x1e3   : > { %1416 = vrot.lane.b32.xlu0 %v8461_v53, %s4548_s12  ;;  %v5692_v38 = vpop.permute.xlu1 %1200 }
 0x1e4   : > { %8463 = vst [vmem:[#allocation82_spill] sm:$0xff] %v5692_v38 }
 0x1e5   : > { %v5694_v23 = vpop.permute.xlu0 %1268 }
 0x1e7   : > { %v5690_v44 = vpop.permute.xlu2 %1284  ;;  %1420 = vrot.lane.b32.xlu2 %v639_v21, %s4548_s12  ;;  %v8467_v21 = vld [vmem:[#allocation93_spill] sm:$0xff] }
 0x1e8   : > { %8462 = vst [vmem:[#allocation78_spill] sm:$0xff] %v5690_v44  ;;  %v683_v44 = vld [vmem:[#allocation2 + $0x159] sm:$0xff] }
 0x1e9   : > { %1418 = vrot.lane.b32.xlu1 %v8464_v58, %s4548_s12 }
 0x1eb   : > { %1422 = vrot.lane.b32.xlu0 %v8465_v61, %s4548_s12  ;;  %v5703_v55 = vpop.permute.xlu1 %1270 }
 0x1ed   : > { %v5705_v53 = vpop.permute.xlu0 %1274 }
 0x1ef   : > { %v5701_v7 = vpop.permute.xlu2 %1290  ;;  %1426 = vrot.lane.b32.xlu2 %v642_v35, %s4548_s12  ;;  %v8470_v35 = vld [vmem:[#allocation98_spill] sm:$0xff] }
 0x1f0   : > { %8466 = vst [vmem:[#allocation83_spill] sm:$0xff] %v5701_v7  ;;  %v8469_v7 = vld [vmem:[#allocation94_spill] sm:$0xff] }
 0x1f1   : > { %1424 = vrot.lane.b32.xlu1 %v5296_v9, %s4548_s12 }
 0x1f3   : > { %1428 = vrot.lane.b32.xlu0 %v8467_v21, %s4548_s12  ;;  %v5714_v58 = vpop.permute.xlu1 %1276 }
 0x1f5   : > { %v5716_v61 = vpop.permute.xlu0 %1280 }
 0x1f7   : > { %v5712_v38 = vpop.permute.xlu2 %1296  ;;  %1432 = vrot.lane.b32.xlu2 %v645_v32, %s4548_s12  ;;  %v8476_v32 = vld [vmem:[#allocation103_spill] sm:$0xff] }
 0x1f8   : > { %8468 = vst [vmem:[#allocation87_spill] sm:$0xff] %v5712_v38  ;;  %v8474_v38 = vld [vmem:[#allocation104_spill] sm:$0xff] }
 0x1f9   : > { %1430 = vrot.lane.b32.xlu1 %v8469_v7, %s4548_s12 }
 0x1fb   : > { %1434 = vrot.lane.b32.xlu0 %v8470_v35, %s4548_s12  ;;  %v5725_v9 = vpop.permute.xlu1 %1282 }
 0x1fc   : > { %8472 = vst [vmem:[#allocation94_spill] sm:$0xff] %v5725_v9  ;;  %v712_v9 = vld [vmem:[#allocation2 + $0x13a] sm:$0xff] }
 0x1fd   : > { %v5727_v21 = vpop.permute.xlu0 %1286 }
 0x1fe   : > { %8473 = vst [vmem:[#allocation98_spill] sm:$0xff] %v5727_v21  ;;  %v671_v21 = vld [vmem:[#allocation2 + $0xc9] sm:$0xff] }
 0x1ff   : > { %v5723_v54 = vpop.permute.xlu2 %1302  ;;  %1438 = vrot.lane.b32.xlu2 %v8474_v38, %s4548_s12  ;;  %v8481_v38 = vld [vmem:[#allocation109_spill] sm:$0xff] }
 0x200   : > { %8471 = vst [vmem:[#allocation93_spill] sm:$0xff] %v5723_v54  ;;  %v2009_v54 = vld [vmem:[%s8202_s1] sm:$0xff] }
 0x201   : > { %1436 = vrot.lane.b32.xlu1 %v8475_v5, %s4548_s12 }
 0x203   : > { %1440 = vrot.lane.b32.xlu0 %v8476_v32, %s4548_s12  ;;  %v5737_v7 = vpop.permute.xlu1 %1288 }
 0x204   : > { %8478 = vst [vmem:[#allocation99_spill] sm:$0xff] %v5737_v7  ;;  %v656_v7 = vld [vmem:[#allocation2 + $0x198] sm:$0xff] }
 0x205   : > { %v5739_v35 = vpop.permute.xlu0 %1292 }
 0x206   : > { %8479 = vst [vmem:[#allocation103_spill] sm:$0xff] %v5739_v35 }
 0x207   : > { %v5735_v52 = vpop.permute.xlu2 %1308  ;;  %1444 = vrot.lane.b32.xlu2 %v5361_v22, %s4548_s12  ;;  %v8484_v22 = vld [vmem:[#allocation113_spill] sm:$0xff] }
 0x208   : > { %8477 = vst [vmem:[#allocation104_spill] sm:$0xff] %v5735_v52  ;;  %v659_v52 = vld [vmem:[#allocation2 + $0x39] sm:$0xff] }
 0x209   : > { %1442 = vrot.lane.b32.xlu1 %v8480_v51, %s4548_s12 }
 0x20b   : > { %1446 = vrot.lane.b32.xlu0 %v8481_v38, %s4548_s12  ;;  %v5749_v5 = vpop.permute.xlu1 %1294 }
 0x20c   : > { %8483 = vst [vmem:[#allocation109_spill] sm:$0xff] %v5749_v5  ;;  %v658_v5 = vld [vmem:[#allocation2 + $0x31] sm:$0xff] }
 0x20d   : > { %v5751_v32 = vpop.permute.xlu0 %1298 }
 0x20f   : > { %v5747_v14 = vpop.permute.xlu2 %1314  ;;  %1450 = vrot.lane.b32.xlu2 %v5379_v11, %s4548_s12 }
 0x210   : > { %8482 = vst [vmem:[#allocation105_spill] sm:$0xff] %v5747_v14  ;;  %v657_v14 = vld [vmem:[#allocation2 + $0x1a0] sm:$0xff] }
 0x211   : > { %1448 = vrot.lane.b32.xlu1 %v5365_v26, %s4548_s12 }
 0x213   : > { %1452 = vrot.lane.b32.xlu0 %v8484_v22, %s4548_s12  ;;  %v5761_v51 = vpop.permute.xlu1 %1300 }
 0x215   : > { %v5763_v38 = vpop.permute.xlu0 %1304 }
 0x216   : > { %8486 = vst [vmem:[#allocation153_spill] sm:$0xff] %v5763_v38  ;;  %v682_v38 = vld [vmem:[#allocation2 + $0x151] sm:$0xff] }
 0x217   : > { %v5759_v35 = vpop.permute.xlu2 %1320  ;;  %1456 = vrot.lane.b32.xlu2 %v657_v14, %s4548_s12 }
 0x218   : > { %8485 = vst [vmem:[#allocation113_spill] sm:$0xff] %v5759_v35  ;;  %v660_v35 = vld [vmem:[#allocation2 + $0x49] sm:$0xff] }
 0x219   : > { %1454 = vrot.lane.b32.xlu1 %v656_v7, %s4548_s12 }
 0x21b   : > { %1522 = vrot.lane.b32.xlu0 %v658_v5, %s4549_s13  ;;  %v5770_v11 = vpop.permute.xlu1 %1306 }
 0x21c   : > { %8488 = vst [vmem:[#allocation155_spill] sm:$0xff] %v5770_v11  ;;  %v668_v11 = vld [vmem:[#allocation2 + $0xa9] sm:$0xff] }
 0x21d   : > { %v5772_v22 = vpop.permute.xlu0 %1310 }
 0x21e   : > { %8489 = vst [vmem:[#allocation156_spill] sm:$0xff] %v5772_v22  ;;  %v666_v22 = vld [vmem:[#allocation2 + $0x91] sm:$0xff] }
 0x21f   : > { %v5768_v26 = vpop.permute.xlu2 %1326  ;;  %1526 = vrot.lane.b32.xlu2 %v660_v35, %s4549_s13 }
 0x220   : > { %8487 = vst [vmem:[#allocation154_spill] sm:$0xff] %v5768_v26  ;;  %v663_v26 = vld [vmem:[#allocation2 + $0x69] sm:$0xff] }
 0x221   : > { %1524 = vrot.lane.b32.xlu1 %v659_v52, %s4549_s13 }
 0x223   : > { %1528 = vrot.lane.b32.xlu0 %v661_v17, %s4549_s13  ;;  %v5779_v7 = vpop.permute.xlu1 %1312 }
 0x224   : > { %8490 = vst [vmem:[#allocation157_spill] sm:$0xff] %v5779_v7  ;;  %v667_v7 = vld [vmem:[#allocation2 + $0x99] sm:$0xff] }
 0x225   : > { %v5781_v5 = vpop.permute.xlu0 %1316 }
 0x226   : > { %8491 = vst [vmem:[#allocation158_spill] sm:$0xff] %v5781_v5  ;;  %v669_v5 = vld [vmem:[#allocation2 + $0xb1] sm:$0xff] }
 0x227   : > { %v5777_v14 = vpop.permute.xlu2 %1396  ;;  %1532 = vrot.lane.b32.xlu2 %v663_v26, %s4549_s13 }
 0x229   : > { %1530 = vrot.lane.b32.xlu1 %v662_v13, %s4549_s13 }
 0x22b   : > { %1534 = vrot.lane.b32.xlu0 %v664_v63, %s4549_s13  ;;  %v5788_v52 = vpop.permute.xlu1 %1318 }
 0x22c   : > { %8492 = vst [vmem:[#allocation159_spill] sm:$0xff] %v5788_v52  ;;  %v670_v52 = vld [vmem:[#allocation2 + $0xc1] sm:$0xff] }
 0x22d   : > { %v5790_v17 = vpop.permute.xlu0 %1322 }
 0x22e   : > { %8493 = vst [vmem:[#allocation160_spill] sm:$0xff] %v5790_v17  ;;  %v672_v17 = vld [vmem:[#allocation2 + $0xd9] sm:$0xff] }
 0x22f   : > { %v5786_v35 = vpop.permute.xlu2 %1402  ;;  %1538 = vrot.lane.b32.xlu2 %v666_v22, %s4549_s13 }
 0x231   : > { %1536 = vrot.lane.b32.xlu1 %v665_v50, %s4549_s13 }
 0x233   : > { %1540 = vrot.lane.b32.xlu0 %v667_v7, %s4549_s13  ;;  %v5797_v13 = vpop.permute.xlu1 %1324 }
 0x234   : > { %8494 = vst [vmem:[#allocation161_spill] sm:$0xff] %v5797_v13  ;;  %v673_v13 = vld [vmem:[#allocation2 + $0xe1] sm:$0xff] }
 0x235   : > { %v5799_v63 = vpop.permute.xlu0 %1328 }
 0x236   : > { %8495 = vst [vmem:[#allocation162_spill] sm:$0xff] %v5799_v63  ;;  %v675_v63 = vld [vmem:[#allocation2 + $0xf9] sm:$0xff] }
 0x237   : > { %v5795_v26 = vpop.permute.xlu2 %1408  ;;  %1544 = vrot.lane.b32.xlu2 %v669_v5, %s4549_s13 }
 0x239   : > { %1542 = vrot.lane.b32.xlu1 %v668_v11, %s4549_s13 }
 0x23b   : > { %1546 = vrot.lane.b32.xlu0 %v670_v52, %s4549_s13  ;;  %v5806_v50 = vpop.permute.xlu1 %1394 }
 0x23d   : > { %v5808_v7 = vpop.permute.xlu0 %1398 }
 0x23f   : > { %v5804_v22 = vpop.permute.xlu2 %1414  ;;  %1550 = vrot.lane.b32.xlu2 %v672_v17, %s4549_s13 }
 0x240   : > { %8496 = vst [vmem:[#allocation163_spill] sm:$0xff] %v5804_v22  ;;  %v674_v22 = vld [vmem:[#allocation2 + $0xf1] sm:$0xff] }
 0x241   : > { %1548 = vrot.lane.b32.xlu1 %v671_v21, %s4549_s13 }
 0x243   : > { %1552 = vrot.lane.b32.xlu0 %v673_v13, %s4549_s13  ;;  %v5815_v11 = vpop.permute.xlu1 %1400 }
 0x245   : > { %v5817_v52 = vpop.permute.xlu0 %1404 }
 0x247   : > { %v5813_v5 = vpop.permute.xlu2 %1420  ;;  %1556 = vrot.lane.b32.xlu2 %v675_v63, %s4549_s13 }
 0x248   : > { %8497 = vst [vmem:[#allocation164_spill] sm:$0xff] %v5813_v5  ;;  %v678_v5 = vld [vmem:[#allocation2 + $0x121] sm:$0xff] }
 0x249   : > { %1554 = vrot.lane.b32.xlu1 %v674_v22, %s4549_s13 }
 0x24b   : > { %1558 = vrot.lane.b32.xlu0 %v676_v4, %s4549_s13  ;;  %v5824_v21 = vpop.permute.xlu1 %1406 }
 0x24d   : > { %v5826_v13 = vpop.permute.xlu0 %1410 }
 0x24e   : > { %8498 = vst [vmem:[#allocation165_spill] sm:$0xff] %v5826_v13  ;;  %v710_v13 = vld [vmem:[#allocation2 + $0x122] sm:$0xff] }
 0x24f   : > { %v5822_v17 = vpop.permute.xlu2 %1426  ;;  %1562 = vrot.lane.b32.xlu2 %v678_v5, %s4549_s13 }
 0x251   : > { %1560 = vrot.lane.b32.xlu1 %v677_v24, %s4549_s13 }
 0x253   : > { %1564 = vrot.lane.b32.xlu0 %v679_v60, %s4549_s13  ;;  %v5833_v22 = vpop.permute.xlu1 %1412 }
 0x254   : > { %8500 = vst [vmem:[#allocation167_spill] sm:$0xff] %v5833_v22  ;;  %v685_v22 = vld [vmem:[#allocation2 + $0x171] sm:$0xff] }
 0x255   : > { %v5835_v4 = vpop.permute.xlu0 %1416 }
 0x256   : > { %8501 = vst [vmem:[#allocation168_spill] sm:$0xff] %v5835_v4  ;;  %v694_v4 = vld [vmem:[#allocation2 + $0x62] sm:$0xff] }
 0x257   : > { %v5831_v63 = vpop.permute.xlu2 %1432  ;;  %1568 = vrot.lane.b32.xlu2 %v681_v29, %s4549_s13 }
 0x258   : > { %8499 = vst [vmem:[#allocation166_spill] sm:$0xff] %v5831_v63  ;;  %v684_v63 = vld [vmem:[#allocation2 + $0x169] sm:$0xff] }
 0x259   : > { %1566 = vrot.lane.b32.xlu1 %v680_v15, %s4549_s13 }
 0x25b   : > { %1570 = vrot.lane.b32.xlu0 %v682_v38, %s4549_s13  ;;  %v5842_v24 = vpop.permute.xlu1 %1418 }
 0x25c   : > { %8503 = vst [vmem:[#allocation170_spill] sm:$0xff] %v5842_v24  ;;  %v692_v24 = vld [vmem:[#allocation2 + $0x4a] sm:$0xff] }
 0x25d   : > { %v5844_v60 = vpop.permute.xlu0 %1422 }
 0x25e   : > { %8504 = vst [vmem:[#allocation171_spill] sm:$0xff] %v5844_v60  ;;  %v689_v60 = vld [vmem:[#allocation2 + $0x1a1] sm:$0xff] }
 0x25f   : > { %v5840_v5 = vpop.permute.xlu2 %1438  ;;  %1574 = vrot.lane.b32.xlu2 %v684_v63, %s4549_s13 }
 0x260   : > { %8502 = vst [vmem:[#allocation169_spill] sm:$0xff] %v5840_v5  ;;  %v688_v5 = vld [vmem:[#allocation2 + $0x199] sm:$0xff] }
 0x261   : > { %1572 = vrot.lane.b32.xlu1 %v683_v44, %s4549_s13 }
 0x263   : > { %1576 = vrot.lane.b32.xlu0 %v685_v22, %s4549_s13  ;;  %v5851_v15 = vpop.permute.xlu1 %1424 }
 0x264   : > { %8506 = vst [vmem:[#allocation173_spill] sm:$0xff] %v5851_v15  ;;  %v691_v15 = vld [vmem:[#allocation2 + $0x3a] sm:$0xff] }
 0x265   : > { %v5853_v38 = vpop.permute.xlu0 %1428 }
 0x267   : > { %v5849_v29 = vpop.permute.xlu2 %1444  ;;  %1580 = vrot.lane.b32.xlu2 %v5515_v28, %s4549_s13 }
 0x268   : > { %8505 = vst [vmem:[#allocation172_spill] sm:$0xff] %v5849_v29  ;;  %v690_v29 = vld [vmem:[#allocation2 + $0x32] sm:$0xff] }
 0x269   : > { %1578 = vrot.lane.b32.xlu1 %v5501_v57, %s4549_s13 }
 0x26b   : > { %1582 = vrot.lane.b32.xlu0 %v688_v5, %s4549_s13  ;;  %v5862_v44 = vpop.permute.xlu1 %1430 }
 0x26c   : > { %8508 = vst [vmem:[#allocation175_spill] sm:$0xff] %v5862_v44 }
 0x26d   : > { %v5864_v22 = vpop.permute.xlu0 %1434 }
 0x26e   : > { %8509 = vst [vmem:[#allocation176_spill] sm:$0xff] %v5864_v22  ;;  %v695_v22 = vld [vmem:[#allocation2 + $0x6a] sm:$0xff] }
 0x26f   : > { %v5860_v63 = vpop.permute.xlu2 %1450  ;;  %1650 = vrot.lane.b32.xlu2 %v690_v29, %s4550_s14 }
 0x270   : > { %8507 = vst [vmem:[#allocation174_spill] sm:$0xff] %v5860_v63  ;;  %v693_v63 = vld [vmem:[#allocation2 + $0x52] sm:$0xff] }
 0x271   : > { %1584 = vrot.lane.b32.xlu1 %v689_v60, %s4549_s13 }
 0x273   : > { %1652 = vrot.lane.b32.xlu0 %v691_v15, %s4550_s14  ;;  %v5871_v57 = vpop.permute.xlu1 %1436 }
 0x274   : > { %8511 = vst [vmem:[#allocation178_spill] sm:$0xff] %v5871_v57  ;;  %v697_v57 = vld [vmem:[#allocation2 + $0x82] sm:$0xff] }
 0x275   : > { %v5873_v5 = vpop.permute.xlu0 %1440 }
 0x276   : > { %8512 = vst [vmem:[#allocation179_spill] sm:$0xff] %v5873_v5  ;;  %v699_v5 = vld [vmem:[#allocation2 + $0x9a] sm:$0xff] }
 0x277   : > { %v5869_v28 = vpop.permute.xlu2 %1456  ;;  %1656 = vrot.lane.b32.xlu2 %v693_v63, %s4550_s14 }
 0x278   : > { %8510 = vst [vmem:[#allocation177_spill] sm:$0xff] %v5869_v28  ;;  %v696_v28 = vld [vmem:[#allocation2 + $0x7a] sm:$0xff] }
 0x279   : > { %1654 = vrot.lane.b32.xlu1 %v692_v24, %s4550_s14 }
 0x27b   : > { %1658 = vrot.lane.b32.xlu0 %v694_v4, %s4550_s14  ;;  %v5880_v60 = vpop.permute.xlu1 %1442 }
 0x27c   : > { %8513 = vst [vmem:[#allocation180_spill] sm:$0xff] %v5880_v60  ;;  %v700_v60 = vld [vmem:[#allocation2 + $0xaa] sm:$0xff] }
 0x27d   : > { %v5882_v15 = vpop.permute.xlu0 %1446 }
 0x27e   : > { %8514 = vst [vmem:[#allocation181_spill] sm:$0xff] %v5882_v15  ;;  %v702_v15 = vld [vmem:[#allocation2 + $0xc2] sm:$0xff] }
 0x27f   : > { %v5878_v29 = vpop.permute.xlu2 %1526  ;;  %1662 = vrot.lane.b32.xlu2 %v696_v28, %s4550_s14 }
 0x281   : > { %1660 = vrot.lane.b32.xlu1 %v695_v22, %s4550_s14 }
 0x283   : > { %1664 = vrot.lane.b32.xlu0 %v697_v57, %s4550_s14  ;;  %v5889_v24 = vpop.permute.xlu1 %1448 }
 0x284   : > { %8515 = vst [vmem:[#allocation182_spill] sm:$0xff] %v5889_v24  ;;  %v703_v24 = vld [vmem:[#allocation2 + $0xca] sm:$0xff] }
 0x285   : > { %v5891_v4 = vpop.permute.xlu0 %1452 }
 0x286   : > { %8516 = vst [vmem:[#allocation183_spill] sm:$0xff] %v5891_v4  ;;  %v705_v4 = vld [vmem:[#allocation2 + $0xe2] sm:$0xff] }
 0x287   : > { %v5887_v63 = vpop.permute.xlu2 %1532  ;;  %1668 = vrot.lane.b32.xlu2 %v699_v5, %s4550_s14 }
 0x289   : > { %1666 = vrot.lane.b32.xlu1 %v698_v16, %s4550_s14 }
 0x28b   : > { %1670 = vrot.lane.b32.xlu0 %v700_v60, %s4550_s14  ;;  %v5898_v22 = vpop.permute.xlu1 %1454 }
 0x28c   : > { %8518 = vst [vmem:[#allocation185_spill] sm:$0xff] %v5898_v22  ;;  %v706_v22 = vld [vmem:[#allocation2 + $0xf2] sm:$0xff] }
 0x28d   : > { %v5900_v57 = vpop.permute.xlu0 %1522 }
 0x28f   : > { %v5896_v28 = vpop.permute.xlu2 %1538  ;;  %1674 = vrot.lane.b32.xlu2 %v702_v15, %s4550_s14 }
 0x290   : > { %8517 = vst [vmem:[#allocation184_spill] sm:$0xff] %v5896_v28 }
 0x291   : > { %1672 = vrot.lane.b32.xlu1 %v701_v6, %s4550_s14 }
 0x293   : > { %1676 = vrot.lane.b32.xlu0 %v703_v24, %s4550_s14  ;;  %v5907_v16 = vpop.permute.xlu1 %1524  ;;  %v2017_v24 = vld [vmem:[%s8202_s1 + $0x40] sm:$0xff] }
 0x294   : > { %2122 = vmatpush.msra.mxu0 %v2017_v24  ;;  %4452 = vmatpush.msra.mxu2 %v2017_v24  ;;  %v2014_v24 = vld [vmem:[%s8202_s1 + $0x28] sm:$0xff] }
 0x295   : > { %v5909_v60 = vpop.permute.xlu0 %1528 }
 0x297   : > { %v5905_v5 = vpop.permute.xlu2 %1544  ;;  %1680 = vrot.lane.b32.xlu2 %v705_v4, %s4550_s14  ;;  %v2016_v4 = vld [vmem:[%s8202_s1 + $0x38] sm:$0xff] }
 0x298   : > { %8519 = vst [vmem:[#allocation186_spill] sm:$0xff] %v5905_v5  ;;  %2123 = vmatpush.msra.mxu0 %v2016_v4  ;;  %4453 = vmatpush.msra.mxu2 %v2016_v4  ;;  %v2013_v4 = vld [vmem:[%s8202_s1 + $0x20] sm:$0xff] }
 0x299   : > { %1678 = vrot.lane.b32.xlu1 %v704_v48, %s4550_s14  ;;  %v2015_v48 = vld [vmem:[%s8202_s1 + $0x30] sm:$0xff] }
 0x29a   : > { %2124 = vmatpush.msra.mxu0 %v2015_v48  ;;  %4454 = vmatpush.msra.mxu2 %v2015_v48  ;;  %v2012_v48 = vld [vmem:[%s8202_s1 + $0x18] sm:$0xff] }
 0x29b   : > { %1682 = vrot.lane.b32.xlu0 %v706_v22, %s4550_s14  ;;  %v5916_v6 = vpop.permute.xlu1 %1530  ;;  %v707_v22 = vld [vmem:[#allocation2 + $0xfa] sm:$0xff] }
 0x29c   : > { %2125 = vmatpush.msra.mxu0 %v2014_v24  ;;  %4455 = vmatpush.msra.mxu2 %v2014_v24  ;;  %v2010_v24 = vld [vmem:[%s8202_s1 + $0x8] sm:$0xff] }
 0x29d   : > { %v5921_v5 = vpop.permute.xlu0 %1534 }
 0x29e   : > { %2126 = vmatpush.msra.mxu0 %v2013_v4  ;;  %4456 = vmatpush.msra.mxu2 %v2013_v4 }
 0x29f   : > { %v5914_v15 = vpop.permute.xlu2 %1550  ;;  %1686 = vrot.lane.b32.xlu2 %v708_v47, %s4550_s14 }
 0x2a0   : > { %8520 = vst [vmem:[#allocation187_spill] sm:$0xff] %v5914_v15  ;;  %v709_v15 = vld [vmem:[#allocation2 + $0x112] sm:$0xff]  ;;  %2127 = vmatpush.msra.mxu0 %v2012_v48  ;;  %4457 = vmatpush.msra.mxu2 %v2012_v48  ;;  %v713_v48 = vld [vmem:[#allocation2 + $0x142] sm:$0xff] }
 0x2a1   : > { %1684 = vrot.lane.b32.xlu1 %v707_v22, %s4550_s14  ;;  %v711_v22 = vld [vmem:[#allocation2 + $0x12a] sm:$0xff] }
 0x2a3   : > { %1688 = vrot.lane.b32.xlu0 %v709_v15, %s4550_s14  ;;  %v5937_v44 = vpop.permute.xlu1 %1536  ;;  %v2011_v15 = vld [vmem:[%s8202_s1 + $0x10] sm:$0xff] }
 0x2a4   : > { %2128 = vmatpush.msra.mxu0 %v2011_v15  ;;  %4458 = vmatpush.msra.mxu2 %v2011_v15 }
 0x2a5   : > { %v5942_v47 = vpop.permute.xlu0 %1540 }
 0x2a6   : > { %8521 = vst [vmem:[#allocation188_spill] sm:$0xff] %v5942_v47  ;;  %2129 = vmatpush.msra.mxu0 %v2010_v24  ;;  %4459 = vmatpush.msra.mxu2 %v2010_v24  ;;  %v717_v24 = vld [vmem:[#allocation2 + $0x172] sm:$0xff] }
 0x2a7   : > { %v5935_v28 = vpop.permute.xlu2 %1556  ;;  %1692 = vrot.lane.b32.xlu2 %v711_v22, %s4550_s14  ;;  %v714_v22 = vld [vmem:[#allocation2 + $0x152] sm:$0xff] }
 0x2a8   : > { %2130 = vmatpush.msra.mxu0 %v2009_v54  ;;  %4460 = vmatpush.msra.mxu2 %v2009_v54 }
 0x2a9   : > { %1690 = vrot.lane.b32.xlu1 %v710_v13, %s4550_s14  ;;  %v715_v13 = vld [vmem:[#allocation2 + $0x15a] sm:$0xff] }
 0x2ab   : > { %1694 = vrot.lane.b32.xlu0 %v712_v9, %s4550_s14  ;;  %v5958_v4 = vpop.permute.xlu1 %1542 }
 0x2ac   : > { %8523 = vst [vmem:[#allocation190_spill] sm:$0xff] %v5958_v4 }
 0x2ad   : > { %v5963_v1 = vpop.permute.xlu0 %1546 }
 0x2ae   : > { %8524 = vst [vmem:[#allocation191_spill] sm:$0xff] %v5963_v1  ;;  %v8532_v1 = vld [vmem:[#allocation64_spill] sm:$0xff] }
 0x2af   : > { %v5956_v47 = vpop.permute.xlu2 %1562  ;;  %1698 = vrot.lane.b32.xlu2 %v714_v22, %s4550_s14 }
 0x2b0   : > { %8522 = vst [vmem:[#allocation189_spill] sm:$0xff] %v5956_v47  ;;  %v716_v47 = vld [vmem:[#allocation2 + $0x16a] sm:$0xff] }
 0x2b1   : > { %1696 = vrot.lane.b32.xlu1 %v713_v48, %s4550_s14 }
 0x2b3   : > { %1700 = vrot.lane.b32.xlu0 %v715_v13, %s4550_s14  ;;  %v5970_v15 = vpop.permute.xlu1 %1548  ;;  %v720_v13 = vld [vmem:[#allocation2 + $0x19a] sm:$0xff] }
 0x2b4   : > { %8526 = vst [vmem:[#allocation193_spill] sm:$0xff] %v5970_v15 }
 0x2b5   : > { %v5972_v4 = vpop.permute.xlu0 %1552 }
 0x2b6   : > { %8527 = vst [vmem:[#allocation194_spill] sm:$0xff] %v5972_v4  ;;  %v433_v4 = vld [vmem:[#allocation2] sm:$0xff] }
 0x2b7   : > { %v5968_v9 = vpop.permute.xlu2 %1568  ;;  %1704 = vrot.lane.b32.xlu2 %v717_v24, %s4550_s14  ;;  %v8531_v24 = vld [vmem:[#allocation37_spill] sm:$0xff] }
 0x2b8   : > { %8525 = vst [vmem:[#allocation192_spill] sm:$0xff] %v5968_v9  ;;  %v721_v9 = vld [vmem:[#allocation2 + $0x1a2] sm:$0xff] }
 0x2b9   : > { %1702 = vrot.lane.b32.xlu1 %v716_v47, %s4550_s14 }
 0x2bb   : > { %1706 = vrot.lane.b32.xlu0 %v5637_v3, %s4550_s14  ;;  %v5980_v22 = vpop.permute.xlu1 %1554 }
 0x2bd   : > { %v5982_v48 = vpop.permute.xlu0 %1558 }
 0x2be   : > { %8529 = vst [vmem:[#allocation196_spill] sm:$0xff] %v5982_v48 }
 0x2bf   : > { %v5978_v54 = vpop.permute.xlu2 %1574  ;;  %1710 = vrot.lane.b32.xlu2 %v720_v13, %s4550_s14 }
 0x2c0   : > { %8528 = vst [vmem:[#allocation195_spill] sm:$0xff] %v5978_v54  ;;  %v1746_v54 = vsel %vm279_vm0, %v433_v4, %v8531_v24 }
 0x2c1   : > { %1708 = vrot.lane.b32.xlu1 %v5639_v12, %s4550_s14  ;;  %v1779_v48 = vsel %vm1778_vm3, %v1746_v54, %v8532_v1 }
 0x2c2   : > { %v1812_v12 = vsel %vm1811_vm4, %v1779_v48, %v5437_v30 }
 0x2c3   : > { %1712 = vrot.lane.b32.xlu0 %v721_v9, %s4550_s14  ;;  %v5990_v3 = vpop.permute.xlu1 %1560  ;;  %v1845_v9 = vsel %vm1844_vm6, %v1812_v12, %v5563_v45  ;;  %v434_v12 = vld [vmem:[#allocation2 + $0x8] sm:$0xff] }
 0x2c4   : > { %v1878_v13 = vsel %vm1877_vm5, %v1845_v9, %v5657_v49 }
 0x2c5   : > { %v5994_v15 = vpop.permute.xlu0 %1564  ;;  %v1911_v4 = vsel %vm1910_vm7, %v1878_v13, %v5806_v50  ;;  %v8536_v13 = vld [vmem:[#allocation40_spill] sm:$0xff] }
 0x2c6   : > { %v1944_v1 = vsel %vm1943_vm9, %v1911_v4, %v5900_v57  ;;  %v1747_v57 = vsel %vm279_vm0, %v434_v12, %v8536_v13  ;;  %v8537_v4 = vld [vmem:[#allocation81_spill] sm:$0xff] }
 0x2c7   : > { %v5988_v47 = vpop.permute.xlu2 %1580 }
 0x2c8   : > { %8530 = vst [vmem:[#allocation197_spill] sm:$0xff] %v5988_v47  ;;  %v1780_v47 = vsel %vm1778_vm3, %v1747_v57, %v8537_v4  ;;  %v4491_v4 = vld [vmem:[#allocation2 + $0x18] sm:$0xff] }
 0x2cb   : > { %v6008_v24 = vpop.permute.xlu1 %1566 }
 0x2cd   : > { %v6011_v48 = vpop.permute.xlu0 %1570 }
 0x2cf   : > { %v1651_v54 = vpop.permute.xlu2 %1650 }
 0x2d0   : > { %v1977_v30 = vsel %vm1976_vm8, %v1944_v1, %v1651_v54  ;;  %v1813_v1 = vsel %vm1811_vm4, %v1780_v47, %v5399_v0 }
 0x2d1   : > { %4384 = vmatmul.msk.f32.vlgmr.msra.gmra.mxu0 %vm2018_vm10, %v1977_v30  ;;  %v1846_v54 = vsel %vm1844_vm6, %v1813_v1, %v5573_v43  ;;  %v8539_v43 = vld [vmem:[#allocation85_spill] sm:$0xff] }
 0x2d2   : > { %v1879_v30 = vsel %vm1877_vm5, %v1846_v54, %v5694_v23 }
 0x2d3   : > { %v6014_v45 = vpop.permute.xlu1 %1572 }
 0x2d5   : > { %v6016_v49 = vpop.permute.xlu0 %1576 }
 0x2d6   : > { %8533 = vst [vmem:[#allocation37_spill] sm:$0xff] %v6016_v49 }
 0x2d7   : > { %v1657_v47 = vpop.permute.xlu2 %1656 }
 0x2db   : > { %v6018_v50 = vpop.permute.xlu1 %1578 }
 0x2dc   : > { %8534 = vst [vmem:[#allocation64_spill] sm:$0xff] %v6018_v50  ;;  %v1912_v50 = vsel %vm1910_vm7, %v1879_v30, %v5777_v14 }
 0x2dd   : > { %v6020_v9 = vpop.permute.xlu0 %1582  ;;  %v1945_v12 = vsel %vm1943_vm9, %v1912_v50, %v5907_v16 }
 0x2de   : > { %8535 = vst [vmem:[#allocation198_spill] sm:$0xff] %v6020_v9  ;;  %v8538_v9 = vld [vmem:[#allocation39_spill] sm:$0xff] }
 0x2df   : > { %v1748_v0 = vsel %vm279_vm0, %v4491_v4, %v8538_v9 }
 0x2e0   : > { %v1781_v23 = vsel %vm1778_vm3, %v1748_v0, %v8539_v43  ;;  %v1663_v0 = vpop.permute.xlu2 %1662 }
 0x2e1   : > { %v1814_v14 = vsel %vm1811_vm4, %v1781_v23, %v5439_v34 }
 0x2e2   : > { %v1847_v1 = vsel %vm1844_vm6, %v1814_v14, %v5535_v62  ;;  %v8541_v62 = vld [vmem:[#allocation69_spill] sm:$0xff] }
 0x2e3   : > { %v6034_v49 = vpop.permute.xlu1 %1584  ;;  %v1880_v16 = vsel %vm1877_vm5, %v1847_v1, %v5703_v55 }
 0x2e4   : > { %v1913_v50 = vsel %vm1910_vm7, %v1880_v16, %v5808_v7 }
 0x2e5   : > { %v1653_v13 = vpop.permute.xlu0 %1652  ;;  %v1946_v9 = vsel %vm1943_vm9, %v1913_v50, %v5878_v29  ;;  %v4493_v50 = vld [vmem:[#allocation2 + $0x30] sm:$0xff] }
 0x2e6   : > { %v1978_v57 = vsel %vm1976_vm8, %v1945_v12, %v1653_v13  ;;  %v4492_v13 = vld [vmem:[#allocation2 + $0x20] sm:$0xff] }
 0x2e7   : > { %4385 = vmatmul.msk.f32.gmra.mxu0 %vm2018_vm10, %v1978_v57  ;;  %v8540_v57 = vld [vmem:[#allocation42_spill] sm:$0xff] }
 0x2e8   : > { %v1749_v34 = vsel %vm279_vm0, %v4492_v13, %v8540_v57  ;;  %v6090_v57 = vpop.permute.xlu2 %1668 }
 0x2e9   : > { %v1782_v4 = vsel %vm1778_vm3, %v1749_v34, %v8541_v62  ;;  %v4494_v62 = vld [vmem:[#allocation2 + $0x38] sm:$0xff] }
 0x2ea   : > { %v1815_v55 = vsel %vm1811_vm4, %v1782_v4, %v5449_v36  ;;  %v8542_v36 = vld [vmem:[#allocation34_spill] sm:$0xff]  ;;  %v8544_v4 = vld [vmem:[#allocation35_spill] sm:$0xff] }
 0x2eb   : > { %v1655_v54 = vpop.permute.xlu1 %1654  ;;  %v1848_v7 = vsel %vm1844_vm6, %v1815_v55, %v5575_v39  ;;  %v8543_v39 = vld [vmem:[#allocation86_spill] sm:$0xff] }
 0x2ec   : > { %v1979_v12 = vsel %vm1976_vm8, %v1946_v9, %v1655_v54  ;;  %v1881_v29 = vsel %vm1877_vm5, %v1848_v7, %v5668_v10  ;;  %v1750_v54 = vsel %vm279_vm0, %v4493_v50, %v8542_v36  ;;  %v4495_v50 = vld [vmem:[#allocation2 + $0x48] sm:$0xff] }
 0x2ed   : > { %v1659_v30 = vpop.permute.xlu0 %1658  ;;  %v1914_v43 = vsel %vm1910_vm7, %v1881_v29, %v5815_v11  ;;  %v1783_v10 = vsel %vm1778_vm3, %v1750_v54, %v8543_v39  ;;  %v8547_v54 = vld [vmem:[#allocation56_spill] sm:$0xff] }
 0x2ee   : > { %v1947_v14 = vsel %vm1943_vm9, %v1914_v43, %v5909_v60  ;;  %v1816_v11 = vsel %vm1811_vm4, %v1783_v10, %v5411_v8 }
 0x2ef   : > { %4386 = vmatmul.msk.f32.gmra.mxu0 %vm2018_vm10, %v1979_v12  ;;  %v1980_v16 = vsel %vm1976_vm8, %v1947_v14, %v1657_v47  ;;  %v1849_v9 = vsel %vm1844_vm6, %v1816_v11, %v5585_v37  ;;  %v1751_v37 = vsel %vm279_vm0, %v4494_v62, %v8544_v4 }
 0x2f0   : > { %v1882_v60 = vsel %vm1877_vm5, %v1849_v9, %v5705_v53  ;;  %v8545_v53 = vld [vmem:[#allocation91_spill] sm:$0xff]  ;;  %v6119_v39 = vpop.permute.xlu2 %1674 }
 0x2f1   : > { %v1915_v47 = vsel %vm1910_vm7, %v1882_v60, %v5786_v35  ;;  %v1784_v35 = vsel %vm1778_vm3, %v1751_v37, %v8545_v53  ;;  %v8550_v53 = vld [vmem:[#allocation44_spill] sm:$0xff] }
 0x2f2   : > { %v1948_v13 = vsel %vm1943_vm9, %v1915_v47, %v5916_v6  ;;  %v1817_v55 = vsel %vm1811_vm4, %v1784_v35, %v5451_v40  ;;  %v8546_v40 = vld [vmem:[#allocation43_spill] sm:$0xff]  ;;  %v4498_v35 = vld [vmem:[#allocation2 + $0x50] sm:$0xff] }
 0x2f3   : > { %v1661_v23 = vpop.permute.xlu1 %1660  ;;  %v1981_v8 = vsel %vm1976_vm8, %v1948_v13, %v1659_v30  ;;  %v1850_v6 = vsel %vm1844_vm6, %v1817_v55, %v5547_v20  ;;  %v1752_v36 = vsel %vm279_vm0, %v4495_v50, %v8546_v40  ;;  %v4496_v20 = vld [vmem:[#allocation2 + $0xc0] sm:$0xff]  ;;  %v8551_v55 = vld [vmem:[#allocation45_spill] sm:$0xff] }
 0x2f4   : > { %v1883_v7 = vsel %vm1877_vm5, %v1850_v6, %v5714_v58  ;;  %v1762_v58 = vsel %vm279_vm0, %v4496_v20, %v8547_v54  ;;  %v8553_v6 = vld [vmem:[#allocation111_spill] sm:$0xff] }
 0x2f5   : > { %v6070_v1 = vpop.permute.xlu0 %1664  ;;  %v1916_v30 = vsel %vm1910_vm7, %v1883_v7, %v5817_v52  ;;  %v8548_v52 = vld [vmem:[#allocation74_spill] sm:$0xff] }
 0x2f6   : > { %v1949_v43 = vsel %vm1943_vm9, %v1916_v30, %v5887_v63  ;;  %v1785_v10 = vsel %vm1778_vm3, %v1752_v36, %v8548_v52  ;;  %v8549_v63 = vld [vmem:[#allocation108_spill] sm:$0xff] }
 0x2f7   : > { %4387 = vmatmul.msk.f32.gmra.mxu0 %vm2018_vm10, %v1980_v16  ;;  %v1982_v16 = vsel %vm1976_vm8, %v1949_v43, %v1661_v23  ;;  %v1795_v11 = vsel %vm1778_vm3, %v1762_v58, %v8549_v63  ;;  %v1818_v9 = vsel %vm1811_vm4, %v1785_v10, %v5461_v42  ;;  %v4499_v58 = vld [vmem:[#allocation2 + $0x60] sm:$0xff]  ;;  %v8555_v10 = vld [vmem:[#allocation57_spill] sm:$0xff] }
 0x2f8   : > { %v1828_v23 = vsel %vm1811_vm4, %v1795_v11, %v5459_v41  ;;  %v1851_v60 = vsel %vm1844_vm6, %v1818_v9, %v5587_v33  ;;  %v6164_v43 = vpop.permute.xlu2 %1680  ;;  %v8557_v63 = vld [vmem:[#allocation96_spill] sm:$0xff] }
 0x2f9   : > { %v1861_v47 = vsel %vm1844_vm6, %v1828_v23, %v5633_v25  ;;  %v1884_v13 = vsel %vm1877_vm5, %v1851_v60, %v5679_v2  ;;  %v8558_v60 = vld [vmem:[#allocation54_spill] sm:$0xff] }
 0x2fa   : > { %v1917_v41 = vsel %vm1910_vm7, %v1884_v13, %v5824_v21  ;;  %v1753_v21 = vsel %vm279_vm0, %v4498_v35, %v8551_v55  ;;  %v8559_v13 = vld [vmem:[#allocation93_spill] sm:$0xff]  ;;  %v8565_v55 = vld [vmem:[#allocation46_spill] sm:$0xff] }
 0x2fb   : > { %v6086_v12 = vpop.permute.xlu1 %1666  ;;  %v1950_v42 = vsel %vm1943_vm9, %v1917_v41, %v5921_v5  ;;  %v8552_v5 = vld [vmem:[#allocation92_spill] sm:$0xff]  ;;  %v4501_v35 = vld [vmem:[#allocation2 + $0x68] sm:$0xff] }
 0x2fc   : > { %v1983_v2 = vsel %vm1976_vm8, %v1950_v42, %v1663_v0 }
 0x2fd   : > { %v6092_v34 = vpop.permute.xlu0 %1670 }
 0x2ff   : > { %4388 = vmatmul.msk.f32.gmra.mxu0 %vm2018_vm10, %v1981_v8  ;;  %v1894_v8 = vsel %vm1877_vm5, %v1861_v47, %v5751_v32  ;;  %v4497_v32 = vld [vmem:[#allocation2 + $0xc8] sm:$0xff] }
 0x300   : > { %v1927_v62 = vsel %vm1910_vm7, %v1894_v8, %v5822_v17  ;;  %v1763_v17 = vsel %vm279_vm0, %v4497_v32, %v8550_v53  ;;  %v1687_v42 = vpop.permute.xlu2 %1686 }
 0x301   : > { %v1960_v33 = vsel %vm1943_vm9, %v1927_v62, %v5980_v22  ;;  %v1786_v22 = vsel %vm1778_vm3, %v1753_v21, %v8552_v5  ;;  %v1796_v0 = vsel %vm1778_vm3, %v1763_v17, %v8553_v6  ;;  %v8560_v62 = vld [vmem:[#allocation94_spill] sm:$0xff]  ;;  %v1755_v21 = vsel %vm279_vm0, %v4501_v35, %v8565_v55  ;;  %v4502_v5 = vld [vmem:[#allocation2 + $0xe0] sm:$0xff] }
 0x302   : > { %v1819_v7 = vsel %vm1811_vm4, %v1786_v22, %v5423_v19  ;;  %v1829_v30 = vsel %vm1811_vm4, %v1796_v0, %v5499_v56  ;;  %v8566_v22 = vld [vmem:[#allocation62_spill] sm:$0xff]  ;;  %v8567_v0 = vld [vmem:[#allocation79_spill] sm:$0xff] }
 0x303   : > { %v6108_v29 = vpop.permute.xlu1 %1672  ;;  %v1852_v50 = vsel %vm1844_vm6, %v1819_v7, %v5597_v31  ;;  %v1765_v6 = vsel %vm279_vm0, %v4502_v5, %v8566_v22  ;;  %v1788_v7 = vsel %vm1778_vm3, %v1755_v21, %v8567_v0  ;;  %v8588_v21 = vld [vmem:[#allocation163_spill] sm:$0xff]  ;;  %v8589_v22 = vld [vmem:[#allocation176_spill] sm:$0xff]  ;;  %v8590_v0 = vld [vmem:[#allocation189_spill] sm:$0xff] }
 0x304   : > { %v1885_v40 = vsel %vm1877_vm5, %v1852_v50, %v5716_v61 }
 0x305   : > { %v6112_v14 = vpop.permute.xlu0 %1676  ;;  %v1918_v19 = vsel %vm1910_vm7, %v1885_v40, %v5795_v26  ;;  %v4500_v26 = vld [vmem:[#allocation2 + $0xd8] sm:$0xff]  ;;  %v8570_v40 = vld [vmem:[#allocation126_spill] sm:$0xff] }
 0x307   : > { %4389 = vmatmul.msk.f32.gmra.mxu0 %vm2018_vm10, %v1982_v16  ;;  %v1862_v16 = vsel %vm1844_vm6, %v1829_v30, %v5595_v27  ;;  %v1951_v27 = vsel %vm1943_vm9, %v1918_v19, %v5937_v44  ;;  %v8568_v30 = vld [vmem:[#allocation112_spill] sm:$0xff]  ;;  %v8571_v19 = vld [vmem:[#allocation145_spill] sm:$0xff] }
 0x308   : > { %v1895_v36 = vsel %vm1877_vm5, %v1862_v16, %v5761_v51  ;;  %v1984_v31 = vsel %vm1976_vm8, %v1951_v27, %v6070_v1  ;;  %v8554_v51 = vld [vmem:[#allocation36_spill] sm:$0xff]  ;;  %v8569_v16 = vld [vmem:[#allocation125_spill] sm:$0xff]  ;;  %v8573_v27 = vld [vmem:[#allocation78_spill] sm:$0xff] }
 0x309   : > { %v1928_v56 = vsel %vm1910_vm7, %v1895_v36, %v5853_v38  ;;  %v1754_v52 = vsel %vm279_vm0, %v4499_v58, %v8554_v51  ;;  %v1764_v38 = vsel %vm279_vm0, %v4500_v26, %v8555_v10  ;;  %v1821_v36 = vsel %vm1811_vm4, %v1788_v7, %v8570_v40  ;;  %v8576_v10 = vld [vmem:[#allocation167_spill] sm:$0xff]  ;;  %v4505_v40 = vld [vmem:[#allocation2 + $0x80] sm:$0xff] }
 0x30a   : > { %v1961_v54 = vsel %vm1943_vm9, %v1928_v56, %v5935_v28  ;;  %v8556_v28 = vld [vmem:[#allocation95_spill] sm:$0xff]  ;;  %v1787_v1 = vsel %vm1778_vm3, %v1754_v52, %v8557_v63  ;;  %v1854_v56 = vsel %vm1844_vm6, %v1821_v36, %v8571_v19  ;;  %v8575_v52 = vld [vmem:[#allocation166_spill] sm:$0xff] }
 0x30b   : > { %v6142_v4 = vpop.permute.xlu1 %1678  ;;  %v1797_v44 = vsel %vm1778_vm3, %v1764_v38, %v8556_v28  ;;  %v1820_v11 = vsel %vm1811_vm4, %v1787_v1, %v5463_v46  ;;  %v8562_v46 = vld [vmem:[#allocation175_spill] sm:$0xff]  ;;  %v8577_v28 = vld [vmem:[#allocation188_spill] sm:$0xff]  ;;  %v8592_v36 = vld [vmem:[#allocation38_spill] sm:$0xff] }
 0x30c   : > { %v1830_v23 = vsel %vm1811_vm4, %v1797_v44, %v5511_v59  ;;  %v1853_v9 = vsel %vm1844_vm6, %v1820_v11, %v5559_v18  ;;  %v8563_v59 = vld [vmem:[#allocation184_spill] sm:$0xff]  ;;  %v1757_v19 = vsel %vm279_vm0, %v4505_v40, %v8592_v36  ;;  %v8616_v36 = vld [vmem:[#allocation170_spill] sm:$0xff] }
 0x30d   : > { %v1683_v25 = vpop.permute.xlu0 %1682  ;;  %v1863_v47 = vsel %vm1844_vm6, %v1830_v23, %v8558_v60  ;;  %v1886_v41 = vsel %vm1877_vm5, %v1853_v9, %v8560_v62  ;;  %v8564_v18 = vld [vmem:[#allocation196_spill] sm:$0xff]  ;;  %v4503_v23 = vld [vmem:[#allocation2 + $0xf0] sm:$0xff]  ;;  %v8578_v9 = vld [vmem:[#allocation47_spill] sm:$0xff] }
 0x30e   : > { %v1993_v37 = vsel %vm1976_vm8, %v1960_v33, %v1683_v25  ;;  %v1896_v8 = vsel %vm1877_vm5, %v1863_v47, %v8559_v13  ;;  %v8561_v33 = vld [vmem:[#allocation165_spill] sm:$0xff]  ;;  %v1766_v60 = vsel %vm279_vm0, %v4503_v23, %v8578_v9  ;;  %v4504_v47 = vld [vmem:[#allocation2 + $0x78] sm:$0xff]  ;;  %v8579_v13 = vld [vmem:[#allocation48_spill] sm:$0xff]  ;;  %v1693_v9 = vpop.permute.xlu2 %1692 }
 0x30f   : > { %4390 = vmatmul.msk.f32.gmra.mxu0 %vm2018_vm10, %v1983_v2  ;;  %4400 = vmatmul.msk.f32.vlgmr.msra.gmra.mxu2 %vm2018_vm10, %v1993_v37  ;;  %v1919_v25 = vsel %vm1910_vm7, %v1886_v41, %v8561_v33  ;;  %v1929_v2 = vsel %vm1910_vm7, %v1896_v8, %v8562_v46  ;;  %v1756_v8 = vsel %vm279_vm0, %v4504_v47, %v8579_v13  ;;  %v8580_v62 = vld [vmem:[#allocation97_spill] sm:$0xff]  ;;  %v8581_v41 = vld [vmem:[#allocation115_spill] sm:$0xff]  ;;  %v8603_v13 = vld [vmem:[#allocation178_spill] sm:$0xff] }
 0x310   : > { %v1952_v37 = vsel %vm1943_vm9, %v1919_v25, %v8563_v59  ;;  %v1962_v32 = vsel %vm1943_vm9, %v1929_v2, %v8564_v18  ;;  %v8583_v25 = vld [vmem:[#allocation134_spill] sm:$0xff] }
 0x311   : > { %v1985_v53 = vsel %vm1976_vm8, %v1952_v37, %v6086_v12  ;;  %v1995_v17 = vsel %vm1976_vm8, %v1962_v32, %v1687_v42  ;;  %v1798_v12 = vsel %vm1778_vm3, %v1765_v6, %v8568_v30  ;;  %v8582_v42 = vld [vmem:[#allocation123_spill] sm:$0xff]  ;;  %v8584_v2 = vld [vmem:[#allocation146_spill] sm:$0xff] }
 0x312   : > { %v1831_v50 = vsel %vm1811_vm4, %v1798_v12, %v8569_v16  ;;  %v8585_v37 = vld [vmem:[#allocation147_spill] sm:$0xff]  ;;  %v8586_v32 = vld [vmem:[#allocation98_spill] sm:$0xff] }
 0x313   : > { %v1685_v20 = vpop.permute.xlu1 %1684  ;;  %v8591_v30 = vld [vmem:[#allocation190_spill] sm:$0xff] }
 0x314   : > { %v1994_v61 = vsel %vm1976_vm8, %v1961_v54, %v1685_v20  ;;  %v8572_v20 = vld [vmem:[#allocation60_spill] sm:$0xff] }
 0x315   : > { %v1864_v54 = vsel %vm1844_vm6, %v1831_v50, %v8572_v20  ;;  %v1689_v51 = vpop.permute.xlu0 %1688  ;;  %v8593_v20 = vld [vmem:[#allocation63_spill] sm:$0xff] }
 0x317   : > { %4391 = vmatmul.msk.f32.gmra.mxu0 %vm2018_vm10, %v1984_v31  ;;  %4401 = vmatmul.msk.f32.gmra.mxu2 %vm2018_vm10, %v1994_v61  ;;  %v1887_v31 = vsel %vm1877_vm5, %v1854_v56, %v8573_v27  ;;  %v8574_v61 = vld [vmem:[#allocation153_spill] sm:$0xff]  ;;  %v4506_v56 = vld [vmem:[#allocation2 + $0xf8] sm:$0xff]  ;;  %v8594_v27 = vld [vmem:[#allocation100_spill] sm:$0xff] }
 0x318   : > { %v1897_v58 = vsel %vm1877_vm5, %v1864_v54, %v8574_v61  ;;  %v1920_v38 = vsel %vm1910_vm7, %v1887_v31, %v8576_v10  ;;  %v1767_v54 = vsel %vm279_vm0, %v4506_v56, %v8593_v20  ;;  %v8595_v61 = vld [vmem:[#allocation101_spill] sm:$0xff]  ;;  %v8598_v10 = vld [vmem:[#allocation143_spill] sm:$0xff] }
 0x319   : > { %v1930_v26 = vsel %vm1910_vm7, %v1897_v58, %v8575_v52  ;;  %v1953_v44 = vsel %vm1943_vm9, %v1920_v38, %v8577_v28  ;;  %v1800_v31 = vsel %vm1778_vm3, %v1767_v54, %v8594_v27  ;;  %v8596_v58 = vld [vmem:[#allocation127_spill] sm:$0xff]  ;;  %v8597_v52 = vld [vmem:[#allocation136_spill] sm:$0xff] }
 0x31a   : > { %v1963_v63 = vsel %vm1943_vm9, %v1930_v26, %v5990_v3  ;;  %v1986_v1 = vsel %vm1976_vm8, %v1953_v44, %v6090_v57  ;;  %v1789_v3 = vsel %vm1778_vm3, %v1756_v8, %v8580_v62  ;;  %v1799_v57 = vsel %vm1778_vm3, %v1766_v60, %v8581_v41  ;;  %v8599_v28 = vld [vmem:[#allocation151_spill] sm:$0xff]  ;;  %v8602_v60 = vld [vmem:[#allocation168_spill] sm:$0xff]  ;;  %v8604_v62 = vld [vmem:[#allocation186_spill] sm:$0xff] }
 0x31b   : > { %v1996_v11 = vsel %vm1976_vm8, %v1963_v63, %v1689_v51  ;;  %v1822_v33 = vsel %vm1811_vm4, %v1789_v3, %v8582_v42  ;;  %v1832_v46 = vsel %vm1811_vm4, %v1799_v57, %v8583_v25  ;;  %v1691_v55 = vpop.permute.xlu1 %1690  ;;  %v1833_v26 = vsel %vm1811_vm4, %v1800_v31, %v8597_v52  ;;  %v8600_v63 = vld [vmem:[#allocation104_spill] sm:$0xff]  ;;  %v8605_v25 = vld [vmem:[#allocation49_spill] sm:$0xff]  ;;  %v8617_v56 = vld [vmem:[#allocation191_spill] sm:$0xff] }
 0x31c   : > { %v1865_v59 = vsel %vm1844_vm6, %v1832_v46, %v8584_v2  ;;  %v1855_v18 = vsel %vm1844_vm6, %v1822_v33, %v8585_v37  ;;  %v1866_v44 = vsel %vm1844_vm6, %v1833_v26, %v8599_v28  ;;  %v4507_v33 = vld [vmem:[#allocation2 + $0x90] sm:$0xff]  ;;  %v4508_v2 = vld [vmem:[#allocation2 + $0x108] sm:$0xff]  ;;  %v8619_v52 = vld [vmem:[#allocation51_spill] sm:$0xff] }
 0x31d   : > { %v1758_v46 = vsel %vm279_vm0, %v4507_v33, %v8605_v25  ;;  %v8622_v28 = vld [vmem:[#allocation124_spill] sm:$0xff] }
 0x31e   : > { %v8630_v25 = vld [vmem:[#allocation192_spill] sm:$0xff] }
 0x31f   : > { %4392 = vmatmul.msk.f32.gmra.mxu0 %vm2018_vm10, %v1985_v53  ;;  %4402 = vmatmul.msk.f32.gmra.mxu2 %vm2018_vm10, %v1995_v17  ;;  %v1888_v53 = vsel %vm1877_vm5, %v1855_v18, %v8586_v32  ;;  %v8587_v17 = vld [vmem:[#allocation155_spill] sm:$0xff]  ;;  %v8607_v18 = vld [vmem:[#allocation84_spill] sm:$0xff] }
 0x320   : > { %v1898_v35 = vsel %vm1877_vm5, %v1865_v59, %v8587_v17  ;;  %v1921_v5 = vsel %vm1910_vm7, %v1888_v53, %v8588_v21  ;;  %v8606_v59 = vld [vmem:[#allocation65_spill] sm:$0xff]  ;;  %v8608_v32 = vld [vmem:[#allocation116_spill] sm:$0xff] }
 0x321   : > { %v1931_v6 = vsel %vm1910_vm7, %v1898_v35, %v8589_v22  ;;  %v1954_v12 = vsel %vm1943_vm9, %v1921_v5, %v8591_v30  ;;  %v1768_v37 = vsel %vm279_vm0, %v4508_v2, %v8606_v59  ;;  %v8609_v53 = vld [vmem:[#allocation128_spill] sm:$0xff]  ;;  %v8610_v35 = vld [vmem:[#allocation129_spill] sm:$0xff]  ;;  %v8612_v22 = vld [vmem:[#allocation67_spill] sm:$0xff] }
 0x322   : > { %v1964_v7 = vsel %vm1943_vm9, %v1931_v6, %v8590_v0  ;;  %v1987_v16 = vsel %vm1976_vm8, %v1954_v12, %v6092_v34  ;;  %v1790_v34 = vsel %vm1778_vm3, %v1757_v19, %v8595_v61  ;;  %v8611_v21 = vld [vmem:[#allocation148_spill] sm:$0xff]  ;;  %v8613_v0 = vld [vmem:[#allocation83_spill] sm:$0xff]  ;;  %v4509_v61 = vld [vmem:[#allocation2 + $0x110] sm:$0xff] }
 0x323   : > { %v1997_v50 = vsel %vm1976_vm8, %v1964_v7, %v1691_v55  ;;  %v1823_v51 = vsel %vm1811_vm4, %v1790_v34, %v8596_v58  ;;  %v8614_v30 = vld [vmem:[#allocation156_spill] sm:$0xff]  ;;  %v8618_v34 = vld [vmem:[#allocation50_spill] sm:$0xff]  ;;  %v8631_v2 = vld [vmem:[#allocation193_spill] sm:$0xff] }
 0x324   : > { %v1856_v38 = vsel %vm1844_vm6, %v1823_v51, %v8598_v10  ;;  %v1769_v58 = vsel %vm279_vm0, %v4509_v61, %v8618_v34  ;;  %v4510_v51 = vld [vmem:[#allocation2 + $0x98] sm:$0xff]  ;;  %v8620_v10 = vld [vmem:[#allocation102_spill] sm:$0xff] }
 0x325   : > { %v1759_v26 = vsel %vm279_vm0, %v4510_v51, %v8619_v52  ;;  %v2397_v34 = vld [vmem:[#allocation3 + $0x1] sm:$0xff]  ;;  %v8643_v52 = vld [vmem:[#allocation180_spill] sm:$0xff] }
 0x326   : > { %2686 = vrot.lane.b32.xlu1 %v2397_v34, %s4543_s30 }
 0x327   : > { %4393 = vmatmul.msk.f32.gmra.mxu0 %vm2018_vm10, %v1986_v1  ;;  %4403 = vmatmul.msk.f32.gmra.mxu2 %vm2018_vm10, %v1996_v11  ;;  %v1899_v1 = vsel %vm1877_vm5, %v1866_v44, %v8600_v63  ;;  %v8601_v11 = vld [vmem:[#allocation99_spill] sm:$0xff]  ;;  %v8623_v63 = vld [vmem:[#allocation137_spill] sm:$0xff] }
 0x328   : > { %v1889_v23 = vsel %vm1877_vm5, %v1856_v38, %v8601_v11  ;;  %v1932_v8 = vsel %vm1910_vm7, %v1899_v1, %v8603_v13  ;;  %v8621_v38 = vld [vmem:[#allocation117_spill] sm:$0xff] }
 0x329   : > { %v1922_v47 = vsel %vm1910_vm7, %v1889_v23, %v8602_v60  ;;  %v1965_v41 = vsel %vm1943_vm9, %v1932_v8, %v5994_v15  ;;  %v1791_v15 = vsel %vm1778_vm3, %v1758_v46, %v8607_v18  ;;  %v8624_v11 = vld [vmem:[#allocation53_spill] sm:$0xff] }
 0x32a   : > { %v1955_v3 = vsel %vm1943_vm9, %v1922_v47, %v8604_v62  ;;  %v1998_v42 = vsel %vm1976_vm8, %v1965_v41, %v1693_v9  ;;  %v1824_v55 = vsel %vm1811_vm4, %v1791_v15, %v8610_v35  ;;  %v8625_v9 = vld [vmem:[#allocation149_spill] sm:$0xff]  ;;  %v8626_v47 = vld [vmem:[#allocation103_spill] sm:$0xff]  ;;  %v8628_v41 = vld [vmem:[#allocation164_spill] sm:$0xff] }
 0x32b   : > { %v1988_v57 = vsel %vm1976_vm8, %v1955_v3, %v6108_v29  ;;  %v1801_v29 = vsel %vm1778_vm3, %v1768_v37, %v8608_v32  ;;  %v1857_v5 = vsel %vm1844_vm6, %v1824_v55, %v8611_v21  ;;  %v8627_v8 = vld [vmem:[#allocation157_spill] sm:$0xff]  ;;  %v1697_v3 = vpop.permute.xlu1 %1696  ;;  %v6392_v55 = vld [vmem:[%s8204_s3] ss:$0 sm:$0xff] }
 0x32c   : > { %v1834_v17 = vsel %vm1811_vm4, %v1801_v29, %v8609_v53  ;;  %v1890_v7 = vsel %vm1877_vm5, %v1857_v5, %v8613_v0  ;;  %v4511_v15 = vld [vmem:[#allocation2 + $0xa8] sm:$0xff]  ;;  %v4512_v53 = vld [vmem:[#allocation2 + $0x120] sm:$0xff]  ;;  %v8635_v5 = vld [vmem:[#allocation107_spill] sm:$0xff] }
 0x32d   : > { %v1867_v6 = vsel %vm1844_vm6, %v1834_v17, %v8612_v22  ;;  %v1923_v19 = vsel %vm1910_vm7, %v1890_v7, %v8616_v36  ;;  %v8632_v32 = vld [vmem:[#allocation41_spill] sm:$0xff]  ;;  %v8633_v17 = vld [vmem:[#allocation66_spill] sm:$0xff] }
 0x32e   : > { %v1900_v12 = vsel %vm1877_vm5, %v1867_v6, %v8614_v30  ;;  %v1956_v20 = vsel %vm1943_vm9, %v1923_v19, %v8617_v56  ;;  %v1760_v29 = vsel %vm279_vm0, %v4511_v15, %v8632_v32  ;;  %v1770_v35 = vsel %vm279_vm0, %v4512_v53, %v8633_v17  ;;  %v8636_v6 = vld [vmem:[#allocation130_spill] sm:$0xff]  ;;  %v8640_v56 = vld [vmem:[#allocation105_spill] sm:$0xff]  ;;  %v2398_v32 = vld [vmem:[#allocation3 + $0x9] sm:$0xff] }
 0x32f   : > { %4394 = vmatmul.msk.f32.gmra.mxu0 %vm2018_vm10, %v1987_v16  ;;  %4404 = vmatmul.msk.f32.gmra.mxu2 %vm2018_vm10, %v1997_v50  ;;  %v1695_v16 = vpop.permute.xlu0 %1694  ;;  %v8615_v50 = vld [vmem:[#allocation169_spill] sm:$0xff]  ;;  %v1989_v27 = vsel %vm1976_vm8, %v1956_v20, %v6119_v39  ;;  %v1802_v39 = vsel %vm1778_vm3, %v1769_v58, %v8621_v38  ;;  %v1793_v22 = vsel %vm1778_vm3, %v1760_v29, %v8635_v5  ;;  %v8637_v7 = vld [vmem:[#allocation138_spill] sm:$0xff]  ;;  %v8642_v58 = vld [vmem:[#allocation171_spill] sm:$0xff] }
 0x330   : > { %v1933_v40 = vsel %vm1910_vm7, %v1900_v12, %v8615_v50  ;;  %v1835_v1 = vsel %vm1811_vm4, %v1802_v39, %v8623_v63  ;;  %v1826_v0 = vsel %vm1811_vm4, %v1793_v22, %v8636_v6  ;;  %v6405_v12 = vld [vmem:[%s8205_s4] ss:$0 sm:$0xff]  ;;  %v4513_v63 = vld [vmem:[#allocation2 + $0xb0] sm:$0xff]  ;;  %v8656_v17 = vld [vmem:[#allocation173_spill] sm:$0xff]  ;;  %2688 = vrot.lane.b32.xlu2 %v2398_v32, %s4543_s30 }
 0x331   : > { %v1966_v54 = vsel %vm1943_vm9, %v1933_v40, %v6008_v24  ;;  %v1792_v24 = vsel %vm1778_vm3, %v1759_v26, %v8620_v10  ;;  %v1868_v23 = vsel %vm1844_vm6, %v1835_v1, %v8624_v11  ;;  %v8639_v40 = vld [vmem:[#allocation152_spill] sm:$0xff]  ;;  %v8644_v10 = vld [vmem:[#allocation187_spill] sm:$0xff]  ;;  %v8677_v32 = vld [vmem:[#allocation174_spill] sm:$0xff] }
 0x332   : > { %v1999_v31 = vsel %vm1976_vm8, %v1966_v54, %v1695_v16  ;;  %v1825_v44 = vsel %vm1811_vm4, %v1792_v24, %v8622_v28  ;;  %v1901_v62 = vsel %vm1877_vm5, %v1868_v23, %v8627_v8  ;;  %v8638_v16 = vld [vmem:[#allocation144_spill] sm:$0xff]  ;;  %v8641_v54 = vld [vmem:[#allocation109_spill] sm:$0xff]  ;;  %v8648_v8 = vld [vmem:[#allocation118_spill] sm:$0xff] }
 0x333   : > { %v1858_v60 = vsel %vm1844_vm6, %v1825_v44, %v8625_v9  ;;  %v1859_v50 = vsel %vm1844_vm6, %v1826_v0, %v8638_v16  ;;  %v8645_v1 = vld [vmem:[#allocation52_spill] sm:$0xff]  ;;  %v4514_v23 = vld [vmem:[#allocation2 + $0x128] sm:$0xff]  ;;  %v8646_v9 = vld [vmem:[#allocation70_spill] sm:$0xff] }
 0x334   : > { %v1891_v13 = vsel %vm1877_vm5, %v1858_v60, %v8626_v47  ;;  %v1761_v11 = vsel %vm279_vm0, %v4513_v63, %v8645_v1  ;;  %v1771_v60 = vsel %vm279_vm0, %v4514_v23, %v8646_v9  ;;  %v8655_v29 = vld [vmem:[#allocation172_spill] sm:$0xff]  ;;  %v4515_v0 = vld [vmem:[#allocation2 + $0x138] sm:$0xff]  ;;  %v8669_v63 = vld [vmem:[#allocation113_spill] sm:$0xff] }
 0x335   : > { %v8659_v16 = vld [vmem:[#allocation119_spill] sm:$0xff]  ;;  %v8670_v23 = vld [vmem:[#allocation182_spill] sm:$0xff] }
 0x337   : > { %4395 = vmatmul.msk.f32.gmra.mxu0 %vm2018_vm10, %v1988_v57  ;;  %4405 = vmatmul.msk.f32.gmra.mxu2 %vm2018_vm10, %v1998_v42  ;;  %v1924_v57 = vsel %vm1910_vm7, %v1891_v13, %v8628_v41  ;;  %v8629_v42 = vld [vmem:[#allocation179_spill] sm:$0xff]  ;;  %v8650_v41 = vld [vmem:[#allocation132_spill] sm:$0xff]  ;;  %v1701_v15 = vpop.permute.xlu0 %1700 }
 0x338   : > { %v1934_v33 = vsel %vm1910_vm7, %v1901_v62, %v8629_v42  ;;  %v1957_v59 = vsel %vm1943_vm9, %v1924_v57, %v8631_v2  ;;  %v8649_v62 = vld [vmem:[#allocation131_spill] sm:$0xff]  ;;  %v8651_v42 = vld [vmem:[#allocation150_spill] sm:$0xff] }
 0x339   : > { %v1967_v46 = vsel %vm1943_vm9, %v1934_v33, %v8630_v25  ;;  %v1990_v37 = vsel %vm1976_vm8, %v1957_v59, %v6112_v14  ;;  %v8634_v14 = vld [vmem:[#allocation106_spill] sm:$0xff]  ;;  %v8652_v25 = vld [vmem:[#allocation68_spill] sm:$0xff]  ;;  %v8653_v2 = vld [vmem:[#allocation87_spill] sm:$0xff] }
 0x33a   : > { %v2000_v18 = vsel %vm1976_vm8, %v1967_v46, %v1697_v3  ;;  %v1803_v21 = vsel %vm1778_vm3, %v1770_v35, %v8634_v14  ;;  %v8657_v14 = vld [vmem:[#allocation194_spill] sm:$0xff] }
 0x33b   : > { %v1836_v30 = vsel %vm1811_vm4, %v1803_v21, %v8637_v7  ;;  %v8658_v7 = vld [vmem:[#allocation55_spill] sm:$0xff] }
 0x33c   : > { %v1869_v36 = vsel %vm1844_vm6, %v1836_v30, %v8639_v40  ;;  %v1772_v30 = vsel %vm279_vm0, %v4515_v0, %v8658_v7  ;;  %v8680_v7 = vld [vmem:[#allocation121_spill] sm:$0xff] }
 0x33d   : > { %v1902_v20 = vsel %vm1877_vm5, %v1869_v36, %v8640_v56  ;;  %v8660_v36 = vld [vmem:[#allocation139_spill] sm:$0xff] }
 0x33e   : > { %v1935_v26 = vsel %vm1910_vm7, %v1902_v20, %v8643_v52  ;;  %v8662_v56 = vld [vmem:[#allocation159_spill] sm:$0xff] }
 0x33f   : > { %4396 = vmatmul.msk.f32.gmra.mxu0 %vm2018_vm10, %v1989_v27  ;;  %4406 = vmatmul.msk.f32.gmra.mxu2 %vm2018_vm10, %v1999_v31  ;;  %v1892_v27 = vsel %vm1877_vm5, %v1859_v50, %v8641_v54  ;;  %v1699_v31 = vpop.permute.xlu2 %1698  ;;  %v1968_v38 = vsel %vm1943_vm9, %v1935_v26, %v6011_v48  ;;  %v8647_v48 = vld [vmem:[#allocation90_spill] sm:$0xff]  ;;  %v1805_v50 = vsel %vm1778_vm3, %v1772_v30, %v8659_v16  ;;  %v1703_v54 = vpop.permute.xlu1 %1702  ;;  %v8665_v52 = vld [vmem:[#allocation71_spill] sm:$0xff]  ;;  %v8681_v16 = vld [vmem:[#allocation141_spill] sm:$0xff] }
 0x340   : > { %v1925_v51 = vsel %vm1910_vm7, %v1892_v27, %v8642_v58  ;;  %v2001_v44 = vsel %vm1976_vm8, %v1968_v38, %v1699_v31  ;;  %v1794_v13 = vsel %vm1778_vm3, %v1761_v11, %v8647_v48  ;;  %v8663_v27 = vld [vmem:[#allocation181_spill] sm:$0xff]  ;;  %v8667_v38 = vld [vmem:[#allocation140_spill] sm:$0xff] }
 0x341   : > { %v1958_v24 = vsel %vm1943_vm9, %v1925_v51, %v8644_v10  ;;  %v1827_v57 = vsel %vm1811_vm4, %v1794_v13, %v8650_v41  ;;  %v4516_v51 = vld [vmem:[#allocation2 + $0x140] sm:$0xff]  ;;  %v8666_v10 = vld [vmem:[#allocation110_spill] sm:$0xff] }
 0x342   : > { %v1991_v28 = vsel %vm1976_vm8, %v1958_v24, %v6142_v4  ;;  %v1804_v4 = vsel %vm1778_vm3, %v1771_v60, %v8648_v8  ;;  %v1860_v33 = vsel %vm1844_vm6, %v1827_v57, %v8651_v42  ;;  %v1773_v26 = vsel %vm279_vm0, %v4516_v51, %v8665_v52  ;;  %v8673_v57 = vld [vmem:[#allocation120_spill] sm:$0xff] }
 0x343   : > { %v1837_v3 = vsel %vm1811_vm4, %v1804_v4, %v8649_v62  ;;  %v1893_v59 = vsel %vm1877_vm5, %v1860_v33, %v8653_v2  ;;  %v1806_v24 = vsel %vm1778_vm3, %v1773_v26, %v8666_v10  ;;  %v4517_v4 = vld [vmem:[#allocation2 + $0x150] sm:$0xff]  ;;  %v8672_v62 = vld [vmem:[#allocation75_spill] sm:$0xff]  ;;  %v8674_v33 = vld [vmem:[#allocation133_spill] sm:$0xff] }
 0x344   : > { %v1870_v46 = vsel %vm1844_vm6, %v1837_v3, %v8652_v25  ;;  %v1926_v35 = vsel %vm1910_vm7, %v1893_v59, %v8656_v17  ;;  %v1774_v3 = vsel %vm279_vm0, %v4517_v4, %v8672_v62  ;;  %v8675_v2 = vld [vmem:[#allocation73_spill] sm:$0xff]  ;;  %v8678_v17 = vld [vmem:[#allocation64_spill] sm:$0xff]  ;;  %v8692_v62 = vld [vmem:[#allocation198_spill] sm:$0xff] }
 0x345   : > { %v1959_v21 = vsel %vm1943_vm9, %v1926_v35, %v8657_v14  ;;  %v1807_v42 = vsel %vm1778_vm3, %v1774_v3, %v8673_v57  ;;  %v4519_v26 = vld [vmem:[#allocation2 + $0x168] sm:$0xff]  ;;  %v8686_v10 = vld [vmem:[#allocation76_spill] sm:$0xff] }
 0x346   : > { %v1992_v22 = vsel %vm1976_vm8, %v1959_v21, %v6164_v43  ;;  %v8661_v43 = vld [vmem:[#allocation59_spill] sm:$0xff]  ;;  %v1840_v25 = vsel %vm1811_vm4, %v1807_v42, %v8674_v33  ;;  %v4520_v42 = vld [vmem:[#allocation2 + $0x170] sm:$0xff]  ;;  %v8693_v33 = vld [vmem:[#allocation80_spill] sm:$0xff] }
 0x347   : > { %4397 = vmatmul.msk.f32.gmra.mxu0 %vm2018_vm10, %v1990_v37  ;;  %4407 = vmatmul.msk.f32.gmra.mxu2 %vm2018_vm10, %v2000_v18  ;;  %v8654_v37 = vld [vmem:[#allocation158_spill] sm:$0xff]  ;;  %v1705_v11 = vpop.permute.xlu2 %1704  ;;  %v1873_v59 = vsel %vm1844_vm6, %v1840_v25, %v8675_v2  ;;  %v1777_v25 = vsel %vm279_vm0, %v4520_v42, %v8693_v33 }
 0x348   : > { %v1903_v18 = vsel %vm1877_vm5, %v1870_v46, %v8654_v37  ;;  %v8676_v37 = vld [vmem:[#allocation160_spill] sm:$0xff]  ;;  %v8694_v2 = vld [vmem:[#allocation122_spill] sm:$0xff] }
 0x349   : > { %v1936_v53 = vsel %vm1910_vm7, %v1903_v18, %v8655_v29  ;;  %v1906_v18 = vsel %vm1877_vm5, %v1873_v59, %v8676_v37  ;;  %v1810_v59 = vsel %vm1778_vm3, %v1777_v25, %v8694_v2  ;;  %v8695_v37 = vld [vmem:[#allocation135_spill] sm:$0xff] }
 0x34a   : > { %v1969_v5 = vsel %vm1943_vm9, %v1936_v53, %v6014_v45  ;;  %v1838_v45 = vsel %vm1811_vm4, %v1805_v50, %v8660_v36  ;;  %v1939_v29 = vsel %vm1910_vm7, %v1906_v18, %v8677_v32  ;;  %v1843_v18 = vsel %vm1811_vm4, %v1810_v59, %v8695_v37  ;;  %v8696_v32 = vld [vmem:[#allocation82_spill] sm:$0xff] }
 0x34b   : > { %v2002_v6 = vsel %vm1976_vm8, %v1969_v5, %v1701_v15  ;;  %v1707_v15 = vpop.permute.xlu0 %1706  ;;  %v1972_v35 = vsel %vm1943_vm9, %v1939_v29, %v8678_v17  ;;  %v4518_v5 = vld [vmem:[#allocation2 + $0x158] sm:$0xff]  ;;  %v1876_v29 = vsel %vm1844_vm6, %v1843_v18, %v8696_v32  ;;  %v8697_v17 = vld [vmem:[#allocation162_spill] sm:$0xff] }
 0x34c   : > { %v2005_v21 = vsel %vm1976_vm8, %v1972_v35, %v1707_v15  ;;  %v1909_v35 = vsel %vm1877_vm5, %v1876_v29, %v8697_v17 }
 0x34e   : > { %v2132_v19 = vpop.f32.mrf.mxu0 }
 0x34f   : > { %v2232_v61 = vmul.f32 %v6392_v55, %v2132_v19  ;;  %4398 = vmatmul.msk.f32.gmra.mxu0 %vm2018_vm10, %v1991_v28  ;;  %4408 = vmatmul.msk.f32.gmra.mxu2 %vm2018_vm10, %v2001_v44  ;;  %v1871_v19 = vsel %vm1844_vm6, %v1838_v45, %v8661_v43  ;;  %v8668_v28 = vld [vmem:[#allocation72_spill] sm:$0xff]  ;;  %v8682_v45 = vld [vmem:[#allocation58_spill] sm:$0xff] }
 0x350   : > { %v1904_v20 = vsel %vm1877_vm5, %v1871_v19, %v8662_v56  ;;  %v8683_v56 = vld [vmem:[#allocation161_spill] sm:$0xff] }
 0x351   : > { %v2268_v39 = vadd.f32 %v6405_v12, %v2232_v61  ;;  %v1937_v31 = vsel %vm1910_vm7, %v1904_v20, %v8663_v27  ;;  %v8664_v61 = vld [vmem:[#allocation195_spill] sm:$0xff] }
 0x352   : > { %v1970_v34 = vsel %vm1943_vm9, %v1937_v31, %v8664_v61  ;;  %v8684_v27 = vld [vmem:[#allocation183_spill] sm:$0xff] }
 0x353   : > { %v2300_v47 = vmax.f32 %v2268_v39, 0.0  ;;  %v2003_v58 = vsel %vm1976_vm8, %v1970_v34, %v1703_v54  ;;  %v1839_v39 = vsel %vm1811_vm4, %v1806_v24, %v8667_v38  ;;  %v1709_v54 = vpop.permute.xlu1 %1708  ;;  %v8685_v34 = vld [vmem:[#allocation197_spill] sm:$0xff]  ;;  %v1776_v24 = vsel %vm279_vm0, %v4519_v26, %v8686_v10 }
 0x354   : > { %v1872_v44 = vsel %vm1844_vm6, %v1839_v39, %v8668_v28  ;;  %v8687_v39 = vld [vmem:[#allocation114_spill] sm:$0xff] }
 0x355   : > { %2333 = vst.msk [vmem:[#allocation3 + $0x19] sm:$0xff] %vm279_vm0, %v2300_v47  ;;  %v1905_v1 = vsel %vm1877_vm5, %v1872_v44, %v8669_v63  ;;  %v8671_v47 = vld [vmem:[#allocation37_spill] sm:$0xff]  ;;  %v1809_v28 = vsel %vm1778_vm3, %v1776_v24, %v8687_v39  ;;  %v8688_v44 = vld [vmem:[#allocation142_spill] sm:$0xff] }
 0x356   : > { %v1938_v9 = vsel %vm1910_vm7, %v1905_v1, %v8670_v23  ;;  %v1842_v63 = vsel %vm1811_vm4, %v1809_v28, %v8688_v44 }
 0x357   : > { %4399 = vmatmul.msk.f32.gmra.mxu0 %vm2018_vm10, %v1992_v22  ;;  %4409 = vmatmul.msk.f32.gmra.mxu2 %vm2018_vm10, %v2002_v6  ;;  %v1971_v48 = vsel %vm1943_vm9, %v1938_v9, %v8671_v47  ;;  %v8679_v22 = vld [vmem:[#allocation61_spill] sm:$0xff] }
 0x358   : > { %v2004_v8 = vsel %vm1976_vm8, %v1971_v48, %v1705_v11  ;;  %v1775_v6 = vsel %vm279_vm0, %v4518_v5, %v8679_v22  ;;  %v8689_v11 = vld [vmem:[#allocation77_spill] sm:$0xff]  ;;  %v1711_v48 = vpop.permute.xlu2 %1710 }
 0x359   : > { %v1808_v30 = vsel %vm1778_vm3, %v1775_v6, %v8680_v7  ;;  %v1875_v23 = vsel %vm1844_vm6, %v1842_v63, %v8689_v11 }
 0x35a   : > { %v1841_v50 = vsel %vm1811_vm4, %v1808_v30, %v8681_v16 }
 0x35b   : > { %v1874_v43 = vsel %vm1844_vm6, %v1841_v50, %v8682_v45 }
 0x35c   : > { %v6470_v40 = vld [vmem:[#allocation3 + $0x19] sm:$0xff]  ;;  %v1907_v20 = vsel %vm1877_vm5, %v1874_v43, %v8683_v56 }
 0x35d   : > { %2690 = vrot.lane.b32.xlu0 %v6470_v40, %s4543_s30  ;;  %v1940_v31 = vsel %vm1910_vm7, %v1907_v20, %v8684_v27 }
 0x35f   : > { %4410 = vmatmul.msk.f32.gmra.mxu2 %vm2018_vm10, %v2003_v58  ;;  %v1973_v58 = vsel %vm1943_vm9, %v1940_v31, %v8685_v34 }
 0x360   : > { %v2006_v52 = vsel %vm1976_vm8, %v1973_v58, %v1709_v54 }
 0x364   : > { %v2135_v60 = vpop.f32.mrf.mxu0 }
 0x365   : > { %v2233_v13 = vmul.f32 %v6392_v55, %v2135_v60  ;;  %v8690_v60 = vld [vmem:[#allocation154_spill] sm:$0xff] }
 0x366   : > { %v1908_v47 = vsel %vm1877_vm5, %v1875_v23, %v8690_v60 }
 0x367   : > { %v2269_v41 = vadd.f32 %v6405_v12, %v2233_v13  ;;  %4411 = vmatmul.msk.f32.gmra.mxu2 %vm2018_vm10, %v2004_v8  ;;  %v8691_v13 = vld [vmem:[#allocation185_spill] sm:$0xff] }
 0x368   : > { %v1941_v8 = vsel %vm1910_vm7, %v1908_v47, %v8691_v13 }
 0x369   : > { %v2301_v46 = vmax.f32 %v2269_v41, 0.0  ;;  %v1974_v3 = vsel %vm1943_vm9, %v1941_v8, %v8692_v62 }
 0x36a   : > { %v2007_v57 = vsel %vm1976_vm8, %v1974_v3, %v1711_v48 }
 0x36b   : > { %2334 = vst.msk [vmem:[#allocation3 + $0x21] sm:$0xff] %vm279_vm0, %v2301_v46 }
 0x36c   : > { %v2138_v53 = vpop.f32.mrf.mxu0 }
 0x36d   : > { %v2234_v14 = vmul.f32 %v6392_v55, %v2138_v53 }
 0x36f   : > { %v2270_v0 = vadd.f32 %v6405_v12, %v2234_v14  ;;  %4412 = vmatmul.msk.f32.gmra.mxu2 %vm2018_vm10, %v2005_v21  ;;  %v1713_v14 = vpop.permute.xlu0 %1712  ;;  %v8698_v21 = vld [vmem:[#allocation177_spill] sm:$0xff] }
 0x370   : > { %v1942_v5 = vsel %vm1910_vm7, %v1909_v35, %v8698_v21 }
 0x371   : > { %v2302_v36 = vmax.f32 %v2270_v0, 0.0  ;;  %v1975_v6 = vsel %vm1943_vm9, %v1942_v5, %v6034_v49 }
 0x372   : > { %v6531_v19 = vld [vmem:[#allocation3 + $0x21] sm:$0xff]  ;;  %v2008_v7 = vsel %vm1976_vm8, %v1975_v6, %v1713_v14 }
 0x373   : > { %2335 = vst.msk [vmem:[#allocation3 + $0x31] sm:$0xff] %vm279_vm0, %v2302_v36  ;;  %2692 = vrot.lane.b32.xlu1 %v6531_v19, %s4543_s30 }
 0x374   : > { %v2141_v61 = vpop.f32.mrf.mxu0 }
 0x375   : > { %v2235_v51 = vmul.f32 %v6392_v55, %v2141_v61 }
 0x377   : > { %v2271_v38 = vadd.f32 %v6405_v12, %v2235_v51  ;;  %4413 = vmatmul.msk.f32.gmra.mxu2 %vm2018_vm10, %v2006_v52 }
 0x379   : > { %v2303_v1 = vmax.f32 %v2271_v38, 0.0 }
 0x37a   : > { %v6554_v9 = vld [vmem:[#allocation3 + $0x31] sm:$0xff] }
 0x37b   : > { %2336 = vst.msk [vmem:[#allocation3 + $0x39] sm:$0xff] %vm279_vm0, %v2303_v1  ;;  %2694 = vrot.lane.b32.xlu2 %v6554_v9, %s4543_s30 }
 0x37c   : > { %v2144_v4 = vpop.f32.mrf.mxu0 }
 0x37d   : > { %v2236_v41 = vmul.f32 %v6392_v55, %v2144_v4 }
 0x37f   : > { %v2272_v46 = vadd.f32 %v6405_v12, %v2236_v41  ;;  %4414 = vmatmul.msk.f32.gmra.mxu2 %vm2018_vm10, %v2007_v57 }
 0x381   : > { %v2304_v15 = vmax.f32 %v2272_v46, 0.0 }
 0x382   : > { %v6577_v53 = vld [vmem:[#allocation3 + $0x39] sm:$0xff] }
 0x383   : > { %2337 = vst.msk [vmem:[#allocation3 + $0x49] sm:$0xff] %vm279_vm0, %v2304_v15  ;;  %2696 = vrot.lane.b32.xlu0 %v6577_v53, %s4543_s30 }
 0x384   : > { %v2147_v22 = vpop.f32.mrf.mxu0 }
 0x385   : > { %v2237_v0 = vmul.f32 %v6392_v55, %v2147_v22 }
 0x387   : > { %v2273_v30 = vadd.f32 %v6405_v12, %v2237_v0  ;;  %4415 = vmatmul.msk.f32.gmra.mxu2 %vm2018_vm10, %v2008_v7 }
 0x389   : > { %v2305_v16 = vmax.f32 %v2273_v30, 0.0 }
 0x38a   : > { %v6592_v50 = vld [vmem:[#allocation3 + $0x49] sm:$0xff] }
 0x38b   : > { %2338 = vst.msk [vmem:[#allocation3 + $0x51] sm:$0xff] %vm279_vm0, %v2305_v16  ;;  %2698 = vrot.lane.b32.xlu1 %v6592_v50, %s4543_s30 }
 0x38c   : > { %v2150_v36 = vpop.f32.mrf.mxu0 }
 0x38d   : > { %v2238_v45 = vmul.f32 %v6392_v55, %v2150_v36 }
 0x38f   : > { %v2274_v49 = vadd.f32 %v6405_v12, %v2238_v45 }
 0x391   : > { %v2306_v43 = vmax.f32 %v2274_v49, 0.0 }
 0x392   : > { %v2180_v56 = vpop.f32.mrf.mxu2  ;;  %v6599_v20 = vld [vmem:[#allocation3 + $0x51] sm:$0xff] }
 0x393   : > { %2339 = vst.msk [vmem:[#allocation3 + $0x61] sm:$0xff] %vm279_vm0, %v2306_v43  ;;  %v2248_v54 = vmul.f32 %v6392_v55, %v2180_v56  ;;  %2700 = vrot.lane.b32.xlu2 %v6599_v20, %s4543_s30 }
 0x394   : > { %v2153_v27 = vpop.f32.mrf.mxu0 }
 0x395   : > { %v2284_v31 = vadd.f32 %v6405_v12, %v2248_v54  ;;  %v2239_v61 = vmul.f32 %v6392_v55, %v2153_v27 }
 0x397   : > { %v2316_v34 = vmax.f32 %v2284_v31, 0.0  ;;  %v2275_v58 = vadd.f32 %v6405_v12, %v2239_v61 }
 0x399   : > { %2349 = vst.msk [vmem:[#allocation3 + $0xd9] sm:$0xff] %vm279_vm0, %v2316_v34  ;;  %v2307_v51 = vmax.f32 %v2275_v58, 0.0 }
 0x39a   : > { %v2183_v52 = vpop.f32.mrf.mxu2  ;;  %v6609_v26 = vld [vmem:[#allocation3 + $0x61] sm:$0xff] }
 0x39b   : > { %2340 = vst.msk [vmem:[#allocation3 + $0x69] sm:$0xff] %vm279_vm0, %v2307_v51  ;;  %v2249_v10 = vmul.f32 %v6392_v55, %v2183_v52  ;;  %2702 = vrot.lane.b32.xlu0 %v6609_v26, %s4543_s30 }
 0x39c   : > { %v2156_v24 = vpop.f32.mrf.mxu0 }
 0x39d   : > { %v2285_v38 = vadd.f32 %v6405_v12, %v2249_v10  ;;  %v2240_v39 = vmul.f32 %v6392_v55, %v2156_v24 }
 0x39f   : > { %v2317_v28 = vmax.f32 %v2285_v38, 0.0  ;;  %v2276_v44 = vadd.f32 %v6405_v12, %v2240_v39 }
 0x3a1   : > { %2350 = vst.msk [vmem:[#allocation3 + $0xe1] sm:$0xff] %vm279_vm0, %v2317_v28  ;;  %v2308_v63 = vmax.f32 %v2276_v44, 0.0 }
 0x3a2   : > { %v2186_v1 = vpop.f32.mrf.mxu2  ;;  %v6619_v11 = vld [vmem:[#allocation3 + $0x69] sm:$0xff] }
 0x3a3   : > { %2341 = vst.msk [vmem:[#allocation3 + $0x79] sm:$0xff] %vm279_vm0, %v2308_v63  ;;  %v2250_v23 = vmul.f32 %v6392_v55, %v2186_v1  ;;  %2704 = vrot.lane.b32.xlu1 %v6619_v11, %s4543_s30 }
 0x3a4   : > { %v2159_v60 = vpop.f32.mrf.mxu0 }
 0x3a5   : > { %v2286_v47 = vadd.f32 %v6405_v12, %v2250_v23  ;;  %v2241_v48 = vmul.f32 %v6392_v55, %v2159_v60 }
 0x3a7   : > { %v2318_v13 = vmax.f32 %v2286_v47, 0.0  ;;  %v2277_v8 = vadd.f32 %v6405_v12, %v2241_v48 }
 0x3a9   : > { %2351 = vst.msk [vmem:[#allocation3 + $0xf1] sm:$0xff] %vm279_vm0, %v2318_v13  ;;  %v2309_v4 = vmax.f32 %v2277_v8, 0.0 }
 0x3aa   : > { %v2189_v62 = vpop.f32.mrf.mxu2  ;;  %v6629_v3 = vld [vmem:[#allocation3 + $0x79] sm:$0xff] }
 0x3ab   : > { %2342 = vst.msk [vmem:[#allocation3 + $0x81] sm:$0xff] %vm279_vm0, %v2309_v4  ;;  %v2251_v41 = vmul.f32 %v6392_v55, %v2189_v62  ;;  %2706 = vrot.lane.b32.xlu2 %v6629_v3, %s4543_s30 }
 0x3ac   : > { %v2162_v57 = vpop.f32.mrf.mxu0 }
 0x3ad   : > { %v2287_v42 = vadd.f32 %v6405_v12, %v2251_v41  ;;  %v2242_v33 = vmul.f32 %v6392_v55, %v2162_v57  ;;  %v6689_v41 = vld [vmem:[#allocation3 + $0xd9] sm:$0xff] }
 0x3af   : > { %v2319_v25 = vmax.f32 %v2287_v42, 0.0  ;;  %v2278_v46 = vadd.f32 %v6405_v12, %v2242_v33 }
 0x3b1   : > { %2352 = vst.msk [vmem:[#allocation3 + $0xf9] sm:$0xff] %vm279_vm0, %v2319_v25  ;;  %v2310_v2 = vmax.f32 %v2278_v46, 0.0 }
 0x3b2   : > { %v2192_v59 = vpop.f32.mrf.mxu2  ;;  %v6639_v37 = vld [vmem:[#allocation3 + $0x81] sm:$0xff] }
 0x3b3   : > { %2343 = vst.msk [vmem:[#allocation3 + $0x91] sm:$0xff] %vm279_vm0, %v2310_v2  ;;  %v2252_v18 = vmul.f32 %v6392_v55, %v2192_v59  ;;  %2708 = vrot.lane.b32.xlu0 %v6639_v37, %s4543_s30  ;;  %v6703_v59 = vld [vmem:[#allocation3 + $0xe1] sm:$0xff] }
 0x3b4   : > { %v2165_v15 = vpop.f32.mrf.mxu0 }
 0x3b5   : > { %v2288_v32 = vadd.f32 %v6405_v12, %v2252_v18  ;;  %v2243_v29 = vmul.f32 %v6392_v55, %v2165_v15 }
 0x3b7   : > { %v2320_v17 = vmax.f32 %v2288_v32, 0.0  ;;  %v2279_v35 = vadd.f32 %v6405_v12, %v2243_v29 }
 0x3b8   : > { %v6701_v2 = vld [vmem:[#allocation3 + $0xf9] sm:$0xff] }
 0x3b9   : > { %2353 = vst.msk [vmem:[#allocation3 + $0x109] sm:$0xff] %vm279_vm0, %v2320_v17  ;;  %v2311_v14 = vmax.f32 %v2279_v35, 0.0 }
 0x3ba   : > { %v2195_v21 = vpop.f32.mrf.mxu2  ;;  %v6649_v5 = vld [vmem:[#allocation3 + $0x91] sm:$0xff] }
 0x3bb   : > { %2344 = vst.msk [vmem:[#allocation3 + $0x99] sm:$0xff] %vm279_vm0, %v2311_v14  ;;  %v2253_v22 = vmul.f32 %v6392_v55, %v2195_v21  ;;  %2710 = vrot.lane.b32.xlu1 %v6649_v5, %s4543_s30 }
 0x3bc   : > { %v2168_v6 = vpop.f32.mrf.mxu0 }
 0x3bd   : > { %v2289_v0 = vadd.f32 %v6405_v12, %v2253_v22  ;;  %v2244_v7 = vmul.f32 %v6392_v55, %v2168_v6  ;;  %v6725_v22 = vld [vmem:[#allocation3 + $0xf1] sm:$0xff] }
 0x3bf   : > { %v2321_v30 = vmax.f32 %v2289_v0, 0.0  ;;  %v2280_v16 = vadd.f32 %v6405_v12, %v2244_v7 }
 0x3c0   : > { %v6718_v14 = vld [vmem:[#allocation3 + $0x109] sm:$0xff] }
 0x3c1   : > { %2354 = vst.msk [vmem:[#allocation3 + $0x111] sm:$0xff] %vm279_vm0, %v2321_v30  ;;  %v2312_v36 = vmax.f32 %v2280_v16, 0.0 }
 0x3c2   : > { %v2198_v45 = vpop.f32.mrf.mxu2  ;;  %v6659_v49 = vld [vmem:[#allocation3 + $0x99] sm:$0xff] }
 0x3c3   : > { %2345 = vst.msk [vmem:[#allocation3 + $0xa9] sm:$0xff] %vm279_vm0, %v2312_v36  ;;  %v2254_v43 = vmul.f32 %v6392_v55, %v2198_v45  ;;  %2712 = vrot.lane.b32.xlu2 %v6659_v49, %s4543_s30 }
 0x3c4   : > { %v2171_v56 = vpop.f32.mrf.mxu0 }
 0x3c5   : > { %v2290_v54 = vadd.f32 %v6405_v12, %v2254_v43  ;;  %v2245_v27 = vmul.f32 %v6392_v55, %v2171_v56 }
 0x3c7   : > { %v2322_v31 = vmax.f32 %v2290_v54, 0.0  ;;  %v2281_v61 = vadd.f32 %v6405_v12, %v2245_v27 }
 0x3c8   : > { %v6740_v45 = vld [vmem:[#allocation3 + $0x111] sm:$0xff] }
 0x3c9   : > { %2355 = vst.msk [vmem:[#allocation3 + $0x121] sm:$0xff] %vm279_vm0, %v2322_v31  ;;  %v2313_v34 = vmax.f32 %v2281_v61, 0.0 }
 0x3ca   : > { %v2201_v58 = vpop.f32.mrf.mxu2  ;;  %v6669_v51 = vld [vmem:[#allocation3 + $0xa9] sm:$0xff] }
 0x3cb   : > { %2346 = vst.msk [vmem:[#allocation3 + $0xb1] sm:$0xff] %vm279_vm0, %v2313_v34  ;;  %v2255_v52 = vmul.f32 %v6392_v55, %v2201_v58  ;;  %2714 = vrot.lane.b32.xlu0 %v6669_v51, %s4543_s30 }
 0x3cc   : > { %v2174_v10 = vpop.f32.mrf.mxu0 }
 0x3cd   : > { %v2291_v24 = vadd.f32 %v6405_v12, %v2255_v52  ;;  %v2246_v38 = vmul.f32 %v6392_v55, %v2174_v10 }
 0x3cf   : > { %v2323_v39 = vmax.f32 %v2291_v24, 0.0  ;;  %v2282_v28 = vadd.f32 %v6405_v12, %v2246_v38 }
 0x3d0   : > { %v6716_v35 = vld [vmem:[#allocation3 + $0x121] sm:$0xff] }
 0x3d1   : > { %2356 = vst.msk [vmem:[#allocation3 + $0x129] sm:$0xff] %vm279_vm0, %v2323_v39  ;;  %v2314_v44 = vmax.f32 %v2282_v28, 0.0  ;;  %v2430_v28 = vld [vmem:[#allocation3 + $0xa] sm:$0xff] }
 0x3d2   : > { %v2204_v63 = vpop.f32.mrf.mxu2  ;;  %v6679_v1 = vld [vmem:[#allocation3 + $0xb1] sm:$0xff] }
 0x3d3   : > { %2347 = vst.msk [vmem:[#allocation3 + $0xc1] sm:$0xff] %vm279_vm0, %v2314_v44  ;;  %v2256_v23 = vmul.f32 %v6392_v55, %v2204_v63  ;;  %2716 = vrot.lane.b32.xlu1 %v6679_v1, %s4543_s30 }
 0x3d4   : > { %v2177_v60 = vpop.f32.mrf.mxu0 }
 0x3d5   : > { %v2292_v47 = vadd.f32 %v6405_v12, %v2256_v23  ;;  %v2247_v48 = vmul.f32 %v6392_v55, %v2177_v60  ;;  %v2429_v23 = vld [vmem:[#allocation3 + $0x2] sm:$0xff] }
 0x3d7   : > { %v2324_v13 = vmax.f32 %v2292_v47, 0.0  ;;  %v2283_v8 = vadd.f32 %v6405_v12, %v2247_v48  ;;  %v6773_v47 = vpop.permute.xlu2 %2688 }
 0x3d8   : > { %v6733_v16 = vld [vmem:[#allocation3 + $0x129] sm:$0xff]  ;;  %8699 = vst [vmem:[#allocation40_spill] sm:$0xff] %v6773_v47 }
 0x3d9   : > { %2357 = vst.msk [vmem:[#allocation3 + $0x139] sm:$0xff] %vm279_vm0, %v2324_v13  ;;  %v2315_v4 = vmax.f32 %v2283_v8, 0.0 }
 0x3da   : > { %v2207_v62 = vpop.f32.mrf.mxu2  ;;  %v6691_v57 = vld [vmem:[#allocation3 + $0xc1] sm:$0xff] }
 0x3db   : > { %2348 = vst.msk [vmem:[#allocation3 + $0xc9] sm:$0xff] %vm279_vm0, %v2315_v4  ;;  %v2257_v42 = vmul.f32 %v6392_v55, %v2207_v62  ;;  %2722 = vrot.lane.b32.xlu1 %v6689_v41, %s4543_s30  ;;  %2718 = vrot.lane.b32.xlu2 %v6691_v57, %s4543_s30  ;;  %v6778_v4 = vld [vmem:[#allocation3 + $0x32] sm:$0xff]  ;;  %v6780_v62 = vld [vmem:[#allocation3 + $0x1a] sm:$0xff] }
 0x3dd   : > { %v2293_v33 = vadd.f32 %v6405_v12, %v2257_v42  ;;  %v6787_v42 = vld [vmem:[#allocation3 + $0x22] sm:$0xff] }
 0x3df   : > { %v2325_v25 = vmax.f32 %v2293_v33, 0.0  ;;  %v6795_v33 = vld [vmem:[#allocation3 + $0x3a] sm:$0xff] }
 0x3e0   : > { %v6751_v61 = vld [vmem:[#allocation3 + $0x139] sm:$0xff] }
 0x3e1   : > { %2358 = vst.msk [vmem:[#allocation3 + $0x141] sm:$0xff] %vm279_vm0, %v2325_v25  ;;  %v6801_v25 = vpop.permute.xlu1 %2686 }
 0x3e2   : > { %v2210_v46 = vpop.f32.mrf.mxu2  ;;  %v6705_v18 = vld [vmem:[#allocation3 + $0xc9] sm:$0xff]  ;;  %8701 = vst [vmem:[#allocation39_spill] sm:$0xff] %v6801_v25 }
 0x3e3   : > { %v2258_v15 = vmul.f32 %v6392_v55, %v2210_v46  ;;  %2728 = vrot.lane.b32.xlu1 %v6701_v2, %s4543_s30  ;;  %2724 = vrot.lane.b32.xlu2 %v6703_v59, %s4543_s30  ;;  %v6803_v46 = vld [vmem:[#allocation3 + $0x4a] sm:$0xff] }
 0x3e4   : > { %2720 = vrot.lane.b32.xlu0 %v6705_v18, %s4543_s30 }
 0x3e5   : > { %v2294_v32 = vadd.f32 %v6405_v12, %v2258_v15 }
 0x3e7   : > { %v2326_v29 = vmax.f32 %v2294_v32, 0.0  ;;  %v6809_v32 = vld [vmem:[#allocation3 + $0x7a] sm:$0xff] }
 0x3e8   : > { %v6731_v30 = vld [vmem:[#allocation3 + $0x141] sm:$0xff] }
 0x3e9   : > { %2359 = vst.msk [vmem:[#allocation3 + $0x151] sm:$0xff] %vm279_vm0, %v2326_v29  ;;  %v6811_v29 = vld [vmem:[#allocation3 + $0x62] sm:$0xff] }
 0x3ea   : > { %v2213_v17 = vpop.f32.mrf.mxu2 }
 0x3eb   : > { %v2259_v21 = vmul.f32 %v6392_v55, %v2213_v17  ;;  %2734 = vrot.lane.b32.xlu1 %v6716_v35, %s4543_s30  ;;  %2730 = vrot.lane.b32.xlu2 %v6718_v14, %s4543_s30  ;;  %v6817_v17 = vld [vmem:[#allocation3 + $0x6a] sm:$0xff] }
 0x3ec   : > { %2726 = vrot.lane.b32.xlu0 %v6725_v22, %s4543_s30 }
 0x3ed   : > { %v2295_v6 = vadd.f32 %v6405_v12, %v2259_v21  ;;  %v6821_v21 = vpop.permute.xlu1 %2692 }
 0x3ee   : > { %8703 = vst [vmem:[#allocation42_spill] sm:$0xff] %v6821_v21 }
 0x3ef   : > { %v2327_v0 = vmax.f32 %v2295_v6, 0.0 }
 0x3f0   : > { %v6746_v27 = vld [vmem:[#allocation3 + $0x151] sm:$0xff] }
 0x3f1   : > { %2360 = vst.msk [vmem:[#allocation3 + $0x159] sm:$0xff] %vm279_vm0, %v2327_v0  ;;  %v6825_v0 = vld [vmem:[#allocation3 + $0x9a] sm:$0xff] }
 0x3f2   : > { %v2216_v7 = vpop.f32.mrf.mxu2 }
 0x3f3   : > { %v2260_v36 = vmul.f32 %v6392_v55, %v2216_v7  ;;  %2740 = vrot.lane.b32.xlu1 %v6731_v30, %s4543_s30  ;;  %2736 = vrot.lane.b32.xlu2 %v6733_v16, %s4543_s30  ;;  %v6827_v7 = vld [vmem:[#allocation3 + $0x82] sm:$0xff] }
 0x3f4   : > { %2732 = vrot.lane.b32.xlu0 %v6740_v45, %s4543_s30 }
 0x3f5   : > { %v2296_v43 = vadd.f32 %v6405_v12, %v2260_v36  ;;  %v6833_v36 = vld [vmem:[#allocation3 + $0x92] sm:$0xff] }
 0x3f7   : > { %v2328_v56 = vmax.f32 %v2296_v43, 0.0 }
 0x3f8   : > { %v6762_v38 = vld [vmem:[#allocation3 + $0x159] sm:$0xff] }
 0x3f9   : > { %2361 = vst.msk [vmem:[#allocation3 + $0x169] sm:$0xff] %vm279_vm0, %v2328_v56  ;;  %v6915_v47 = vld [vmem:[#allocation3 + $0x152] sm:$0xff] }
 0x3fa   : > { %v2219_v54 = vpop.f32.mrf.mxu2  ;;  %8720 = vst [vmem:[#allocation96_spill] sm:$0xff] %v6915_v47 }
 0x3fb   : > { %v2261_v31 = vmul.f32 %v6392_v55, %v2219_v54  ;;  %2742 = vrot.lane.b32.xlu2 %v6746_v27, %s4543_s30  ;;  %v6841_v54 = vpop.permute.xlu0 %2690 }
 0x3fc   : > { %2738 = vrot.lane.b32.xlu0 %v6751_v61, %s4543_s30  ;;  %8707 = vst [vmem:[#allocation35_spill] sm:$0xff] %v6841_v54  ;;  %v6913_v54 = vld [vmem:[#allocation3 + $0x13a] sm:$0xff] }
 0x3fd   : > { %v2297_v34 = vadd.f32 %v6405_v12, %v2261_v31  ;;  %v6837_v43 = vpop.permute.xlu1 %2698  ;;  %v6843_v31 = vld [vmem:[#allocation3 + $0xaa] sm:$0xff]  ;;  %8719 = vst [vmem:[#allocation95_spill] sm:$0xff] %v6913_v54 }
 0x3fe   : > { %8705 = vst [vmem:[#allocation34_spill] sm:$0xff] %v6837_v43  ;;  %v6897_v43 = vld [vmem:[#allocation3 + $0x112] sm:$0xff] }
 0x3ff   : > { %v2329_v58 = vmax.f32 %v2297_v34, 0.0  ;;  %v6845_v34 = vld [vmem:[#allocation3 + $0xc2] sm:$0xff] }
 0x400   : > { %v6756_v52 = vld [vmem:[#allocation3 + $0x169] sm:$0xff] }
 0x401   : > { %2362 = vst.msk [vmem:[#allocation3 + $0x171] sm:$0xff] %vm279_vm0, %v2329_v58  ;;  %2746 = vrot.lane.b32.xlu1 %v6756_v52, %s4543_s30  ;;  %v6851_v58 = vld [vmem:[#allocation3 + $0xb2] sm:$0xff] }
 0x402   : > { %v2222_v10 = vpop.f32.mrf.mxu2 }
 0x403   : > { %v2262_v24 = vmul.f32 %v6392_v55, %v2222_v10 }
 0x404   : > { %2744 = vrot.lane.b32.xlu0 %v6762_v38, %s4543_s30 }
 0x405   : > { %v2298_v39 = vadd.f32 %v6405_v12, %v2262_v24 }
 0x407   : > { %v2330_v44 = vmax.f32 %v2298_v39, 0.0  ;;  %v6859_v39 = vpop.permute.xlu0 %2696 }
 0x408   : > { %v6767_v63 = vld [vmem:[#allocation3 + $0x171] sm:$0xff]  ;;  %8710 = vst [vmem:[#allocation56_spill] sm:$0xff] %v6859_v39 }
 0x409   : > { %2363 = vst.msk [vmem:[#allocation3 + $0x181] sm:$0xff] %vm279_vm0, %v2330_v44  ;;  %2816 = vrot.lane.b32.xlu1 %v2430_v28, %s4544_s8  ;;  %2748 = vrot.lane.b32.xlu2 %v6767_v63, %s4543_s30  ;;  %v6861_v28 = vld [vmem:[#allocation3 + $0xca] sm:$0xff]  ;;  %v6863_v44 = vld [vmem:[#allocation3 + $0xe2] sm:$0xff] }
 0x40a   : > { %v2225_v60 = vpop.f32.mrf.mxu2  ;;  %v6899_v39 = vld [vmem:[#allocation3 + $0x12a] sm:$0xff] }
 0x40b   : > { %v2263_v48 = vmul.f32 %v6392_v55, %v2225_v60  ;;  %v6791_v55 = vpop.permute.xlu2 %2694  ;;  %8716 = vst [vmem:[#allocation111_spill] sm:$0xff] %v6899_v39 }
 0x40c   : > { %2814 = vrot.lane.b32.xlu0 %v2429_v23, %s4544_s8  ;;  %8700 = vst [vmem:[#allocation81_spill] sm:$0xff] %v6791_v55  ;;  %v6869_v23 = vld [vmem:[#allocation3 + $0xda] sm:$0xff]  ;;  %v6905_v55 = vld [vmem:[#allocation3 + $0x122] sm:$0xff] }
 0x40d   : > { %v2299_v13 = vadd.f32 %v6405_v12, %v2263_v48  ;;  %v6793_v12 = vld [vmem:[#allocation3 + $0x52] sm:$0xff] }
 0x40f   : > { %v2331_v8 = vmax.f32 %v2299_v13, 0.0  ;;  %v6877_v13 = vpop.permute.xlu0 %2702 }
 0x410   : > { %8713 = vst [vmem:[#allocation44_spill] sm:$0xff] %v6877_v13 }
 0x411   : > { %2364 = vst.msk [vmem:[#allocation3 + $0x189] sm:$0xff] %vm279_vm0, %v2331_v8  ;;  %2822 = vrot.lane.b32.xlu1 %v6778_v4, %s4544_s8  ;;  %2818 = vrot.lane.b32.xlu2 %v6780_v62, %s4544_s8  ;;  %v6879_v8 = vld [vmem:[#allocation3 + $0xf2] sm:$0xff] }
 0x413   : > { %v6807_v15 = vpop.permute.xlu2 %2700 }
 0x414   : > { %2820 = vrot.lane.b32.xlu0 %v6787_v42, %s4544_s8  ;;  %8702 = vst [vmem:[#allocation85_spill] sm:$0xff] %v6807_v15 }
 0x415   : > { %v6855_v10 = vpop.permute.xlu1 %2704 }
 0x416   : > { %8708 = vst [vmem:[#allocation91_spill] sm:$0xff] %v6855_v10  ;;  %v6887_v10 = vld [vmem:[#allocation3 + $0xfa] sm:$0xff] }
 0x419   : > { %2828 = vrot.lane.b32.xlu1 %v6793_v12, %s4544_s8  ;;  %2824 = vrot.lane.b32.xlu2 %v6795_v33, %s4544_s8 }
 0x41b   : > { %v6823_v6 = vpop.permute.xlu2 %2706 }
 0x41c   : > { %2826 = vrot.lane.b32.xlu0 %v6803_v46, %s4544_s8  ;;  %8704 = vst [vmem:[#allocation69_spill] sm:$0xff] %v6823_v6  ;;  %v6881_v6 = vld [vmem:[#allocation3 + $0x10a] sm:$0xff] }
 0x421   : > { %2834 = vrot.lane.b32.xlu1 %v6809_v32, %s4544_s8  ;;  %2830 = vrot.lane.b32.xlu2 %v6811_v29, %s4544_s8 }
 0x423   : > { %v6839_v56 = vpop.permute.xlu2 %2712 }
 0x424   : > { %2832 = vrot.lane.b32.xlu0 %v6817_v17, %s4544_s8  ;;  %8706 = vst [vmem:[#allocation86_spill] sm:$0xff] %v6839_v56  ;;  %v6931_v56 = vld [vmem:[#allocation3 + $0x15a] sm:$0xff] }
 0x425   : > { %v6893_v15 = vpop.permute.xlu0 %2708  ;;  %8725 = vst [vmem:[#allocation175_spill] sm:$0xff] %v6931_v56 }
 0x426   : > { %8714 = vst [vmem:[#allocation45_spill] sm:$0xff] %v6893_v15 }
 0x429   : > { %2840 = vrot.lane.b32.xlu1 %v6825_v0, %s4544_s8  ;;  %2836 = vrot.lane.b32.xlu2 %v6827_v7, %s4544_s8 }
 0x42c   : > { %2838 = vrot.lane.b32.xlu0 %v6833_v36, %s4544_s8 }
 0x42d   : > { %v6873_v60 = vpop.permute.xlu1 %2710 }
 0x42e   : > { %8711 = vst [vmem:[#allocation74_spill] sm:$0xff] %v6873_v60 }
 0x431   : > { %2842 = vrot.lane.b32.xlu2 %v6843_v31, %s4544_s8  ;;  %2846 = vrot.lane.b32.xlu1 %v6845_v34, %s4544_s8 }
 0x434   : > { %2844 = vrot.lane.b32.xlu0 %v6851_v58, %s4544_s8 }
 0x435   : > { %v6857_v24 = vpop.permute.xlu2 %2718 }
 0x436   : > { %8709 = vst [vmem:[#allocation43_spill] sm:$0xff] %v6857_v24  ;;  %v6923_v24 = vld [vmem:[#allocation3 + $0x142] sm:$0xff] }
 0x437   : > { %8722 = vst [vmem:[#allocation93_spill] sm:$0xff] %v6923_v24 }
 0x439   : > { %2848 = vrot.lane.b32.xlu2 %v6861_v28, %s4544_s8  ;;  %2852 = vrot.lane.b32.xlu1 %v6863_v44, %s4544_s8 }
 0x43c   : > { %2850 = vrot.lane.b32.xlu0 %v6869_v23, %s4544_s8 }
 0x43d   : > { %v6875_v48 = vpop.permute.xlu2 %2724  ;;  %v6911_v15 = vpop.permute.xlu0 %2714 }
 0x43e   : > { %8712 = vst [vmem:[#allocation108_spill] sm:$0xff] %v6875_v48 }
 0x43f   : > { %8718 = vst [vmem:[#allocation57_spill] sm:$0xff] %v6911_v15  ;;  %v2460_v15 = vld [vmem:[#allocation3 + $0x172] sm:$0xff] }
 0x441   : > { %2854 = vrot.lane.b32.xlu2 %v6879_v8, %s4544_s8  ;;  %2858 = vrot.lane.b32.xlu1 %v6881_v6, %s4544_s8 }
 0x444   : > { %2856 = vrot.lane.b32.xlu0 %v6887_v10, %s4544_s8 }
 0x445   : > { %v6891_v60 = vpop.permute.xlu1 %2716  ;;  %v6895_v13 = vpop.permute.xlu2 %2730 }
 0x446   : > { %8715 = vst [vmem:[#allocation92_spill] sm:$0xff] %v6895_v13 }
 0x449   : > { %2860 = vrot.lane.b32.xlu2 %v6897_v43, %s4544_s8  ;;  %2864 = vrot.lane.b32.xlu1 %v6899_v39, %s4544_s8 }
 0x44c   : > { %2862 = vrot.lane.b32.xlu0 %v6905_v55, %s4544_s8 }
 0x44d   : > { %v6909_v21 = vpop.permute.xlu1 %2722  ;;  %v6917_v25 = vpop.permute.xlu2 %2736 }
 0x44e   : > { %8717 = vst [vmem:[#allocation36_spill] sm:$0xff] %v6909_v21 }
 0x44f   : > { %8721 = vst [vmem:[#allocation54_spill] sm:$0xff] %v6917_v25 }
 0x451   : > { %2866 = vrot.lane.b32.xlu2 %v6913_v54, %s4544_s8  ;;  %2870 = vrot.lane.b32.xlu1 %v6915_v47, %s4544_s8  ;;  %v2459_v47 = vld [vmem:[#allocation3 + $0x16a] sm:$0xff]  ;;  %v2367_v54 = vld [vmem:[#allocation3 + $0x18] sm:$0xff] }
 0x454   : > { %2868 = vrot.lane.b32.xlu0 %v6923_v24, %s4544_s8  ;;  %v2369_v24 = vld [vmem:[#allocation3 + $0x30] sm:$0xff] }
 0x455   : > { %v6929_v48 = vpop.permute.xlu1 %2728  ;;  %v6936_v25 = vpop.permute.xlu2 %2742 }
 0x456   : > { %v6927_v13 = vpop.permute.xlu0 %2720  ;;  %8724 = vst [vmem:[#allocation165_spill] sm:$0xff] %v6929_v48  ;;  %v2368_v48 = vld [vmem:[#allocation3 + $0x20] sm:$0xff] }
 0x457   : > { %8723 = vst [vmem:[#allocation94_spill] sm:$0xff] %v6927_v13 }
 0x458   : > { %8726 = vst [vmem:[#allocation184_spill] sm:$0xff] %v6936_v25  ;;  %v2372_v25 = vld [vmem:[#allocation3 + $0x50] sm:$0xff] }
 0x459   : > { %2872 = vrot.lane.b32.xlu2 %v6931_v56, %s4544_s8  ;;  %2876 = vrot.lane.b32.xlu1 %v2460_v15, %s4544_s8  ;;  %v2370_v56 = vld [vmem:[#allocation3 + $0x38] sm:$0xff] }
 0x45c   : > { %2874 = vrot.lane.b32.xlu0 %v2459_v47, %s4544_s8  ;;  %v2371_v47 = vld [vmem:[#allocation3 + $0x48] sm:$0xff] }
 0x45d   : > { %v6941_v13 = vpop.permute.xlu1 %2734 }
 0x45e   : > { %v6939_v21 = vpop.permute.xlu0 %2726  ;;  %8728 = vst [vmem:[#allocation46_spill] sm:$0xff] %v6941_v13 }
 0x45f   : > { %8727 = vst [vmem:[#allocation196_spill] sm:$0xff] %v6939_v21 }
 0x461   : > { %2942 = vrot.lane.b32.xlu2 %v2367_v54, %s4545_s9  ;;  %2946 = vrot.lane.b32.xlu1 %v2369_v24, %s4545_s9  ;;  %v2375_v24 = vld [vmem:[#allocation3 + $0x78] sm:$0xff] }
 0x463   : > { %v6945_v39 = vpop.permute.xlu2 %2748 }
 0x464   : > { %8729 = vst [vmem:[#allocation62_spill] sm:$0xff] %v6945_v39  ;;  %2944 = vrot.lane.b32.xlu0 %v2368_v48, %s4545_s9  ;;  %v2373_v39 = vld [vmem:[#allocation3 + $0x60] sm:$0xff]  ;;  %v2374_v48 = vld [vmem:[#allocation3 + $0x68] sm:$0xff] }
 0x465   : > { %v6952_v21 = vpop.permute.xlu1 %2740 }
 0x466   : > { %v6948_v15 = vpop.permute.xlu0 %2732  ;;  %8731 = vst [vmem:[#allocation112_spill] sm:$0xff] %v6952_v21  ;;  %v7034_v21 = vld [vmem:[#allocation3 + $0x128] sm:$0xff] }
 0x467   : > { %8730 = vst [vmem:[#allocation79_spill] sm:$0xff] %v6948_v15 }
 0x468   : > { %8758 = vst [vmem:[#allocation101_spill] sm:$0xff] %v7034_v21 }
 0x469   : > { %2948 = vrot.lane.b32.xlu2 %v2370_v56, %s4545_s9  ;;  %2952 = vrot.lane.b32.xlu1 %v2372_v25, %s4545_s9 }
 0x46b   : > { %v6954_v13 = vpop.permute.xlu2 %2818 }
 0x46c   : > { %8732 = vst [vmem:[#allocation125_spill] sm:$0xff] %v6954_v13  ;;  %2950 = vrot.lane.b32.xlu0 %v2371_v47, %s4545_s9  ;;  %v6968_v13 = vld [vmem:[#allocation3 + $0x98] sm:$0xff]  ;;  %v2376_v47 = vld [vmem:[#allocation3 + $0x80] sm:$0xff] }
 0x46d   : > { %8737 = vst [vmem:[#allocation153_spill] sm:$0xff] %v6968_v13 }
 0x46e   : > { %v6957_v54 = vpop.permute.xlu0 %2738 }
 0x46f   : > { %8733 = vst [vmem:[#allocation126_spill] sm:$0xff] %v6957_v54 }
 0x471   : > { %2954 = vrot.lane.b32.xlu2 %v2373_v39, %s4545_s9  ;;  %2958 = vrot.lane.b32.xlu1 %v2375_v24, %s4545_s9  ;;  %v2377_v39 = vld [vmem:[#allocation3 + $0x90] sm:$0xff] }
 0x473   : > { %v6961_v15 = vpop.permute.xlu1 %2746  ;;  %v6963_v56 = vpop.permute.xlu2 %2824 }
 0x474   : > { %8734 = vst [vmem:[#allocation145_spill] sm:$0xff] %v6961_v15  ;;  %2956 = vrot.lane.b32.xlu0 %v2374_v48, %s4545_s9  ;;  %v6980_v48 = vld [vmem:[#allocation3 + $0xc0] sm:$0xff]  ;;  %v7018_v15 = vld [vmem:[#allocation3 + $0xf0] sm:$0xff] }
 0x475   : > { %8735 = vst [vmem:[#allocation60_spill] sm:$0xff] %v6963_v56 }
 0x476   : > { %v6966_v25 = vpop.permute.xlu0 %2744  ;;  %8741 = vst [vmem:[#allocation47_spill] sm:$0xff] %v6980_v48 }
 0x477   : > { %8736 = vst [vmem:[#allocation78_spill] sm:$0xff] %v6966_v25  ;;  %v6982_v25 = vld [vmem:[#allocation3 + $0xa8] sm:$0xff] }
 0x478   : > { %8742 = vst [vmem:[#allocation48_spill] sm:$0xff] %v6982_v25 }
 0x479   : > { %2960 = vrot.lane.b32.xlu2 %v2376_v47, %s4545_s9  ;;  %2964 = vrot.lane.b32.xlu1 %v6968_v13, %s4545_s9  ;;  %v6988_v47 = vld [vmem:[#allocation3 + $0xb0] sm:$0xff]  ;;  %8753 = vst [vmem:[#allocation189_spill] sm:$0xff] %v7018_v15 }
 0x47b   : > { %v6973_v54 = vpop.permute.xlu1 %2816  ;;  %v6975_v24 = vpop.permute.xlu2 %2830 }
 0x47c   : > { %8738 = vst [vmem:[#allocation166_spill] sm:$0xff] %v6973_v54  ;;  %2962 = vrot.lane.b32.xlu0 %v2377_v39, %s4545_s9 }
 0x47d   : > { %8739 = vst [vmem:[#allocation167_spill] sm:$0xff] %v6975_v24  ;;  %v6998_v24 = vld [vmem:[#allocation3 + $0xe0] sm:$0xff] }
 0x47e   : > { %v6978_v56 = vpop.permute.xlu0 %2814  ;;  %8746 = vst [vmem:[#allocation134_spill] sm:$0xff] %v6998_v24 }
 0x47f   : > { %8740 = vst [vmem:[#allocation188_spill] sm:$0xff] %v6978_v56  ;;  %v7000_v56 = vld [vmem:[#allocation3 + $0xc8] sm:$0xff] }
 0x480   : > { %8747 = vst [vmem:[#allocation146_spill] sm:$0xff] %v7000_v56 }
 0x481   : > { %2966 = vrot.lane.b32.xlu2 %v6982_v25, %s4545_s9  ;;  %2970 = vrot.lane.b32.xlu1 %v6980_v48, %s4545_s9  ;;  %v7006_v48 = vld [vmem:[#allocation3 + $0xd8] sm:$0xff]  ;;  %v7016_v25 = vld [vmem:[#allocation3 + $0x108] sm:$0xff] }
 0x482   : > { %8748 = vst [vmem:[#allocation147_spill] sm:$0xff] %v7006_v48 }
 0x483   : > { %v6990_v13 = vpop.permute.xlu1 %2822  ;;  %v6992_v54 = vpop.permute.xlu2 %2836  ;;  %8752 = vst [vmem:[#allocation176_spill] sm:$0xff] %v7016_v25 }
 0x484   : > { %8743 = vst [vmem:[#allocation97_spill] sm:$0xff] %v6990_v13  ;;  %2968 = vrot.lane.b32.xlu0 %v6988_v47, %s4545_s9 }
 0x485   : > { %8744 = vst [vmem:[#allocation115_spill] sm:$0xff] %v6992_v54 }
 0x486   : > { %v6996_v39 = vpop.permute.xlu0 %2820 }
 0x487   : > { %8745 = vst [vmem:[#allocation123_spill] sm:$0xff] %v6996_v39 }
 0x489   : > { %2972 = vrot.lane.b32.xlu2 %v7000_v56, %s4545_s9  ;;  %2976 = vrot.lane.b32.xlu1 %v6998_v24, %s4545_s9  ;;  %v7024_v24 = vld [vmem:[#allocation3 + $0xf8] sm:$0xff]  ;;  %v7036_v56 = vld [vmem:[#allocation3 + $0x110] sm:$0xff] }
 0x48a   : > { %8754 = vst [vmem:[#allocation190_spill] sm:$0xff] %v7024_v24 }
 0x48b   : > { %v7008_v13 = vpop.permute.xlu1 %2828  ;;  %v7010_v54 = vpop.permute.xlu2 %2842  ;;  %8759 = vst [vmem:[#allocation127_spill] sm:$0xff] %v7036_v56 }
 0x48c   : > { %8749 = vst [vmem:[#allocation98_spill] sm:$0xff] %v7008_v13  ;;  %2974 = vrot.lane.b32.xlu0 %v7006_v48, %s4545_s9  ;;  %v2492_v48 = vld [vmem:[#allocation3 + $0x188] sm:$0xff] }
 0x48d   : > { %8750 = vst [vmem:[#allocation155_spill] sm:$0xff] %v7010_v54 }
 0x48e   : > { %v7014_v39 = vpop.permute.xlu0 %2826 }
 0x48f   : > { %8751 = vst [vmem:[#allocation163_spill] sm:$0xff] %v7014_v39 }
 0x491   : > { %2978 = vrot.lane.b32.xlu2 %v7018_v15, %s4545_s9  ;;  %2982 = vrot.lane.b32.xlu1 %v7016_v25, %s4545_s9  ;;  %v7042_v25 = vld [vmem:[#allocation3 + $0x120] sm:$0xff]  ;;  %v7052_v15 = vld [vmem:[#allocation3 + $0x138] sm:$0xff] }
 0x492   : > { %8760 = vst [vmem:[#allocation136_spill] sm:$0xff] %v7042_v25 }
 0x493   : > { %v7026_v13 = vpop.permute.xlu1 %2834  ;;  %v7028_v54 = vpop.permute.xlu2 %2848  ;;  %8764 = vst [vmem:[#allocation99_spill] sm:$0xff] %v7052_v15 }
 0x494   : > { %8755 = vst [vmem:[#allocation38_spill] sm:$0xff] %v7026_v13  ;;  %2980 = vrot.lane.b32.xlu0 %v7024_v24, %s4545_s9  ;;  %v2393_v24 = vld [vmem:[#allocation3 + $0x150] sm:$0xff] }
 0x495   : > { %8756 = vst [vmem:[#allocation63_spill] sm:$0xff] %v7028_v54 }
 0x496   : > { %v7032_v39 = vpop.permute.xlu0 %2832 }
 0x497   : > { %8757 = vst [vmem:[#allocation100_spill] sm:$0xff] %v7032_v39 }
 0x499   : > { %2984 = vrot.lane.b32.xlu2 %v7036_v56, %s4545_s9  ;;  %2988 = vrot.lane.b32.xlu1 %v7034_v21, %s4545_s9  ;;  %v7057_v21 = vld [vmem:[#allocation3 + $0x140] sm:$0xff] }
 0x49a   : > { %8765 = vst [vmem:[#allocation168_spill] sm:$0xff] %v7057_v21 }
 0x49b   : > { %v7044_v13 = vpop.permute.xlu1 %2840  ;;  %v7046_v54 = vpop.permute.xlu2 %2854 }
 0x49c   : > { %8761 = vst [vmem:[#allocation143_spill] sm:$0xff] %v7044_v13  ;;  %2986 = vrot.lane.b32.xlu0 %v7042_v25, %s4545_s9  ;;  %v7067_v25 = vld [vmem:[#allocation3 + $0x158] sm:$0xff] }
 0x49d   : > { %8762 = vst [vmem:[#allocation151_spill] sm:$0xff] %v7046_v54 }
 0x49e   : > { %v7050_v39 = vpop.permute.xlu0 %2838  ;;  %8768 = vst [vmem:[#allocation49_spill] sm:$0xff] %v7067_v25 }
 0x49f   : > { %8763 = vst [vmem:[#allocation104_spill] sm:$0xff] %v7050_v39  ;;  %v2396_v39 = vld [vmem:[#allocation3 + $0x170] sm:$0xff] }
 0x4a1   : > { %2990 = vrot.lane.b32.xlu2 %v7052_v15, %s4545_s9  ;;  %2994 = vrot.lane.b32.xlu1 %v2393_v24, %s4545_s9  ;;  %v7072_v24 = vld [vmem:[#allocation3 + $0x168] sm:$0xff] }
 0x4a3   : > { %v7059_v56 = vpop.permute.xlu2 %2860  ;;  %v7061_v13 = vpop.permute.xlu1 %2846 }
 0x4a4   : > { %8766 = vst [vmem:[#allocation178_spill] sm:$0xff] %v7059_v56  ;;  %2992 = vrot.lane.b32.xlu0 %v7057_v21, %s4545_s9  ;;  %v2491_v21 = vld [vmem:[#allocation3 + $0x180] sm:$0xff] }
 0x4a5   : > { %8767 = vst [vmem:[#allocation186_spill] sm:$0xff] %v7061_v13 }
 0x4a6   : > { %v7065_v54 = vpop.permute.xlu0 %2844 }
 0x4a9   : > { %2996 = vrot.lane.b32.xlu2 %v7067_v25, %s4545_s9  ;;  %3000 = vrot.lane.b32.xlu1 %v2396_v39, %s4545_s9 }
 0x4ab   : > { %v7074_v15 = vpop.permute.xlu2 %2866  ;;  %v7076_v56 = vpop.permute.xlu1 %2852 }
 0x4ac   : > { %8769 = vst [vmem:[#allocation65_spill] sm:$0xff] %v7074_v15  ;;  %2998 = vrot.lane.b32.xlu0 %v7072_v24, %s4545_s9 }
 0x4ad   : > { %8770 = vst [vmem:[#allocation84_spill] sm:$0xff] %v7076_v56 }
 0x4ae   : > { %v7080_v13 = vpop.permute.xlu0 %2850 }
 0x4b1   : > { %3002 = vrot.lane.b32.xlu2 %v2491_v21, %s4545_s9  ;;  %3070 = vrot.lane.b32.xlu1 %v6470_v40, %s4546_s10 }
 0x4b3   : > { %v7085_v25 = vpop.permute.xlu2 %2872  ;;  %v7087_v39 = vpop.permute.xlu1 %2858 }
 0x4b4   : > { %3004 = vrot.lane.b32.xlu0 %v2492_v48, %s4545_s9 }
 0x4b6   : > { %v7090_v15 = vpop.permute.xlu0 %2856 }
 0x4b9   : > { %3072 = vrot.lane.b32.xlu2 %v6531_v19, %s4546_s10  ;;  %3076 = vrot.lane.b32.xlu1 %v6577_v53, %s4546_s10 }
 0x4bb   : > { %v7096_v56 = vpop.permute.xlu2 %2942  ;;  %v7098_v21 = vpop.permute.xlu1 %2864 }
 0x4bc   : > { %3074 = vrot.lane.b32.xlu0 %v6554_v9, %s4546_s10 }
 0x4be   : > { %v7102_v40 = vpop.permute.xlu0 %2862 }
 0x4c1   : > { %3078 = vrot.lane.b32.xlu2 %v6592_v50, %s4546_s10  ;;  %3082 = vrot.lane.b32.xlu1 %v6609_v26, %s4546_s10 }
 0x4c3   : > { %v7108_v48 = vpop.permute.xlu2 %2948  ;;  %v7110_v19 = vpop.permute.xlu1 %2870 }
 0x4c4   : > { %8771 = vst [vmem:[#allocation116_spill] sm:$0xff] %v7110_v19  ;;  %3080 = vrot.lane.b32.xlu0 %v6599_v20, %s4546_s10 }
 0x4c6   : > { %v7114_v53 = vpop.permute.xlu0 %2868 }
 0x4c9   : > { %3084 = vrot.lane.b32.xlu2 %v6619_v11, %s4546_s10  ;;  %3088 = vrot.lane.b32.xlu1 %v6639_v37, %s4546_s10 }
 0x4cb   : > { %v7120_v9 = vpop.permute.xlu2 %2954  ;;  %v7122_v50 = vpop.permute.xlu1 %2876 }
 0x4cc   : > { %8772 = vst [vmem:[#allocation128_spill] sm:$0xff] %v7120_v9  ;;  %3086 = vrot.lane.b32.xlu0 %v6629_v3, %s4546_s10 }
 0x4cd   : > { %8773 = vst [vmem:[#allocation129_spill] sm:$0xff] %v7122_v50  ;;  %v7200_v50 = vld [vmem:[#allocation3 + $0x181] sm:$0xff] }
 0x4ce   : > { %v7126_v26 = vpop.permute.xlu0 %2874 }
 0x4d1   : > { %3090 = vrot.lane.b32.xlu2 %v6649_v5, %s4546_s10  ;;  %3094 = vrot.lane.b32.xlu1 %v6669_v51, %s4546_s10 }
 0x4d3   : > { %v7132_v20 = vpop.permute.xlu2 %2960  ;;  %v7134_v11 = vpop.permute.xlu1 %2946 }
 0x4d4   : > { %8774 = vst [vmem:[#allocation148_spill] sm:$0xff] %v7132_v20  ;;  %3092 = vrot.lane.b32.xlu0 %v6659_v49, %s4546_s10 }
 0x4d6   : > { %v7138_v37 = vpop.permute.xlu0 %2944 }
 0x4d9   : > { %3096 = vrot.lane.b32.xlu2 %v6679_v1, %s4546_s10  ;;  %3100 = vrot.lane.b32.xlu1 %v6705_v18, %s4546_s10 }
 0x4db   : > { %v7144_v3 = vpop.permute.xlu2 %2966  ;;  %v7146_v5 = vpop.permute.xlu1 %2952 }
 0x4dc   : > { %8775 = vst [vmem:[#allocation67_spill] sm:$0xff] %v7144_v3  ;;  %3098 = vrot.lane.b32.xlu0 %v6691_v57, %s4546_s10 }
 0x4de   : > { %v7150_v51 = vpop.permute.xlu0 %2950 }
 0x4e1   : > { %3102 = vrot.lane.b32.xlu2 %v6689_v41, %s4546_s10  ;;  %3106 = vrot.lane.b32.xlu1 %v6725_v22, %s4546_s10 }
 0x4e3   : > { %v7156_v49 = vpop.permute.xlu2 %2972  ;;  %v7158_v1 = vpop.permute.xlu1 %2958 }
 0x4e4   : > { %8776 = vst [vmem:[#allocation83_spill] sm:$0xff] %v7158_v1  ;;  %3104 = vrot.lane.b32.xlu0 %v6703_v59, %s4546_s10 }
 0x4e6   : > { %v7162_v18 = vpop.permute.xlu0 %2956 }
 0x4e7   : > { %8777 = vst [vmem:[#allocation156_spill] sm:$0xff] %v7162_v18  ;;  %v8798_v18 = vld [vmem:[#allocation146_spill] sm:$0xff] }
 0x4e9   : > { %3108 = vrot.lane.b32.xlu2 %v6701_v2, %s4546_s10  ;;  %3112 = vrot.lane.b32.xlu1 %v6740_v45, %s4546_s10 }
 0x4eb   : > { %v7168_v57 = vpop.permute.xlu2 %2978  ;;  %v7170_v41 = vpop.permute.xlu1 %2964 }
 0x4ec   : > { %8778 = vst [vmem:[#allocation169_spill] sm:$0xff] %v7170_v41  ;;  %3110 = vrot.lane.b32.xlu0 %v6718_v14, %s4546_s10 }
 0x4ee   : > { %v7174_v22 = vpop.permute.xlu0 %2962 }
 0x4ef   : > { %8779 = vst [vmem:[#allocation170_spill] sm:$0xff] %v7174_v22 }
 0x4f1   : > { %3114 = vrot.lane.b32.xlu2 %v6716_v35, %s4546_s10  ;;  %3118 = vrot.lane.b32.xlu1 %v6751_v61, %s4546_s10 }
 0x4f3   : > { %v7180_v59 = vpop.permute.xlu2 %2984  ;;  %v7182_v2 = vpop.permute.xlu1 %2970 }
 0x4f4   : > { %3116 = vrot.lane.b32.xlu0 %v6733_v16, %s4546_s10 }
 0x4f6   : > { %v7186_v45 = vpop.permute.xlu0 %2968 }
 0x4f9   : > { %3120 = vrot.lane.b32.xlu2 %v6731_v30, %s4546_s10  ;;  %3124 = vrot.lane.b32.xlu1 %v6762_v38, %s4546_s10 }
 0x4fb   : > { %v7192_v14 = vpop.permute.xlu2 %2990  ;;  %v7194_v35 = vpop.permute.xlu1 %2976 }
 0x4fc   : > { %3122 = vrot.lane.b32.xlu0 %v6746_v27, %s4546_s10  ;;  %v7214_v27 = vld [vmem:[#allocation3 + $0x189] sm:$0xff] }
 0x4fd   : > { %8780 = vst [vmem:[#allocation191_spill] sm:$0xff] %v7214_v27 }
 0x4fe   : > { %v7198_v61 = vpop.permute.xlu0 %2974 }
 0x501   : > { %3126 = vrot.lane.b32.xlu2 %v6756_v52, %s4546_s10  ;;  %3130 = vrot.lane.b32.xlu1 %v7200_v50, %s4546_s10 }
 0x503   : > { %v7206_v30 = vpop.permute.xlu2 %2996  ;;  %v7208_v16 = vpop.permute.xlu1 %2982 }
 0x504   : > { %3128 = vrot.lane.b32.xlu0 %v6767_v63, %s4546_s10 }
 0x506   : > { %v7212_v38 = vpop.permute.xlu0 %2980 }
 0x509   : > { %3132 = vrot.lane.b32.xlu2 %v7214_v27, %s4546_s10  ;;  %3200 = vrot.lane.b32.xlu1 %v6787_v42, %s4547_s11  ;;  %v2558_v27 = vld [vmem:[#allocation3 + $0x30] sm:$0xff] }
 0x50b   : > { %v7220_v52 = vpop.permute.xlu2 %3002  ;;  %v7222_v3 = vpop.permute.xlu1 %2988 }
 0x50c   : > { %3198 = vrot.lane.b32.xlu0 %v6780_v62, %s4547_s11 }
 0x50e   : > { %v7226_v19 = vpop.permute.xlu0 %2986 }
 0x511   : > { %3202 = vrot.lane.b32.xlu2 %v6778_v4, %s4547_s11  ;;  %3206 = vrot.lane.b32.xlu1 %v6803_v46, %s4547_s11 }
 0x513   : > { %v7232_v63 = vpop.permute.xlu2 %3072  ;;  %v7234_v41 = vpop.permute.xlu1 %2994 }
 0x514   : > { %3204 = vrot.lane.b32.xlu0 %v6795_v33, %s4547_s11 }
 0x516   : > { %v7238_v42 = vpop.permute.xlu0 %2992 }
 0x519   : > { %3208 = vrot.lane.b32.xlu2 %v6793_v12, %s4547_s11  ;;  %3212 = vrot.lane.b32.xlu1 %v6817_v17, %s4547_s11 }
 0x51b   : > { %v7244_v62 = vpop.permute.xlu2 %3078  ;;  %v7246_v22 = vpop.permute.xlu1 %3000 }
 0x51c   : > { %3210 = vrot.lane.b32.xlu0 %v6811_v29, %s4547_s11 }
 0x51e   : > { %v7250_v46 = vpop.permute.xlu0 %2998 }
 0x51f   : > { %8781 = vst [vmem:[#allocation50_spill] sm:$0xff] %v7250_v46  ;;  %v3693_v46 = vsel %vm279_vm0, %v6988_v47, %v6891_v60  ;;  %v8792_v60 = vld [vmem:[#allocation95_spill] sm:$0xff] }
 0x521   : > { %3214 = vrot.lane.b32.xlu2 %v6809_v32, %s4547_s11  ;;  %3218 = vrot.lane.b32.xlu1 %v6833_v36, %s4547_s11 }
 0x523   : > { %v7256_v20 = vpop.permute.xlu2 %3084  ;;  %v7258_v12 = vpop.permute.xlu1 %3070 }
 0x524   : > { %8782 = vst [vmem:[#allocation51_spill] sm:$0xff] %v7256_v20  ;;  %3216 = vrot.lane.b32.xlu0 %v6827_v7, %s4547_s11  ;;  %v8794_v20 = vld [vmem:[#allocation147_spill] sm:$0xff] }
 0x526   : > { %v7262_v17 = vpop.permute.xlu0 %3004 }
 0x527   : > { %8783 = vst [vmem:[#allocation102_spill] sm:$0xff] %v7262_v17 }
 0x529   : > { %3220 = vrot.lane.b32.xlu2 %v6825_v0, %s4547_s11  ;;  %3224 = vrot.lane.b32.xlu1 %v6851_v58, %s4547_s11 }
 0x52b   : > { %v7268_v29 = vpop.permute.xlu2 %3090  ;;  %v7270_v32 = vpop.permute.xlu1 %3076 }
 0x52c   : > { %8784 = vst [vmem:[#allocation117_spill] sm:$0xff] %v7268_v29  ;;  %3222 = vrot.lane.b32.xlu0 %v6843_v31, %s4547_s11  ;;  %v8790_v29 = vld [vmem:[#allocation111_spill] sm:$0xff] }
 0x52e   : > { %v7274_v36 = vpop.permute.xlu0 %3074 }
 0x531   : > { %3226 = vrot.lane.b32.xlu2 %v6845_v34, %s4547_s11  ;;  %3230 = vrot.lane.b32.xlu1 %v6869_v23, %s4547_s11 }
 0x533   : > { %v7280_v7 = vpop.permute.xlu2 %3096  ;;  %v7282_v0 = vpop.permute.xlu1 %3082 }
 0x534   : > { %8785 = vst [vmem:[#allocation124_spill] sm:$0xff] %v7282_v0  ;;  %3228 = vrot.lane.b32.xlu0 %v6861_v28, %s4547_s11 }
 0x536   : > { %v7286_v58 = vpop.permute.xlu0 %3080 }
 0x539   : > { %3232 = vrot.lane.b32.xlu2 %v6863_v44, %s4547_s11  ;;  %3236 = vrot.lane.b32.xlu1 %v6887_v10, %s4547_s11 }
 0x53b   : > { %v7292_v31 = vpop.permute.xlu2 %3102  ;;  %v7294_v34 = vpop.permute.xlu1 %3088 }
 0x53c   : > { %8786 = vst [vmem:[#allocation137_spill] sm:$0xff] %v7294_v34  ;;  %3234 = vrot.lane.b32.xlu0 %v6879_v8, %s4547_s11  ;;  %v8791_v34 = vld [vmem:[#allocation93_spill] sm:$0xff] }
 0x53e   : > { %v7298_v23 = vpop.permute.xlu0 %3086 }
 0x53f   : > { %8787 = vst [vmem:[#allocation53_spill] sm:$0xff] %v7298_v23 }
 0x541   : > { %3238 = vrot.lane.b32.xlu2 %v6881_v6, %s4547_s11  ;;  %3242 = vrot.lane.b32.xlu1 %v6905_v55, %s4547_s11  ;;  %v3725_v55 = vsel %vm1778_vm3, %v3693_v46, %v7065_v54  ;;  %v8795_v54 = vld [vmem:[#allocation96_spill] sm:$0xff] }
 0x543   : > { %v7304_v28 = vpop.permute.xlu2 %3108  ;;  %v7306_v44 = vpop.permute.xlu1 %3094 }
 0x544   : > { %8788 = vst [vmem:[#allocation149_spill] sm:$0xff] %v7306_v44  ;;  %3240 = vrot.lane.b32.xlu0 %v6897_v43, %s4547_s11  ;;  %v3757_v44 = vsel %vm1811_vm4, %v3725_v55, %v7156_v49  ;;  %v8796_v49 = vld [vmem:[#allocation189_spill] sm:$0xff] }
 0x546   : > { %v7310_v17 = vpop.permute.xlu0 %3092 }
 0x547   : > { %8789 = vst [vmem:[#allocation103_spill] sm:$0xff] %v7310_v17 }
 0x549   : > { %3244 = vrot.lane.b32.xlu2 %v8790_v29, %s4547_s11  ;;  %3248 = vrot.lane.b32.xlu1 %v8791_v34, %s4547_s11  ;;  %v8793_v29 = vld [vmem:[#allocation36_spill] sm:$0xff] }
 0x54a   : > { %v3696_v34 = vsel %vm279_vm0, %v8794_v20, %v8793_v29  ;;  %v8799_v29 = vld [vmem:[#allocation175_spill] sm:$0xff] }
 0x54b   : > { %v7323_v23 = vpop.permute.xlu2 %3114  ;;  %v3101_v1 = vpop.permute.xlu1 %3100  ;;  %v3728_v46 = vsel %vm1778_vm3, %v3696_v34, %v7080_v13 }
 0x54c   : > { %v7326_v17 = vsel %vm1844_vm6, %v3757_v44, %v3101_v1  ;;  %3246 = vrot.lane.b32.xlu0 %v8792_v60, %s4547_s11  ;;  %v3760_v1 = vsel %vm1811_vm4, %v3728_v46, %v7168_v57  ;;  %v8797_v60 = vld [vmem:[#allocation94_spill] sm:$0xff]  ;;  %v2606_v46 = vld [vmem:[#allocation3 + $0xf1] sm:$0xff] }
 0x54d   : > { %v3695_v0 = vsel %vm279_vm0, %v8798_v18, %v8797_v60 }
 0x54e   : > { %v7330_v47 = vpop.permute.xlu0 %3098 }
 0x551   : > { %3250 = vrot.lane.b32.xlu2 %v8795_v54, %s4547_s11  ;;  %3358 = vrot.lane.b32.xlu1 %v8796_v49, %s4548_s12  ;;  %v8800_v54 = vld [vmem:[#allocation63_spill] sm:$0xff] }
 0x552   : > { %v3727_v9 = vsel %vm1778_vm3, %v3695_v0, %v8800_v54  ;;  %v2559_v54 = vld [vmem:[#allocation3 + $0x38] sm:$0xff] }
 0x553   : > { %v7343_v44 = vpop.permute.xlu2 %3120  ;;  %v3107_v55 = vpop.permute.xlu1 %3106  ;;  %v3759_v13 = vsel %vm1811_vm4, %v3727_v9, %v7194_v35  ;;  %v2590_v9 = vld [vmem:[#allocation3 + $0x31] sm:$0xff] }
 0x554   : > { %v7349_v20 = vsel %vm1844_vm6, %v3760_v1, %v3107_v55  ;;  %3252 = vrot.lane.b32.xlu0 %v8799_v29, %s4547_s11  ;;  %v2607_v29 = vld [vmem:[#allocation3 + $0xf9] sm:$0xff] }
 0x556   : > { %v3105_v57 = vpop.permute.xlu0 %3104 }
 0x557   : > { %v7358_v34 = vsel %vm1844_vm6, %v3759_v13, %v3105_v57  ;;  %v8805_v13 = vld [vmem:[#allocation168_spill] sm:$0xff] }
 0x559   : > { %3486 = vrot.lane.b32.xlu2 %v2606_v46, %s4549_s13  ;;  %3326 = vrot.lane.b32.xlu1 %v2558_v27, %s4548_s12  ;;  %v8803_v27 = vld [vmem:[#allocation190_spill] sm:$0xff] }
 0x55b   : > { %v7362_v18 = vpop.permute.xlu2 %3126  ;;  %v7364_v1 = vpop.permute.xlu1 %3112 }
 0x55c   : > { %8801 = vst [vmem:[#allocation157_spill] sm:$0xff] %v7362_v18  ;;  %3614 = vrot.lane.b32.xlu0 %v6879_v8, %s4550_s14  ;;  %v8804_v8 = vld [vmem:[#allocation112_spill] sm:$0xff] }
 0x55d   : > { %v3705_v57 = vsel %vm279_vm0, %v8805_v13, %v8804_v8  ;;  %v8806_v13 = vld [vmem:[#allocation145_spill] sm:$0xff] }
 0x55e   : > { %v7368_v0 = vpop.permute.xlu0 %3110 }
 0x561   : > { %3454 = vrot.lane.b32.xlu2 %v2590_v9, %s4549_s13  ;;  %3582 = vrot.lane.b32.xlu1 %v6778_v4, %s4550_s14  ;;  %v3737_v4 = vsel %vm1778_vm3, %v3705_v57, %v7114_v53  ;;  %v8808_v57 = vld [vmem:[#allocation78_spill] sm:$0xff] }
 0x562   : > { %v3769_v46 = vsel %vm1811_vm4, %v3737_v4, %v7206_v30  ;;  %v8809_v4 = vld [vmem:[#allocation49_spill] sm:$0xff] }
 0x563   : > { %v7373_v35 = vpop.permute.xlu2 %3132  ;;  %v7375_v55 = vpop.permute.xlu1 %3118 }
 0x564   : > { %8802 = vst [vmem:[#allocation164_spill] sm:$0xff] %v7373_v35  ;;  %3360 = vrot.lane.b32.xlu0 %v8803_v27, %s4548_s12 }
 0x566   : > { %v7379_v60 = vpop.permute.xlu0 %3116 }
 0x569   : > { %3488 = vrot.lane.b32.xlu2 %v2607_v29, %s4549_s13  ;;  %3328 = vrot.lane.b32.xlu1 %v2559_v54, %s4548_s12  ;;  %v2591_v29 = vld [vmem:[#allocation3 + $0x39] sm:$0xff]  ;;  %v3708_v54 = vsel %vm279_vm0, %v7072_v24, %v8806_v13 }
 0x56a   : > { %v3740_v53 = vsel %vm1778_vm3, %v3708_v54, %v7126_v26  ;;  %v2608_v54 = vld [vmem:[#allocation3 + $0x109] sm:$0xff] }
 0x56b   : > { %v7390_v9 = vpop.permute.xlu2 %3202  ;;  %v3125_v35 = vpop.permute.xlu1 %3124  ;;  %v3772_v30 = vsel %vm1811_vm4, %v3740_v53, %v7220_v52  ;;  %v2560_v53 = vld [vmem:[#allocation3 + $0x48] sm:$0xff] }
 0x56c   : > { %v7393_v18 = vsel %vm1844_vm6, %v3769_v46, %v3125_v35  ;;  %3616 = vrot.lane.b32.xlu0 %v6887_v10, %s4550_s14  ;;  %v3707_v46 = vsel %vm279_vm0, %v8809_v4, %v8808_v57  ;;  %v2624_v57 = vld [vmem:[#allocation3 + $0x4a] sm:$0xff] }
 0x56e   : > { %v7397_v8 = vpop.permute.xlu0 %3122 }
 0x571   : > { %3456 = vrot.lane.b32.xlu2 %v2591_v29, %s4549_s13  ;;  %3584 = vrot.lane.b32.xlu1 %v6795_v33, %s4550_s14  ;;  %v8811_v29 = vld [vmem:[#allocation176_spill] sm:$0xff]  ;;  %v3739_v33 = vsel %vm1778_vm3, %v3707_v46, %v7085_v25 }
 0x572   : > { %v3771_v26 = vsel %vm1811_vm4, %v3739_v33, %v7246_v22  ;;  %v2592_v22 = vld [vmem:[#allocation3 + $0x49] sm:$0xff] }
 0x573   : > { %v7409_v35 = vpop.permute.xlu2 %3208  ;;  %v3131_v10 = vpop.permute.xlu1 %3130  ;;  %v8815_v33 = vld [vmem:[#allocation127_spill] sm:$0xff] }
 0x574   : > { %8807 = vst [vmem:[#allocation179_spill] sm:$0xff] %v7409_v35  ;;  %v7415_v24 = vsel %vm1844_vm6, %v3772_v30, %v3131_v10  ;;  %3362 = vrot.lane.b32.xlu0 %v8811_v29, %s4548_s12 }
 0x575   : > { %8810 = vst [vmem:[#allocation192_spill] sm:$0xff] %v7415_v24  ;;  %v2561_v24 = vld [vmem:[#allocation3 + $0x50] sm:$0xff] }
 0x576   : > { %v3129_v52 = vpop.permute.xlu0 %3128 }
 0x577   : > { %v7424_v13 = vsel %vm1844_vm6, %v3771_v26, %v3129_v52  ;;  %v8816_v52 = vld [vmem:[#allocation57_spill] sm:$0xff] }
 0x578   : > { %8812 = vst [vmem:[#allocation193_spill] sm:$0xff] %v7424_v13  ;;  %v8818_v13 = vld [vmem:[#allocation155_spill] sm:$0xff] }
 0x579   : > { %3490 = vrot.lane.b32.xlu2 %v2608_v54, %s4549_s13  ;;  %3330 = vrot.lane.b32.xlu1 %v2560_v53, %s4548_s12  ;;  %v8817_v54 = vld [vmem:[#allocation48_spill] sm:$0xff] }
 0x57a   : > { %v2609_v53 = vld [vmem:[#allocation3 + $0x111] sm:$0xff] }
 0x57b   : > { %v7428_v30 = vpop.permute.xlu2 %3214  ;;  %v7430_v10 = vpop.permute.xlu1 %3200 }
 0x57c   : > { %8813 = vst [vmem:[#allocation41_spill] sm:$0xff] %v7428_v30  ;;  %3618 = vrot.lane.b32.xlu0 %v6881_v6, %s4550_s14  ;;  %v3692_v6 = vsel %vm279_vm0, %v8817_v54, %v8816_v52  ;;  %v2593_v54 = vld [vmem:[#allocation3 + $0x51] sm:$0xff] }
 0x57e   : > { %v7434_v25 = vpop.permute.xlu0 %3198 }
 0x581   : > { %3458 = vrot.lane.b32.xlu2 %v2592_v22, %s4549_s13  ;;  %3586 = vrot.lane.b32.xlu1 %v2624_v57, %s4550_s14  ;;  %v3724_v22 = vsel %vm1778_vm3, %v3692_v6, %v8818_v13  ;;  %v2625_v6 = vld [vmem:[#allocation3 + $0x52] sm:$0xff] }
 0x582   : > { %v3756_v57 = vsel %vm1811_vm4, %v3724_v22, %v7182_v2  ;;  %v8827_v22 = vld [vmem:[#allocation196_spill] sm:$0xff] }
 0x583   : > { %v7438_v4 = vpop.permute.xlu2 %3220  ;;  %v7440_v46 = vpop.permute.xlu1 %3206 }
 0x584   : > { %8814 = vst [vmem:[#allocation66_spill] sm:$0xff] %v7438_v4  ;;  %3364 = vrot.lane.b32.xlu0 %v8815_v33, %s4548_s12  ;;  %v3788_v4 = vsel %vm1844_vm6, %v3756_v57, %v7330_v47  ;;  %v3698_v57 = vsel %vm279_vm0, %v8796_v49, %v8827_v22 }
 0x586   : > { %v7444_v26 = vpop.permute.xlu0 %3204 }
 0x589   : > { %3492 = vrot.lane.b32.xlu2 %v2609_v53, %s4549_s13  ;;  %3332 = vrot.lane.b32.xlu1 %v2561_v24, %s4548_s12  ;;  %v8823_v24 = vld [vmem:[#allocation136_spill] sm:$0xff]  ;;  %v8826_v53 = vld [vmem:[#allocation153_spill] sm:$0xff] }
 0x58b   : > { %v3227_v30 = vpop.permute.xlu2 %3226  ;;  %v7457_v35 = vpop.permute.xlu1 %3212 }
 0x58c   : > { %8819 = vst [vmem:[#allocation106_spill] sm:$0xff] %v7457_v35  ;;  %v7460_v52 = vsel %vm1877_vm5, %v3788_v4, %v3227_v30  ;;  %3620 = vrot.lane.b32.xlu0 %v6897_v43, %s4550_s14  ;;  %v8825_v4 = vld [vmem:[#allocation86_spill] sm:$0xff] }
 0x58d   : > { %8820 = vst [vmem:[#allocation107_spill] sm:$0xff] %v7460_v52  ;;  %v3691_v43 = vsel %vm279_vm0, %v8826_v53, %v8825_v4  ;;  %v2562_v52 = vld [vmem:[#allocation3 + $0x60] sm:$0xff] }
 0x58e   : > { %v7464_v13 = vpop.permute.xlu0 %3210 }
 0x58f   : > { %8821 = vst [vmem:[#allocation130_spill] sm:$0xff] %v7464_v13  ;;  %v8829_v13 = vld [vmem:[#allocation151_spill] sm:$0xff] }
 0x591   : > { %3460 = vrot.lane.b32.xlu2 %v2593_v54, %s4549_s13  ;;  %3588 = vrot.lane.b32.xlu1 %v2625_v6, %s4550_s14  ;;  %v2610_v54 = vld [vmem:[#allocation3 + $0x121] sm:$0xff] }
 0x592   : > { %v8828_v6 = vld [vmem:[#allocation143_spill] sm:$0xff] }
 0x593   : > { %v7468_v2 = vpop.permute.xlu2 %3232  ;;  %v7470_v47 = vpop.permute.xlu1 %3218  ;;  %v3723_v35 = vsel %vm1778_vm3, %v3691_v43, %v8828_v6  ;;  %v2642_v6 = vld [vmem:[#allocation3 + $0x122] sm:$0xff] }
 0x594   : > { %8822 = vst [vmem:[#allocation138_spill] sm:$0xff] %v7470_v47  ;;  %3366 = vrot.lane.b32.xlu0 %v8823_v24, %s4548_s12  ;;  %v3730_v47 = vsel %vm1778_vm3, %v3698_v57, %v8829_v13  ;;  %v8831_v57 = vld [vmem:[#allocation178_spill] sm:$0xff] }
 0x595   : > { %v3762_v4 = vsel %vm1811_vm4, %v3730_v47, %v7208_v16  ;;  %v3942_v16 = vld [vmem:[%s8203_s2 + $0x40] sm:$0xff]  ;;  %v2594_v47 = vld [vmem:[#allocation3 + $0x61] sm:$0xff] }
 0x596   : > { %v7474_v30 = vpop.permute.xlu0 %3216  ;;  %v3794_v53 = vsel %vm1844_vm6, %v3762_v4, %v7368_v0  ;;  %v8830_v0 = vld [vmem:[#allocation79_spill] sm:$0xff]  ;;  %4461 = vmatpush.msra.mxu3 %v3942_v16  ;;  %4046 = vmatpush.msra.mxu1 %v3942_v16  ;;  %v3940_v4 = vld [vmem:[%s8203_s2 + $0x30] sm:$0xff]  ;;  %v3939_v16 = vld [vmem:[%s8203_s2 + $0x28] sm:$0xff] }
 0x597   : > { %8824 = vst [vmem:[#allocation144_spill] sm:$0xff] %v7474_v30  ;;  %v3755_v30 = vsel %vm1811_vm4, %v3723_v35, %v7186_v45  ;;  %v3701_v35 = vsel %vm279_vm0, %v8815_v33, %v8830_v0  ;;  %v3937_v0 = vld [vmem:[%s8203_s2 + $0x18] sm:$0xff] }
 0x598   : > { %v3787_v49 = vsel %vm1844_vm6, %v3755_v30, %v7280_v7  ;;  %v3941_v7 = vld [vmem:[%s8203_s2 + $0x38] sm:$0xff] }
 0x599   : > { %3494 = vrot.lane.b32.xlu2 %v2610_v54, %s4549_s13  ;;  %3334 = vrot.lane.b32.xlu1 %v2562_v52, %s4548_s12  ;;  %v2626_v30 = vld [vmem:[#allocation3 + $0x62] sm:$0xff]  ;;  %v3733_v54 = vsel %vm1778_vm3, %v3701_v35, %v8831_v57  ;;  %v8832_v35 = vld [vmem:[#allocation108_spill] sm:$0xff] }
 0x59a   : > { %4462 = vmatpush.msra.mxu3 %v3941_v7  ;;  %4047 = vmatpush.msra.mxu1 %v3941_v7  ;;  %v3938_v7 = vld [vmem:[%s8203_s2 + $0x20] sm:$0xff]  ;;  %v8834_v57 = vld [vmem:[#allocation126_spill] sm:$0xff] }
 0x59b   : > { %v3239_v43 = vpop.permute.xlu2 %3238  ;;  %v3225_v22 = vpop.permute.xlu1 %3224 }
 0x59c   : > { %v7497_v13 = vsel %vm1877_vm5, %v3794_v53, %v3239_v43  ;;  %v7500_v52 = vsel %vm1877_vm5, %v3787_v49, %v3225_v22  ;;  %3622 = vrot.lane.b32.xlu0 %v2642_v6, %s4550_s14  ;;  %v3765_v49 = vsel %vm1811_vm4, %v3733_v54, %v7222_v3  ;;  %v2579_v22 = vld [vmem:[#allocation3 + $0x128] sm:$0xff]  ;;  %4463 = vmatpush.msra.mxu3 %v3940_v4 }
 0x59d   : > { %v3797_v33 = vsel %vm1844_vm6, %v3765_v49, %v7379_v60  ;;  %4048 = vmatpush.msra.mxu1 %v3940_v4  ;;  %v8835_v54 = vld [vmem:[#allocation99_spill] sm:$0xff] }
 0x59e   : > { %v7503_v45 = vpop.permute.xlu0 %3222  ;;  %4464 = vmatpush.msra.mxu3 %v3939_v16  ;;  %v3704_v4 = vsel %vm279_vm0, %v8835_v54, %v8834_v57  ;;  %v2611_v49 = vld [vmem:[#allocation3 + $0x129] sm:$0xff] }
 0x59f   : > { %4049 = vmatpush.msra.mxu1 %v3939_v16  ;;  %v3936_v16 = vld [vmem:[%s8203_s2 + $0x10] sm:$0xff] }
 0x5a0   : > { %4465 = vmatpush.msra.mxu3 %v3938_v7 }
 0x5a1   : > { %3462 = vrot.lane.b32.xlu2 %v2594_v47, %s4549_s13  ;;  %3590 = vrot.lane.b32.xlu1 %v2626_v30, %s4550_s14  ;;  %v8833_v47 = vld [vmem:[#allocation134_spill] sm:$0xff] }
 0x5a2   : > { %v3697_v30 = vsel %vm279_vm0, %v8833_v47, %v8832_v35  ;;  %4466 = vmatpush.msra.mxu3 %v3937_v0  ;;  %4050 = vmatpush.msra.mxu1 %v3938_v7 }
 0x5a3   : > { %v3245_v53 = vpop.permute.xlu2 %3244  ;;  %v7525_v43 = vpop.permute.xlu1 %3230 }
 0x5a4   : > { %v7528_v6 = vsel %vm1877_vm5, %v3797_v33, %v3245_v53  ;;  %3368 = vrot.lane.b32.xlu0 %v2579_v22, %s4548_s12  ;;  %v8836_v33 = vld [vmem:[#allocation65_spill] sm:$0xff]  ;;  %v8837_v22 = vld [vmem:[#allocation84_spill] sm:$0xff]  ;;  %4467 = vmatpush.msra.mxu3 %v3936_v16 }
 0x5a5   : > { %v3736_v53 = vsel %vm1778_vm3, %v3704_v4, %v8836_v33  ;;  %4051 = vmatpush.msra.mxu1 %v3937_v0 }
 0x5a6   : > { %v3229_v3 = vpop.permute.xlu0 %3228  ;;  %v3768_v47 = vsel %vm1811_vm4, %v3736_v53, %v7234_v41  ;;  %v3935_v41 = vld [vmem:[%s8203_s2 + $0x8] sm:$0xff]  ;;  %v2595_v53 = vld [vmem:[#allocation3 + $0x69] sm:$0xff] }
 0x5a7   : > { %v7536_v60 = vsel %vm1877_vm5, %v7326_v17, %v3229_v3  ;;  %v2563_v17 = vld [vmem:[#allocation3 + $0x68] sm:$0xff]  ;;  %v3729_v3 = vsel %vm1778_vm3, %v3697_v30, %v8837_v22  ;;  %v3800_v30 = vsel %vm1844_vm6, %v3768_v47, %v7397_v8  ;;  %4468 = vmatpush.msra.mxu3 %v3935_v41  ;;  %4052 = vmatpush.msra.mxu1 %v3936_v16  ;;  %v8838_v8 = vld [vmem:[#allocation92_spill] sm:$0xff]  ;;  %v8839_v47 = vld [vmem:[#allocation165_spill] sm:$0xff] }
 0x5a8   : > { %v3761_v35 = vsel %vm1811_vm4, %v3729_v3, %v7212_v38  ;;  %v3700_v7 = vsel %vm279_vm0, %v8811_v29, %v8838_v8  ;;  %v2627_v3 = vld [vmem:[#allocation3 + $0x6a] sm:$0xff]  ;;  %v3699_v16 = vsel %vm279_vm0, %v8803_v27, %v8839_v47  ;;  %v2612_v8 = vld [vmem:[#allocation3 + $0x139] sm:$0xff] }
 0x5a9   : > { %3496 = vrot.lane.b32.xlu2 %v2611_v49, %s4549_s13  ;;  %3336 = vrot.lane.b32.xlu1 %v2563_v17, %s4548_s12  ;;  %v3793_v57 = vsel %vm1844_vm6, %v3761_v35, %v7304_v28  ;;  %v2643_v17 = vld [vmem:[#allocation3 + $0x12a] sm:$0xff]  ;;  %v3732_v35 = vsel %vm1778_vm3, %v3700_v7, %v7087_v39  ;;  %v3731_v39 = vsel %vm1778_vm3, %v3699_v16, %v7090_v15  ;;  %v2564_v7 = vld [vmem:[#allocation3 + $0x78] sm:$0xff] }
 0x5aa   : > { %v3934_v28 = vld [vmem:[%s8203_s2] sm:$0xff]  ;;  %v3764_v0 = vsel %vm1811_vm4, %v3732_v35, %v7226_v19  ;;  %4053 = vmatpush.msra.mxu1 %v3935_v41  ;;  %v3763_v19 = vsel %vm1811_vm4, %v3731_v39, %v7180_v59  ;;  %v8841_v41 = vld [vmem:[#allocation101_spill] sm:$0xff] }
 0x5ab   : > { %v3251_v4 = vpop.permute.xlu2 %3250  ;;  %v3237_v49 = vpop.permute.xlu1 %3236  ;;  %4469 = vmatpush.msra.mxu3 %v3934_v28  ;;  %v3796_v29 = vsel %vm1844_vm6, %v3764_v0, %v7323_v23  ;;  %v3795_v27 = vsel %vm1844_vm6, %v3763_v19, %v7364_v1  ;;  %v8842_v1 = vld [vmem:[#allocation46_spill] sm:$0xff] }
 0x5ac   : > { %v7568_v33 = vsel %vm1877_vm5, %v3800_v30, %v3251_v4  ;;  %v7571_v22 = vsel %vm1877_vm5, %v3793_v57, %v3237_v49  ;;  %3624 = vrot.lane.b32.xlu0 %v2643_v17, %s4550_s14  ;;  %4054 = vmatpush.msra.mxu1 %v3934_v28  ;;  %v8840_v17 = vld [vmem:[#allocation54_spill] sm:$0xff]  ;;  %v3702_v28 = vsel %vm279_vm0, %v8823_v24, %v8842_v1 }
 0x5ad   : > { %v3703_v15 = vsel %vm279_vm0, %v8841_v41, %v8840_v17  ;;  %v2644_v0 = vld [vmem:[#allocation3 + $0x13a] sm:$0xff] }
 0x5ae   : > { %v7577_v38 = vpop.permute.xlu0 %3234  ;;  %v2581_v19 = vld [vmem:[#allocation3 + $0x140] sm:$0xff] }
 0x5af   : > { %v8845_v17 = vld [vmem:[#allocation186_spill] sm:$0xff] }
 0x5b1   : > { %3464 = vrot.lane.b32.xlu2 %v2595_v53, %s4549_s13  ;;  %3592 = vrot.lane.b32.xlu1 %v2627_v3, %s4550_s14 }
 0x5b3   : > { %v3487_v57 = vpop.permute.xlu2 %3486  ;;  %v3243_v30 = vpop.permute.xlu1 %3242 }
 0x5b4   : > { %v7599_v4 = vsel %vm1877_vm5, %v3796_v29, %v3243_v30  ;;  %3370 = vrot.lane.b32.xlu0 %v8835_v54, %s4548_s12  ;;  %v3735_v54 = vsel %vm1778_vm3, %v3703_v15, %v7098_v21  ;;  %v3734_v21 = vsel %vm1778_vm3, %v3702_v28, %v7102_v40  ;;  %v2596_v29 = vld [vmem:[#allocation3 + $0x79] sm:$0xff] }
 0x5b5   : > { %v3767_v59 = vsel %vm1811_vm4, %v3735_v54, %v7238_v42  ;;  %v3766_v42 = vsel %vm1811_vm4, %v3734_v21, %v7192_v14  ;;  %v2628_v30 = vld [vmem:[#allocation3 + $0x7a] sm:$0xff]  ;;  %v8844_v14 = vld [vmem:[#allocation47_spill] sm:$0xff] }
 0x5b6   : > { %v3241_v49 = vpop.permute.xlu0 %3240  ;;  %v3799_v53 = vsel %vm1844_vm6, %v3767_v59, %v7343_v44  ;;  %v3798_v24 = vsel %vm1844_vm6, %v3766_v42, %v7375_v55  ;;  %v2613_v54 = vld [vmem:[#allocation3 + $0x141] sm:$0xff]  ;;  %v8847_v42 = vld [vmem:[#allocation188_spill] sm:$0xff] }
 0x5b7   : > { %v7608_v23 = vsel %vm1877_vm5, %v3795_v27, %v3241_v49  ;;  %v8843_v27 = vld [vmem:[#allocation43_spill] sm:$0xff]  ;;  %v2565_v59 = vld [vmem:[#allocation3 + $0x80] sm:$0xff] }
 0x5b8   : > { %v3694_v49 = vsel %vm279_vm0, %v8844_v14, %v8843_v27  ;;  %v2597_v27 = vld [vmem:[#allocation3 + $0x81] sm:$0xff] }
 0x5b9   : > { %3498 = vrot.lane.b32.xlu2 %v2612_v8, %s4549_s13  ;;  %3338 = vrot.lane.b32.xlu1 %v2564_v7, %s4548_s12  ;;  %v3726_v41 = vsel %vm1778_vm3, %v3694_v49, %v8845_v17  ;;  %v2365_v8 = vld [vmem:[#allocation3] sm:$0xff]  ;;  %v2582_v49 = vld [vmem:[#allocation3 + $0x150] sm:$0xff]  ;;  %v2366_v17 = vld [vmem:[#allocation3 + $0x8] sm:$0xff] }
 0x5ba   : > { %v3758_v7 = vsel %vm1811_vm4, %v3726_v41, %v7198_v61  ;;  %v2645_v61 = vld [vmem:[#allocation3 + $0x142] sm:$0xff]  ;;  %v2614_v41 = vld [vmem:[#allocation3 + $0x151] sm:$0xff] }
 0x5bb   : > { %v3455_v3 = vpop.permute.xlu2 %3454  ;;  %v3249_v35 = vpop.permute.xlu1 %3248  ;;  %v3790_v1 = vsel %vm1844_vm6, %v3758_v7, %v7292_v31  ;;  %v2629_v14 = vld [vmem:[#allocation3 + $0x82] sm:$0xff]  ;;  %v3823_v7 = vsel %vm1877_vm5, %v7358_v34, %v7468_v2 }
 0x5bc   : > { %v7627_v47 = vsel %vm1877_vm5, %v3799_v53, %v3249_v35  ;;  %3626 = vrot.lane.b32.xlu0 %v2644_v0, %s4550_s14  ;;  %v3822_v28 = vsel %vm1877_vm5, %v3790_v1, %v7525_v43  ;;  %v8846_v53 = vld [vmem:[#allocation39_spill] sm:$0xff] }
 0x5be   : > { %v3247_v16 = vpop.permute.xlu0 %3246 }
 0x5bf   : > { %v7635_v44 = vsel %vm1877_vm5, %v3798_v24, %v3247_v16 }
 0x5c1   : > { %3466 = vrot.lane.b32.xlu2 %v2596_v29, %s4549_s13  ;;  %3594 = vrot.lane.b32.xlu1 %v2628_v30, %s4550_s14 }
 0x5c3   : > { %v3489_v40 = vpop.permute.xlu2 %3488  ;;  %v3359_v39 = vpop.permute.xlu1 %3358 }
 0x5c4   : > { %3372 = vrot.lane.b32.xlu0 %v2581_v19, %s4548_s12  ;;  %v3854_v35 = vsel %vm1910_vm7, %v3822_v28, %v3359_v39 }
 0x5c5   : > { %v3886_v29 = vsel %vm1943_vm9, %v3854_v35, %v3487_v57 }
 0x5c6   : > { %v3253_v55 = vpop.permute.xlu0 %3252 }
 0x5c7   : > { %v7647_v15 = vsel %vm1877_vm5, %v7393_v18, %v3253_v55  ;;  %v3678_v18 = vsel %vm279_vm0, %v2365_v8, %v8846_v53  ;;  %v2566_v8 = vld [vmem:[#allocation3 + $0x90] sm:$0xff] }
 0x5c8   : > { %v3710_v24 = vsel %vm1778_vm3, %v3678_v18, %v8847_v42  ;;  %v2646_v53 = vld [vmem:[#allocation3 + $0x152] sm:$0xff]  ;;  %v8849_v18 = vld [vmem:[#allocation166_spill] sm:$0xff] }
 0x5c9   : > { %3500 = vrot.lane.b32.xlu2 %v2613_v54, %s4549_s13  ;;  %3340 = vrot.lane.b32.xlu1 %v2565_v59, %s4548_s12  ;;  %v3742_v31 = vsel %vm1811_vm4, %v3710_v24, %v7096_v56  ;;  %v8848_v54 = vld [vmem:[#allocation40_spill] sm:$0xff] }
 0x5ca   : > { %v3774_v16 = vsel %vm1844_vm6, %v3742_v31, %v7258_v12 }
 0x5cb   : > { %v3457_v0 = vpop.permute.xlu2 %3456  ;;  %v3327_v21 = vpop.permute.xlu1 %3326  ;;  %v3806_v30 = vsel %vm1877_vm5, %v3774_v16, %v7434_v25  ;;  %v2598_v16 = vld [vmem:[#allocation3 + $0x91] sm:$0xff] }
 0x5cc   : > { %3628 = vrot.lane.b32.xlu0 %v2645_v61, %s4550_s14  ;;  %v3838_v19 = vsel %vm1910_vm7, %v3806_v30, %v3327_v21 }
 0x5cd   : > { %v3870_v57 = vsel %vm1943_vm9, %v3838_v19, %v3455_v3  ;;  %v3679_v3 = vsel %vm279_vm0, %v2366_v17, %v8848_v54  ;;  %v2567_v19 = vld [vmem:[#allocation3 + $0x98] sm:$0xff] }
 0x5ce   : > { %v3615_v43 = vpop.permute.xlu0 %3614  ;;  %v3711_v35 = vsel %vm1778_vm3, %v3679_v3, %v8849_v18  ;;  %v8851_v17 = vld [vmem:[#allocation125_spill] sm:$0xff]  ;;  %v2584_v18 = vld [vmem:[#allocation3 + $0x168] sm:$0xff] }
 0x5cf   : > { %v3918_v39 = vsel %vm1976_vm8, %v3886_v29, %v3615_v43  ;;  %v3743_v21 = vsel %vm1811_vm4, %v3711_v35, %v7138_v37  ;;  %v2630_v43 = vld [vmem:[#allocation3 + $0x92] sm:$0xff] }
 0x5d0   : > { %4432 = vmatmul.msk.f32.vlgmr.msra.gmra.mxu3 %vm2018_vm10, %v3918_v39  ;;  %v3775_v61 = vsel %vm1844_vm6, %v3743_v21, %v7232_v63  ;;  %v2583_v29 = vld [vmem:[#allocation3 + $0x158] sm:$0xff]  ;;  %v2616_v21 = vld [vmem:[#allocation3 + $0x169] sm:$0xff] }
 0x5d1   : > { %3468 = vrot.lane.b32.xlu2 %v2597_v27, %s4549_s13  ;;  %3596 = vrot.lane.b32.xlu1 %v2629_v14, %s4550_s14  ;;  %v3807_v42 = vsel %vm1877_vm5, %v3775_v61, %v7430_v10  ;;  %v2615_v39 = vld [vmem:[#allocation3 + $0x159] sm:$0xff]  ;;  %v3824_v27 = vsel %vm1877_vm5, %v7349_v20, %v7577_v38  ;;  %v2568_v61 = vld [vmem:[#allocation3 + $0xa8] sm:$0xff] }
 0x5d2   : > { %v4521_v14 = vld [vmem:[#allocation3 + $0x18] sm:$0xff] }
 0x5d3   : > { %v3491_v56 = vpop.permute.xlu2 %3490  ;;  %v3583_v12 = vpop.permute.xlu1 %3582 }
 0x5d4   : > { %3374 = vrot.lane.b32.xlu0 %v2582_v49, %s4548_s12  ;;  %v3902_v25 = vsel %vm1976_vm8, %v3870_v57, %v3583_v12  ;;  %v8850_v12 = vld [vmem:[#allocation35_spill] sm:$0xff] }
 0x5d5   : > { %4416 = vmatmul.msk.f32.vlgmr.msra.gmra.mxu1 %vm2018_vm10, %v3902_v25 }
 0x5d6   : > { %v3361_v55 = vpop.permute.xlu0 %3360 }
 0x5d7   : > { %v3855_v59 = vsel %vm1910_vm7, %v3823_v7, %v3361_v55  ;;  %v2647_v55 = vld [vmem:[#allocation3 + $0x15a] sm:$0xff] }
 0x5d8   : > { %v3887_v2 = vsel %vm1943_vm9, %v3855_v59, %v3489_v40 }
 0x5d9   : > { %3502 = vrot.lane.b32.xlu2 %v2614_v41, %s4549_s13  ;;  %3342 = vrot.lane.b32.xlu1 %v2566_v8, %s4548_s12 }
 0x5db   : > { %v3459_v1 = vpop.permute.xlu2 %3458  ;;  %v3329_v28 = vpop.permute.xlu1 %3328 }
 0x5dc   : > { %3630 = vrot.lane.b32.xlu0 %v2646_v53, %s4550_s14  ;;  %v3839_v31 = vsel %vm1910_vm7, %v3807_v42, %v3329_v28  ;;  %v2599_v28 = vld [vmem:[#allocation3 + $0x99] sm:$0xff] }
 0x5dd   : > { %v3871_v40 = vsel %vm1943_vm9, %v3839_v31, %v3457_v0  ;;  %v3680_v0 = vsel %vm279_vm0, %v4521_v14, %v8850_v12  ;;  %v2631_v53 = vld [vmem:[#allocation3 + $0x9a] sm:$0xff]  ;;  %v2632_v14 = vld [vmem:[#allocation3 + $0xaa] sm:$0xff] }
 0x5de   : > { %v3617_v34 = vpop.permute.xlu0 %3616  ;;  %v3712_v41 = vsel %vm1778_vm3, %v3680_v0, %v8851_v17  ;;  %v2585_v12 = vld [vmem:[#allocation3 + $0x170] sm:$0xff]  ;;  %v8854_v17 = vld [vmem:[#allocation81_spill] sm:$0xff] }
 0x5df   : > { %v3919_v24 = vsel %vm1976_vm8, %v3887_v2, %v3617_v34  ;;  %v3744_v8 = vsel %vm1811_vm4, %v3712_v41, %v7134_v11  ;;  %v4522_v34 = vld [vmem:[#allocation3 + $0x20] sm:$0xff] }
 0x5e0   : > { %4433 = vmatmul.msk.f32.gmra.mxu3 %vm2018_vm10, %v3919_v24  ;;  %v3776_v20 = vsel %vm1844_vm6, %v3744_v8, %v7274_v36  ;;  %v8852_v2 = vld [vmem:[#allocation42_spill] sm:$0xff] }
 0x5e1   : > { %3470 = vrot.lane.b32.xlu2 %v2598_v16, %s4549_s13  ;;  %3598 = vrot.lane.b32.xlu1 %v2630_v43, %s4550_s14  ;;  %v3808_v54 = vsel %vm1877_vm5, %v3776_v20, %v7390_v9  ;;  %v3681_v42 = vsel %vm279_vm0, %v4522_v34, %v8852_v2  ;;  %v2648_v16 = vld [vmem:[#allocation3 + $0x16a] sm:$0xff]  ;;  %v4524_v34 = vld [vmem:[#allocation3 + $0x38] sm:$0xff] }
 0x5e2   : > { %v8853_v43 = vld [vmem:[#allocation123_spill] sm:$0xff]  ;;  %v8856_v2 = vld [vmem:[#allocation56_spill] sm:$0xff] }
 0x5e3   : > { %v3493_v37 = vpop.permute.xlu2 %3492  ;;  %v3585_v63 = vpop.permute.xlu1 %3584 }
 0x5e4   : > { %3376 = vrot.lane.b32.xlu0 %v2583_v29, %s4548_s12  ;;  %v3903_v10 = vsel %vm1976_vm8, %v3871_v40, %v3585_v63  ;;  %v3713_v63 = vsel %vm1778_vm3, %v3681_v42, %v8853_v43  ;;  %v3683_v42 = vsel %vm279_vm0, %v4524_v34, %v8856_v2 }
 0x5e5   : > { %4417 = vmatmul.msk.f32.gmra.mxu1 %vm2018_vm10, %v3903_v10  ;;  %v3745_v29 = vsel %vm1811_vm4, %v3713_v63, %v7108_v48 }
 0x5e6   : > { %v3363_v30 = vpop.permute.xlu0 %3362  ;;  %v3777_v40 = vsel %vm1844_vm6, %v3745_v29, %v7270_v32 }
 0x5e7   : > { %v3856_v49 = vsel %vm1910_vm7, %v3824_v27, %v3363_v30  ;;  %v2600_v27 = vld [vmem:[#allocation3 + $0xa9] sm:$0xff] }
 0x5e8   : > { %v3888_v7 = vsel %vm1943_vm9, %v3856_v49, %v3491_v56  ;;  %v2617_v49 = vld [vmem:[#allocation3 + $0x171] sm:$0xff] }
 0x5e9   : > { %3504 = vrot.lane.b32.xlu2 %v2615_v39, %s4549_s13  ;;  %3344 = vrot.lane.b32.xlu1 %v2567_v19, %s4548_s12 }
 0x5eb   : > { %v3461_v57 = vpop.permute.xlu2 %3460  ;;  %v3331_v25 = vpop.permute.xlu1 %3330 }
 0x5ec   : > { %3632 = vrot.lane.b32.xlu0 %v2647_v55, %s4550_s14  ;;  %v3840_v59 = vsel %vm1910_vm7, %v3808_v54, %v3331_v25  ;;  %v2569_v25 = vld [vmem:[#allocation3 + $0xb0] sm:$0xff] }
 0x5ed   : > { %v3872_v56 = vsel %vm1943_vm9, %v3840_v59, %v3459_v1  ;;  %v4523_v55 = vld [vmem:[#allocation3 + $0x30] sm:$0xff] }
 0x5ee   : > { %v3619_v38 = vpop.permute.xlu0 %3618  ;;  %v3682_v41 = vsel %vm279_vm0, %v4523_v55, %v8854_v17  ;;  %v2634_v17 = vld [vmem:[#allocation3 + $0xc2] sm:$0xff] }
 0x5ef   : > { %v3920_v3 = vsel %vm1976_vm8, %v3888_v7, %v3619_v38  ;;  %v2649_v38 = vld [vmem:[#allocation3 + $0x172] sm:$0xff] }
 0x5f0   : > { %4434 = vmatmul.msk.f32.gmra.mxu3 %vm2018_vm10, %v3920_v3  ;;  %v8855_v7 = vld [vmem:[#allocation97_spill] sm:$0xff] }
 0x5f1   : > { %3472 = vrot.lane.b32.xlu2 %v2599_v28, %s4549_s13  ;;  %3600 = vrot.lane.b32.xlu1 %v2631_v53, %s4550_s14  ;;  %v3714_v54 = vsel %vm1778_vm3, %v3682_v41, %v8855_v7  ;;  %v8861_v41 = vld [vmem:[#allocation163_spill] sm:$0xff] }
 0x5f2   : > { %v3746_v3 = vsel %vm1811_vm4, %v3714_v54, %v7150_v51 }
 0x5f3   : > { %v3495_v11 = vpop.permute.xlu2 %3494  ;;  %v3587_v36 = vpop.permute.xlu1 %3586  ;;  %v3778_v59 = vsel %vm1844_vm6, %v3746_v3, %v7244_v62  ;;  %v2601_v62 = vld [vmem:[#allocation3 + $0xb1] sm:$0xff] }
 0x5f4   : > { %3378 = vrot.lane.b32.xlu0 %v2584_v18, %s4548_s12  ;;  %v3904_v9 = vsel %vm1976_vm8, %v3872_v56, %v3587_v36  ;;  %v2586_v56 = vld [vmem:[#allocation3 + $0x180] sm:$0xff] }
 0x5f5   : > { %4418 = vmatmul.msk.f32.gmra.mxu1 %vm2018_vm10, %v3904_v9 }
 0x5f6   : > { %v3365_v35 = vpop.permute.xlu0 %3364 }
 0x5f7   : > { %v3857_v1 = vsel %vm1910_vm7, %v7571_v22, %v3365_v35  ;;  %v3809_v22 = vsel %vm1877_vm5, %v3777_v40, %v7444_v26 }
 0x5f8   : > { %v3889_v30 = vsel %vm1943_vm9, %v3857_v1, %v3493_v37 }
 0x5f9   : > { %3506 = vrot.lane.b32.xlu2 %v2616_v21, %s4549_s13  ;;  %3346 = vrot.lane.b32.xlu1 %v2568_v61, %s4548_s12  ;;  %v2633_v21 = vld [vmem:[#allocation3 + $0xb2] sm:$0xff]  ;;  %v2650_v61 = vld [vmem:[#allocation3 + $0x182] sm:$0xff] }
 0x5fb   : > { %v3463_v24 = vpop.permute.xlu2 %3462  ;;  %v3333_v31 = vpop.permute.xlu1 %3332 }
 0x5fc   : > { %3634 = vrot.lane.b32.xlu0 %v2648_v16, %s4550_s14  ;;  %v3841_v19 = vsel %vm1910_vm7, %v3809_v22, %v3333_v31 }
 0x5fd   : > { %v3873_v37 = vsel %vm1943_vm9, %v3841_v19, %v3461_v57  ;;  %v2570_v19 = vld [vmem:[#allocation3 + $0xc0] sm:$0xff] }
 0x5fe   : > { %v3621_v10 = vpop.permute.xlu0 %3620 }
 0x5ff   : > { %v3921_v39 = vsel %vm1976_vm8, %v3889_v30, %v3621_v10  ;;  %v8858_v30 = vld [vmem:[#allocation179_spill] sm:$0xff] }
 0x600   : > { %4435 = vmatmul.msk.f32.gmra.mxu3 %vm2018_vm10, %v3921_v39 }
 0x601   : > { %3474 = vrot.lane.b32.xlu2 %v2600_v27, %s4549_s13  ;;  %3602 = vrot.lane.b32.xlu1 %v2632_v14, %s4550_s14 }
 0x603   : > { %v3497_v48 = vpop.permute.xlu2 %3496  ;;  %v3589_v32 = vpop.permute.xlu1 %3588 }
 0x604   : > { %3380 = vrot.lane.b32.xlu0 %v2585_v12, %s4548_s12  ;;  %v3905_v26 = vsel %vm1976_vm8, %v3873_v37, %v3589_v32  ;;  %v2587_v32 = vld [vmem:[#allocation3 + $0x188] sm:$0xff] }
 0x605   : > { %4419 = vmatmul.msk.f32.gmra.mxu1 %vm2018_vm10, %v3905_v26  ;;  %v8859_v12 = vld [vmem:[#allocation191_spill] sm:$0xff]  ;;  %v8860_v26 = vld [vmem:[#allocation34_spill] sm:$0xff] }
 0x606   : > { %v3367_v0 = vpop.permute.xlu0 %3366  ;;  %v4525_v37 = vld [vmem:[#allocation3 + $0x48] sm:$0xff] }
 0x607   : > { %v3858_v57 = vsel %vm1910_vm7, %v7497_v13, %v3367_v0  ;;  %v3810_v13 = vsel %vm1877_vm5, %v3778_v59, %v7440_v46  ;;  %v3684_v0 = vsel %vm279_vm0, %v4525_v37, %v8860_v26  ;;  %v8864_v59 = vld [vmem:[#allocation130_spill] sm:$0xff] }
 0x608   : > { %v3890_v53 = vsel %vm1943_vm9, %v3858_v57, %v3495_v11  ;;  %v3716_v57 = vsel %vm1778_vm3, %v3684_v0, %v8861_v41  ;;  %v2604_v0 = vld [vmem:[#allocation3 + $0xd9] sm:$0xff] }
 0x609   : > { %3508 = vrot.lane.b32.xlu2 %v2617_v49, %s4549_s13  ;;  %3348 = vrot.lane.b32.xlu1 %v2569_v25, %s4548_s12 }
 0x60b   : > { %v3465_v8 = vpop.permute.xlu2 %3464  ;;  %v3335_v20 = vpop.permute.xlu1 %3334 }
 0x60c   : > { %3636 = vrot.lane.b32.xlu0 %v2649_v38, %s4550_s14  ;;  %v3842_v18 = vsel %vm1910_vm7, %v3810_v13, %v3335_v20  ;;  %v2651_v13 = vld [vmem:[#allocation3 + $0x18a] sm:$0xff] }
 0x60d   : > { %v3874_v35 = vsel %vm1943_vm9, %v3842_v18, %v3463_v24 }
 0x60e   : > { %v3623_v28 = vpop.permute.xlu0 %3622 }
 0x60f   : > { %v3922_v36 = vsel %vm1976_vm8, %v3890_v53, %v3623_v28 }
 0x610   : > { %4436 = vmatmul.msk.f32.gmra.mxu3 %vm2018_vm10, %v3922_v36 }
 0x611   : > { %3254 = vrot.lane.b32.xlu2 %v2648_v16, %s4547_s11  ;;  %3382 = vrot.lane.b32.xlu1 %v2586_v56, %s4548_s12  ;;  %v8857_v16 = vld [vmem:[#allocation60_spill] sm:$0xff]  ;;  %v2571_v56 = vld [vmem:[#allocation3 + $0xc8] sm:$0xff] }
 0x612   : > { %v3715_v43 = vsel %vm1778_vm3, %v3683_v42, %v8857_v16  ;;  %v8867_v16 = vld [vmem:[#allocation156_spill] sm:$0xff] }
 0x613   : > { %v3499_v51 = vpop.permute.xlu2 %3498  ;;  %v3591_v9 = vpop.permute.xlu1 %3590  ;;  %v3747_v63 = vsel %vm1811_vm4, %v3715_v43, %v7146_v5 }
 0x614   : > { %3476 = vrot.lane.b32.xlu0 %v2601_v62, %s4549_s13  ;;  %v3906_v46 = vsel %vm1976_vm8, %v3874_v35, %v3591_v9  ;;  %v3779_v29 = vsel %vm1844_vm6, %v3747_v63, %v7286_v58  ;;  %v2603_v35 = vld [vmem:[#allocation3 + $0xc9] sm:$0xff] }
 0x615   : > { %4420 = vmatmul.msk.f32.gmra.mxu1 %vm2018_vm10, %v3906_v46  ;;  %v2635_v46 = vld [vmem:[#allocation3 + $0xca] sm:$0xff] }
 0x616   : > { %v3369_v11 = vpop.permute.xlu0 %3368  ;;  %v8868_v63 = vld [vmem:[#allocation51_spill] sm:$0xff] }
 0x617   : > { %v3859_v1 = vsel %vm1910_vm7, %v7608_v23, %v3369_v11  ;;  %v3811_v23 = vsel %vm1877_vm5, %v3779_v29, %v8858_v30  ;;  %v2588_v11 = vld [vmem:[#allocation3 + $0x198] sm:$0xff] }
 0x618   : > { %v3891_v10 = vsel %vm1943_vm9, %v3859_v1, %v3497_v48  ;;  %v2620_v30 = vld [vmem:[#allocation3 + $0x199] sm:$0xff] }
 0x619   : > { %3604 = vrot.lane.b32.xlu2 %v2633_v21, %s4550_s14  ;;  %3638 = vrot.lane.b32.xlu1 %v2650_v61, %s4550_s14  ;;  %v4526_v21 = vld [vmem:[#allocation3 + $0x50] sm:$0xff] }
 0x61b   : > { %v3467_v24 = vpop.permute.xlu2 %3466  ;;  %v3337_v31 = vpop.permute.xlu1 %3336 }
 0x61c   : > { %3510 = vrot.lane.b32.xlu0 %v7200_v50, %s4549_s13  ;;  %v3843_v39 = vsel %vm1910_vm7, %v3811_v23, %v3337_v31  ;;  %v2602_v50 = vld [vmem:[#allocation3 + $0xc1] sm:$0xff] }
 0x61d   : > { %v3875_v27 = vsel %vm1943_vm9, %v3843_v39, %v3465_v8  ;;  %v8862_v8 = vld [vmem:[#allocation128_spill] sm:$0xff]  ;;  %v8869_v23 = vld [vmem:[#allocation106_spill] sm:$0xff] }
 0x61e   : > { %v3625_v40 = vpop.permute.xlu0 %3624  ;;  %v3748_v20 = vsel %vm1811_vm4, %v3716_v57, %v8862_v8  ;;  %v8872_v57 = vld [vmem:[#allocation83_spill] sm:$0xff] }
 0x61f   : > { %v3923_v22 = vsel %vm1976_vm8, %v3891_v10, %v3625_v40 }
 0x620   : > { %4437 = vmatmul.msk.f32.gmra.mxu3 %vm2018_vm10, %v3923_v22 }
 0x621   : > { %3350 = vrot.lane.b32.xlu2 %v2570_v19, %s4548_s12  ;;  %3478 = vrot.lane.b32.xlu1 %v2602_v50, %s4549_s13  ;;  %v2572_v19 = vld [vmem:[#allocation3 + $0xd8] sm:$0xff] }
 0x622   : > { %v2652_v50 = vld [vmem:[#allocation3 + $0x19a] sm:$0xff] }
 0x623   : > { %v3501_v5 = vpop.permute.xlu2 %3500  ;;  %v3593_v58 = vpop.permute.xlu1 %3592 }
 0x624   : > { %3256 = vrot.lane.b32.xlu0 %v2649_v38, %s4547_s11  ;;  %v3907_v14 = vsel %vm1976_vm8, %v3875_v27, %v3593_v58  ;;  %v8863_v38 = vld [vmem:[#allocation124_spill] sm:$0xff] }
 0x625   : > { %4421 = vmatmul.msk.f32.gmra.mxu1 %vm2018_vm10, %v3907_v14  ;;  %v3780_v7 = vsel %vm1844_vm6, %v3748_v20, %v8863_v38 }
 0x626   : > { %v3371_v48 = vpop.permute.xlu0 %3370 }
 0x627   : > { %v3860_v49 = vsel %vm1910_vm7, %v7599_v4, %v3371_v48  ;;  %v3812_v4 = vsel %vm1877_vm5, %v3780_v7, %v8864_v59  ;;  %v8873_v7 = vld [vmem:[#allocation53_spill] sm:$0xff]  ;;  %v7882_v59 = vld [vmem:[%s8206_s5] ss:$0 sm:$0xff] }
 0x628   : > { %v3892_v3 = vsel %vm1943_vm9, %v3860_v49, %v3499_v51  ;;  %v4527_v49 = vld [vmem:[#allocation3 + $0x60] sm:$0xff] }
 0x629   : > { %3384 = vrot.lane.b32.xlu2 %v2587_v32, %s4548_s12  ;;  %3512 = vrot.lane.b32.xlu1 %v8859_v12, %s4549_s13  ;;  %v2589_v32 = vld [vmem:[#allocation3 + $0x1a0] sm:$0xff] }
 0x62b   : > { %v3469_v25 = vpop.permute.xlu2 %3468  ;;  %v3339_v55 = vpop.permute.xlu1 %3338 }
 0x62c   : > { %3606 = vrot.lane.b32.xlu0 %v2634_v17, %s4550_s14  ;;  %v3844_v53 = vsel %vm1910_vm7, %v3812_v4, %v3339_v55  ;;  %v8871_v17 = vld [vmem:[#allocation167_spill] sm:$0xff]  ;;  %v8874_v4 = vld [vmem:[#allocation41_spill] sm:$0xff] }
 0x62d   : > { %v3876_v9 = vsel %vm1943_vm9, %v3844_v53, %v3467_v24  ;;  %v8866_v24 = vld [vmem:[#allocation98_spill] sm:$0xff] }
 0x62e   : > { %v3627_v54 = vpop.permute.xlu0 %3626  ;;  %v2636_v53 = vld [vmem:[#allocation3 + $0xda] sm:$0xff] }
 0x62f   : > { %v3924_v28 = vsel %vm1976_vm8, %v3892_v3, %v3627_v54 }
 0x630   : > { %4438 = vmatmul.msk.f32.gmra.mxu3 %vm2018_vm10, %v3924_v28 }
 0x631   : > { %3640 = vrot.lane.b32.xlu2 %v2651_v13, %s4550_s14  ;;  %3258 = vrot.lane.b32.xlu1 %v2650_v61, %s4547_s11  ;;  %v8865_v61 = vld [vmem:[#allocation85_spill] sm:$0xff] }
 0x632   : > { %v3685_v34 = vsel %vm279_vm0, %v4526_v21, %v8865_v61 }
 0x633   : > { %v3503_v36 = vpop.permute.xlu2 %3502  ;;  %v3595_v18 = vpop.permute.xlu1 %3594  ;;  %v3717_v31 = vsel %vm1778_vm3, %v3685_v34, %v8866_v24 }
 0x634   : > { %3352 = vrot.lane.b32.xlu0 %v2571_v56, %s4548_s12  ;;  %v3908_v51 = vsel %vm1976_vm8, %v3876_v9, %v3595_v18  ;;  %v3749_v43 = vsel %vm1811_vm4, %v3717_v31, %v8867_v16  ;;  %v2621_v18 = vld [vmem:[#allocation3 + $0x1a1] sm:$0xff]  ;;  %v8876_v31 = vld [vmem:[#allocation20_spill] sm:$0xff] }
 0x635   : > { %4422 = vmatmul.msk.f32.gmra.mxu1 %vm2018_vm10, %v3908_v51  ;;  %v3781_v29 = vsel %vm1844_vm6, %v3749_v43, %v8868_v63  ;;  %v2573_v16 = vld [vmem:[#allocation3 + $0xe0] sm:$0xff] }
 0x636   : > { %v3373_v62 = vpop.permute.xlu0 %3372  ;;  %v2637_v43 = vld [vmem:[#allocation3 + $0xe2] sm:$0xff] }
 0x637   : > { %v3861_v2 = vsel %vm1910_vm7, %v7528_v6, %v3373_v62  ;;  %v3813_v6 = vsel %vm1877_vm5, %v3781_v29, %v8869_v23  ;;  %v4528_v23 = vld [vmem:[#allocation3 + $0x68] sm:$0xff] }
 0x638   : > { %v3893_v10 = vsel %vm1943_vm9, %v3861_v2, %v3501_v5 }
 0x639   : > { %3480 = vrot.lane.b32.xlu2 %v2603_v35, %s4549_s13  ;;  %3608 = vrot.lane.b32.xlu1 %v2635_v46, %s4550_s14 }
 0x63b   : > { %v3471_v42 = vpop.permute.xlu2 %3470  ;;  %v3341_v1 = vpop.permute.xlu1 %3340 }
 0x63c   : > { %3386 = vrot.lane.b32.xlu0 %v2588_v11, %s4548_s12  ;;  %v3845_v39 = vsel %vm1910_vm7, %v3813_v6, %v3341_v1  ;;  %v8875_v1 = vld [vmem:[#allocation5_spill] sm:$0xff]  ;;  %v8877_v6 = vld [vmem:[#allocation91_spill] sm:$0xff] }
 0x63d   : > { %v3877_v5 = vsel %vm1943_vm9, %v3845_v39, %v3469_v25  ;;  %v8870_v25 = vld [vmem:[#allocation44_spill] sm:$0xff] }
 0x63e   : > { %v3629_v40 = vpop.permute.xlu0 %3628  ;;  %v3686_v55 = vsel %vm279_vm0, %v4527_v49, %v8870_v25 }
 0x63f   : > { %v3925_v22 = vsel %vm1976_vm8, %v3893_v10, %v3629_v40  ;;  %v3718_v41 = vsel %vm1778_vm3, %v3686_v55, %v8871_v17 }
 0x640   : > { %4439 = vmatmul.msk.f32.gmra.mxu3 %vm2018_vm10, %v3925_v22  ;;  %v3750_v8 = vsel %vm1811_vm4, %v3718_v41, %v8872_v57  ;;  %v3687_v22 = vsel %vm279_vm0, %v4528_v23, %v8877_v6 }
 0x641   : > { %3514 = vrot.lane.b32.xlu2 %v2620_v30, %s4549_s13  ;;  %3354 = vrot.lane.b32.xlu1 %v2572_v19, %s4548_s12  ;;  %v3782_v54 = vsel %vm1844_vm6, %v3750_v8, %v8873_v7  ;;  %v2605_v30 = vld [vmem:[#allocation3 + $0xe1] sm:$0xff]  ;;  %v8878_v19 = vld [vmem:[#allocation100_spill] sm:$0xff] }
 0x642   : > { %v3814_v28 = vsel %vm1877_vm5, %v3782_v54, %v8874_v4  ;;  %v8882_v54 = vld [vmem:[#allocation7_spill] sm:$0xff]  ;;  %v8883_v4 = vld [vmem:[#allocation22_spill] sm:$0xff] }
 0x643   : > { %v7856_v58 = vpop.permute.xlu2 %3504  ;;  %v3597_v27 = vpop.permute.xlu1 %3596 }
 0x644   : > { %3642 = vrot.lane.b32.xlu0 %v2652_v50, %s4550_s14  ;;  %v3909_v14 = vsel %vm1976_vm8, %v3877_v5, %v3597_v27  ;;  %v3719_v50 = vsel %vm1778_vm3, %v3687_v22, %v8878_v19  ;;  %v8879_v27 = vld [vmem:[#allocation148_spill] sm:$0xff] }
 0x645   : > { %4423 = vmatmul.msk.f32.gmra.mxu1 %vm2018_vm10, %v3909_v14  ;;  %v3751_v5 = vsel %vm1811_vm4, %v3719_v50, %v8879_v27  ;;  %v8889_v19 = vld [vmem:[#allocation4_spill] sm:$0xff]  ;;  %v8890_v27 = vld [vmem:[#allocation21_spill] sm:$0xff] }
 0x646   : > { %v3375_v48 = vpop.permute.xlu0 %3374 }
 0x647   : > { %v3862_v12 = vsel %vm1910_vm7, %v7635_v44, %v3375_v48  ;;  %v2653_v44 = vld [vmem:[#allocation3 + $0x1a2] sm:$0xff]  ;;  %v8880_v48 = vld [vmem:[#allocation137_spill] sm:$0xff] }
 0x648   : > { %v3894_v38 = vsel %vm1943_vm9, %v3862_v12, %v3503_v36  ;;  %v7893_v36 = vld [vmem:[%s8207_s6] ss:$0 sm:$0xff] }
 0x649   : > { %3260 = vrot.lane.b32.xlu2 %v2651_v13, %s4547_s11  ;;  %3388 = vrot.lane.b32.xlu1 %v2589_v32, %s4548_s12  ;;  %v3783_v32 = vsel %vm1844_vm6, %v3751_v5, %v8880_v48 }
 0x64b   : > { %v7866_v37 = vpop.permute.xlu2 %3472  ;;  %v3343_v26 = vpop.permute.xlu1 %3342 }
 0x64c   : > { %3482 = vrot.lane.b32.xlu0 %v2604_v0, %s4549_s13  ;;  %v3846_v13 = vsel %vm1910_vm7, %v3814_v28, %v3343_v26  ;;  %v8881_v26 = vld [vmem:[#allocation144_spill] sm:$0xff] }
 0x64d   : > { %v3878_v11 = vsel %vm1943_vm9, %v3846_v13, %v3471_v42  ;;  %v3815_v0 = vsel %vm1877_vm5, %v3783_v32, %v8881_v26 }
 0x64e   : > { %v3631_v20 = vpop.permute.xlu0 %3630 }
 0x64f   : > { %v3926_v3 = vsel %vm1976_vm8, %v3894_v38, %v3631_v20 }
 0x650   : > { %4440 = vmatmul.msk.f32.gmra.mxu3 %vm2018_vm10, %v3926_v3 }
 0x651   : > { %3610 = vrot.lane.b32.xlu2 %v2636_v53, %s4550_s14  ;;  %3644 = vrot.lane.b32.xlu1 %v2653_v44, %s4550_s14 }
 0x652   : > { %v4056_v56 = vpop.f32.mrf.mxu1 }
 0x653   : > { %v4156_v9 = vmul.f32 %v7882_v59, %v4056_v56  ;;  %v4104_v51 = vpop.f32.mrf.mxu3  ;;  %v7896_v62 = vpop.permute.xlu2 %3506  ;;  %v8884_v56 = vld [vmem:[#allocation69_spill] sm:$0xff] }
 0x654   : > { %v4172_v35 = vmul.f32 %v7882_v59, %v4104_v51  ;;  %v3599_v46 = vpop.permute.xlu1 %3598  ;;  %3516 = vrot.lane.b32.xlu0 %v2621_v18, %s4549_s13  ;;  %v4529_v18 = vld [vmem:[#allocation3 + $0x78] sm:$0xff] }
 0x655   : > { %v4192_v21 = vadd.f32 %v7893_v36, %v4156_v9  ;;  %v3910_v61 = vsel %vm1976_vm8, %v3878_v11, %v3599_v46  ;;  %v3688_v9 = vsel %vm279_vm0, %v4529_v18, %v8884_v56  ;;  %v8886_v11 = vld [vmem:[#allocation170_spill] sm:$0xff] }
 0x656   : > { %v4208_v34 = vadd.f32 %v7893_v36, %v4172_v35  ;;  %4424 = vmatmul.msk.f32.gmra.mxu1 %vm2018_vm10, %v3910_v61  ;;  %v3377_v2 = vpop.permute.xlu0 %3376  ;;  %v8885_v35 = vld [vmem:[#allocation38_spill] sm:$0xff] }
 0x657   : > { %v4224_v24 = vadd.f32 %v4192_v21, %v8875_v1  ;;  %v3863_v40 = vsel %vm1910_vm7, %v7627_v47, %v3377_v2  ;;  %v3720_v46 = vsel %vm1778_vm3, %v3688_v9, %v8885_v35  ;;  %v8887_v2 = vld [vmem:[#allocation117_spill] sm:$0xff]  ;;  %v8896_v56 = vld [vmem:[#allocation6_spill] sm:$0xff]  ;;  %v8897_v35 = vld [vmem:[#allocation23_spill] sm:$0xff] }
 0x658   : > { %v4240_v42 = vadd.f32 %v4208_v34, %v8876_v31  ;;  %v3895_v47 = vsel %vm1943_vm9, %v3863_v40, %v7856_v58  ;;  %v3752_v21 = vsel %vm1811_vm4, %v3720_v46, %v8886_v11  ;;  %v8888_v31 = vld [vmem:[#allocation138_spill] sm:$0xff] }
 0x659   : > { %v4256_v63 = vmax.f32 %v4224_v24, 0.0  ;;  %3356 = vrot.lane.b32.xlu2 %v2573_v16, %s4548_s12  ;;  %3612 = vrot.lane.b32.xlu1 %v2637_v43, %s4550_s14 }
 0x65a   : > { %v4272_v29 = vmax.f32 %v4240_v42, 0.0 }
 0x65b   : > { %4288 = vst.msk [vmem:[%s7911_s16] sm:$0xff] %vm279_vm0, %v4256_v63  ;;  %v3475_v10 = vpop.permute.xlu2 %3474 }
 0x65c   : > { %4304 = vst.msk [vmem:[%s7911_s16 + $0x80] sm:$0xff] %vm279_vm0, %v4272_v29  ;;  %v3345_v39 = vpop.permute.xlu1 %3344  ;;  %3484 = vrot.lane.b32.xlu0 %v2605_v30, %s4549_s13 }
 0x65d   : > { %v3847_v49 = vsel %vm1910_vm7, %v3815_v0, %v3345_v39 }
 0x65e   : > { %v3633_v14 = vpop.permute.xlu0 %3632  ;;  %v3879_v57 = vsel %vm1943_vm9, %v3847_v49, %v7866_v37  ;;  %v4530_v49 = vld [vmem:[#allocation3 + $0x80] sm:$0xff] }
 0x65f   : > { %v3927_v12 = vsel %vm1976_vm8, %v3895_v47, %v3633_v14 }
 0x660   : > { %4441 = vmatmul.msk.f32.gmra.mxu3 %vm2018_vm10, %v3927_v12 }
 0x662   : > { %v4059_v25 = vpop.f32.mrf.mxu1 }
 0x663   : > { %v4157_v55 = vmul.f32 %v7882_v59, %v4059_v25  ;;  %v4107_v17 = vpop.f32.mrf.mxu3  ;;  %v3509_v20 = vpop.permute.xlu2 %3508  ;;  %v8891_v25 = vld [vmem:[#allocation45_spill] sm:$0xff] }
 0x664   : > { %v4173_v41 = vmul.f32 %v7882_v59, %v4107_v17  ;;  %v3601_v58 = vpop.permute.xlu1 %3600  ;;  %v8892_v17 = vld [vmem:[#allocation115_spill] sm:$0xff] }
 0x665   : > { %v4193_v8 = vadd.f32 %v7893_v36, %v4157_v55  ;;  %v3911_v38 = vsel %vm1976_vm8, %v3879_v57, %v3601_v58  ;;  %v3689_v55 = vsel %vm279_vm0, %v4530_v49, %v8891_v25  ;;  %v8893_v57 = vld [vmem:[#allocation169_spill] sm:$0xff] }
 0x666   : > { %v4209_v44 = vadd.f32 %v7893_v36, %v4173_v41  ;;  %4425 = vmatmul.msk.f32.gmra.mxu1 %vm2018_vm10, %v3911_v38  ;;  %v3379_v7 = vpop.permute.xlu0 %3378  ;;  %v3721_v41 = vsel %vm1778_vm3, %v3689_v55, %v8892_v17  ;;  %v8904_v49 = vld [vmem:[#allocation25_spill] sm:$0xff]  ;;  %v8905_v55 = vld [vmem:[#allocation104_spill] sm:$0xff] }
 0x667   : > { %v4225_v3 = vadd.f32 %v4193_v8, %v8882_v54  ;;  %v3864_v37 = vsel %vm1910_vm7, %v7568_v33, %v3379_v7  ;;  %v3784_v33 = vsel %vm1844_vm6, %v3752_v21, %v8887_v2  ;;  %v4531_v21 = vld [vmem:[#allocation3 + $0x150] sm:$0xff] }
 0x668   : > { %v4241_v28 = vadd.f32 %v4209_v44, %v8883_v4  ;;  %v3896_v34 = vsel %vm1943_vm9, %v3864_v37, %v7896_v62  ;;  %v3816_v42 = vsel %vm1877_vm5, %v3784_v33, %v8888_v31  ;;  %v8895_v4 = vld [vmem:[#allocation66_spill] sm:$0xff]  ;;  %v8899_v33 = vld [vmem:[#allocation116_spill] sm:$0xff] }
 0x669   : > { %v4257_v53 = vmax.f32 %v4225_v3, 0.0 }
 0x66a   : > { %v4273_v13 = vmax.f32 %v4241_v28, 0.0 }
 0x66b   : > { %4289 = vst.msk [vmem:[%s7911_s16 + $0x8] sm:$0xff] %vm279_vm0, %v4257_v53  ;;  %v3255_v1 = vpop.permute.xlu2 %3254 }
 0x66c   : > { %4305 = vst.msk [vmem:[%s7911_s16 + $0x88] sm:$0xff] %vm279_vm0, %v4273_v13  ;;  %v3347_v51 = vpop.permute.xlu1 %3346 }
 0x66d   : > { %v3848_v16 = vsel %vm1910_vm7, %v3816_v42, %v3347_v51  ;;  %v8900_v42 = vld [vmem:[#allocation50_spill] sm:$0xff] }
 0x66e   : > { %v3635_v61 = vpop.permute.xlu0 %3634  ;;  %v3880_v30 = vsel %vm1943_vm9, %v3848_v16, %v3475_v10 }
 0x66f   : > { %v3928_v24 = vsel %vm1976_vm8, %v3896_v34, %v3635_v61  ;;  %v8898_v61 = vld [vmem:[#allocation184_spill] sm:$0xff] }
 0x670   : > { %4442 = vmatmul.msk.f32.gmra.mxu3 %vm2018_vm10, %v3928_v24  ;;  %v3706_v34 = vsel %vm279_vm0, %v4531_v21, %v8898_v61 }
 0x671   : > { %v3738_v24 = vsel %vm1778_vm3, %v3706_v34, %v8899_v33  ;;  %v8909_v34 = vld [vmem:[#allocation10_spill] sm:$0xff]  ;;  %v8910_v33 = vld [vmem:[#allocation24_spill] sm:$0xff] }
 0x672   : > { %v4062_v43 = vpop.f32.mrf.mxu1  ;;  %v3770_v16 = vsel %vm1811_vm4, %v3738_v24, %v8900_v42 }
 0x673   : > { %v4158_v63 = vmul.f32 %v7882_v59, %v4062_v43  ;;  %v4110_v29 = vpop.f32.mrf.mxu3  ;;  %v3605_v47 = vpop.permute.xlu2 %3604  ;;  %v8901_v43 = vld [vmem:[#allocation157_spill] sm:$0xff] }
 0x674   : > { %v4174_v62 = vmul.f32 %v7882_v59, %v4110_v29  ;;  %v3603_v40 = vpop.permute.xlu1 %3602 }
 0x675   : > { %v4194_v23 = vadd.f32 %v7893_v36, %v4158_v63  ;;  %v3912_v6 = vsel %vm1976_vm8, %v3880_v30, %v3603_v40  ;;  %v3802_v63 = vsel %vm1844_vm6, %v3770_v16, %v8901_v43 }
 0x676   : > { %v4210_v22 = vadd.f32 %v7893_v36, %v4174_v62  ;;  %4426 = vmatmul.msk.f32.gmra.mxu1 %vm2018_vm10, %v3912_v6  ;;  %v3381_v39 = vpop.permute.xlu0 %3380  ;;  %v3834_v62 = vsel %vm1877_vm5, %v3802_v63, %v3255_v1 }
 0x677   : > { %v4226_v50 = vadd.f32 %v4194_v23, %v8889_v19  ;;  %v3865_v10 = vsel %vm1910_vm7, %v7647_v15, %v3381_v39  ;;  %v3753_v15 = vsel %vm1811_vm4, %v3721_v41, %v8893_v57 }
 0x678   : > { %v4242_v5 = vadd.f32 %v4210_v22, %v8890_v27  ;;  %v3897_v26 = vsel %vm1943_vm9, %v3865_v10, %v3509_v20  ;;  %v8894_v20 = vld [vmem:[#allocation103_spill] sm:$0xff]  ;;  %v8902_v10 = vld [vmem:[#allocation8_spill] sm:$0xff] }
 0x679   : > { %v4258_v14 = vmax.f32 %v4226_v50, 0.0  ;;  %v3785_v7 = vsel %vm1844_vm6, %v3753_v15, %v8894_v20  ;;  %v8907_v15 = vld [vmem:[#allocation67_spill] sm:$0xff]  ;;  %v8908_v20 = vld [vmem:[#allocation149_spill] sm:$0xff] }
 0x67a   : > { %v4274_v48 = vmax.f32 %v4242_v5, 0.0  ;;  %v3817_v28 = vsel %vm1877_vm5, %v3785_v7, %v8895_v4 }
 0x67b   : > { %4290 = vst.msk [vmem:[%s7911_s16 + $0x10] sm:$0xff] %vm279_vm0, %v4258_v14  ;;  %v3351_v8 = vpop.permute.xlu2 %3350 }
 0x67c   : > { %4306 = vst.msk [vmem:[%s7911_s16 + $0x90] sm:$0xff] %vm279_vm0, %v4274_v48  ;;  %v3349_v32 = vpop.permute.xlu1 %3348 }
 0x67d   : > { %v3849_v13 = vsel %vm1910_vm7, %v3817_v28, %v3349_v32 }
 0x67e   : > { %v3637_v12 = vpop.permute.xlu0 %3636 }
 0x67f   : > { %v3929_v0 = vsel %vm1976_vm8, %v3897_v26, %v3637_v12  ;;  %v4532_v12 = vld [vmem:[#allocation3 + $0x90] sm:$0xff]  ;;  %v8903_v26 = vld [vmem:[#allocation74_spill] sm:$0xff] }
 0x680   : > { %4443 = vmatmul.msk.f32.gmra.mxu3 %vm2018_vm10, %v3929_v0  ;;  %v3690_v0 = vsel %vm279_vm0, %v4532_v12, %v8903_v26  ;;  %v8913_v12 = vld [vmem:[#allocation26_spill] sm:$0xff] }
 0x681   : > { %v3722_v17 = vsel %vm1778_vm3, %v3690_v0, %v8905_v55  ;;  %v8914_v55 = vld [vmem:[#allocation107_spill] sm:$0xff] }
 0x682   : > { %v4065_v58 = vpop.f32.mrf.mxu1 }
 0x683   : > { %v4159_v38 = vmul.f32 %v7882_v59, %v4065_v58  ;;  %v4113_v44 = vpop.f32.mrf.mxu3  ;;  %v3385_v40 = vpop.permute.xlu2 %3384  ;;  %v8906_v58 = vld [vmem:[#allocation193_spill] sm:$0xff] }
 0x684   : > { %v4175_v54 = vmul.f32 %v7882_v59, %v4113_v44  ;;  %v3383_v3 = vpop.permute.xlu1 %3382 }
 0x685   : > { %v4195_v53 = vadd.f32 %v7893_v36, %v4159_v38  ;;  %v3866_v30 = vsel %vm1910_vm7, %v3834_v62, %v3383_v3  ;;  %v3754_v38 = vsel %vm1811_vm4, %v3722_v17, %v8907_v15 }
 0x686   : > { %v4211_v37 = vadd.f32 %v7893_v36, %v4175_v54  ;;  %v3477_v18 = vpop.permute.xlu0 %3476  ;;  %v3786_v7 = vsel %vm1844_vm6, %v3754_v38, %v8908_v20  ;;  %v4533_v38 = vld [vmem:[#allocation3 + $0x170] sm:$0xff] }
 0x687   : > { %v4227_v9 = vadd.f32 %v4195_v53, %v8896_v56  ;;  %v3881_v51 = vsel %vm1943_vm9, %v3849_v13, %v3477_v18  ;;  %v3818_v54 = vsel %vm1877_vm5, %v3786_v7, %v7503_v45  ;;  %v8916_v7 = vld [vmem:[#allocation129_spill] sm:$0xff] }
 0x688   : > { %v4243_v46 = vadd.f32 %v4211_v37, %v8897_v35  ;;  %v3913_v11 = vsel %vm1976_vm8, %v3881_v51, %v3605_v47  ;;  %v3850_v28 = vsel %vm1910_vm7, %v3818_v54, %v3351_v8 }
 0x689   : > { %v4259_v2 = vmax.f32 %v4227_v9, 0.0  ;;  %4427 = vmatmul.msk.f32.gmra.mxu1 %vm2018_vm10, %v3913_v11 }
 0x68a   : > { %v4275_v31 = vmax.f32 %v4243_v46, 0.0 }
 0x68b   : > { %4291 = vst.msk [vmem:[%s7911_s16 + $0x18] sm:$0xff] %vm279_vm0, %v4259_v2  ;;  %v3641_v48 = vpop.permute.xlu2 %3640 }
 0x68c   : > { %4307 = vst.msk [vmem:[%s7911_s16 + $0x98] sm:$0xff] %vm279_vm0, %v4275_v31  ;;  %v3639_v29 = vpop.permute.xlu1 %3638 }
 0x68e   : > { %v3511_v23 = vpop.permute.xlu0 %3510 }
 0x68f   : > { %v3898_v6 = vsel %vm1943_vm9, %v3866_v30, %v3511_v23  ;;  %v8911_v30 = vld [vmem:[#allocation192_spill] sm:$0xff] }
 0x690   : > { %v3930_v22 = vsel %vm1976_vm8, %v3898_v6, %v3639_v29 }
 0x691   : > { %4444 = vmatmul.msk.f32.gmra.mxu3 %vm2018_vm10, %v3930_v22 }
 0x692   : > { %v4068_v39 = vpop.f32.mrf.mxu1 }
 0x693   : > { %v4160_v19 = vmul.f32 %v7882_v59, %v4068_v39  ;;  %v4116_v50 = vpop.f32.mrf.mxu3  ;;  %v3481_v45 = vpop.permute.xlu2 %3480 }
 0x694   : > { %v4176_v27 = vmul.f32 %v7882_v59, %v4116_v50  ;;  %v3479_v5 = vpop.permute.xlu1 %3478 }
 0x695   : > { %v4196_v1 = vadd.f32 %v7893_v36, %v4160_v19  ;;  %v3882_v13 = vsel %vm1943_vm9, %v3850_v28, %v3479_v5 }
 0x696   : > { %v4212_v14 = vadd.f32 %v7893_v36, %v4176_v27  ;;  %v3257_v47 = vpop.permute.xlu0 %3256 }
 0x697   : > { %v4228_v32 = vadd.f32 %v4196_v1, %v8902_v10  ;;  %v3835_v57 = vsel %vm1877_vm5, %v8906_v58, %v3257_v47 }
 0x698   : > { %v4244_v25 = vadd.f32 %v4212_v14, %v8904_v49  ;;  %v3867_v4 = vsel %vm1910_vm7, %v3835_v57, %v3385_v40 }
 0x699   : > { %v4260_v41 = vmax.f32 %v4228_v32, 0.0 }
 0x69a   : > { %v4276_v44 = vmax.f32 %v4244_v25, 0.0 }
 0x69b   : > { %4292 = vst.msk [vmem:[%s7911_s16 + $0x20] sm:$0xff] %vm279_vm0, %v4260_v41  ;;  %v3515_v43 = vpop.permute.xlu2 %3514 }
 0x69c   : > { %4308 = vst.msk [vmem:[%s7911_s16 + $0xa0] sm:$0xff] %vm279_vm0, %v4276_v44  ;;  %v3513_v3 = vpop.permute.xlu1 %3512  ;;  %v8915_v44 = vld [vmem:[#allocation62_spill] sm:$0xff] }
 0x69d   : > { %v3899_v53 = vsel %vm1943_vm9, %v3867_v4, %v3513_v3  ;;  %v3709_v20 = vsel %vm279_vm0, %v4533_v38, %v8915_v44  ;;  %v8917_v4 = vld [vmem:[#allocation102_spill] sm:$0xff] }
 0x69e   : > { %v3607_v37 = vpop.permute.xlu0 %3606  ;;  %v3931_v18 = vsel %vm1976_vm8, %v3899_v53, %v3641_v48  ;;  %v8912_v48 = vld [vmem:[#allocation9_spill] sm:$0xff]  ;;  %v3741_v54 = vsel %vm1778_vm3, %v3709_v20, %v8916_v7  ;;  %v8925_v44 = vld [vmem:[#allocation14_spill] sm:$0xff]  ;;  %v8926_v7 = vld [vmem:[#allocation31_spill] sm:$0xff] }
 0x69f   : > { %4445 = vmatmul.msk.f32.gmra.mxu3 %vm2018_vm10, %v3931_v18  ;;  %v3914_v56 = vsel %vm1976_vm8, %v3882_v13, %v3607_v37  ;;  %v3773_v28 = vsel %vm1811_vm4, %v3741_v54, %v8917_v4  ;;  %v8918_v37 = vld [vmem:[#allocation164_spill] sm:$0xff] }
 0x6a0   : > { %4428 = vmatmul.msk.f32.gmra.mxu1 %vm2018_vm10, %v3914_v56  ;;  %v3805_v18 = vsel %vm1844_vm6, %v3773_v28, %v8918_v37 }
 0x6a2   : > { %v4071_v9 = vpop.f32.mrf.mxu1 }
 0x6a3   : > { %v4161_v51 = vmul.f32 %v7882_v59, %v4071_v9  ;;  %v4119_v8 = vpop.f32.mrf.mxu3  ;;  %v3261_v27 = vpop.permute.xlu2 %3260 }
 0x6a4   : > { %v4177_v35 = vmul.f32 %v7882_v59, %v4119_v8  ;;  %v3259_v46 = vpop.permute.xlu1 %3258 }
 0x6a5   : > { %v4197_v11 = vadd.f32 %v7893_v36, %v4161_v51  ;;  %v3836_v23 = vsel %vm1877_vm5, %v8911_v30, %v3259_v46 }
 0x6a6   : > { %v4213_v21 = vadd.f32 %v7893_v36, %v4177_v35  ;;  %v3353_v61 = vpop.permute.xlu0 %3352 }
 0x6a7   : > { %v4229_v2 = vadd.f32 %v4197_v11, %v8909_v34  ;;  %v3851_v42 = vsel %vm1910_vm7, %v7500_v52, %v3353_v61  ;;  %v8919_v11 = vld [vmem:[#allocation11_spill] sm:$0xff]  ;;  %v8920_v34 = vld [vmem:[#allocation28_spill] sm:$0xff] }
 0x6a8   : > { %v4245_v24 = vadd.f32 %v4213_v21, %v8910_v33  ;;  %v3883_v29 = vsel %vm1943_vm9, %v3851_v42, %v3481_v45  ;;  %v3837_v45 = vsel %vm1877_vm5, %v3805_v18, %v3261_v27 }
 0x6a9   : > { %v4261_v31 = vmax.f32 %v4229_v2, 0.0 }
 0x6aa   : > { %v4277_v16 = vmax.f32 %v4245_v24, 0.0 }
 0x6ab   : > { %4293 = vst.msk [vmem:[%s7911_s16 + $0x28] sm:$0xff] %vm279_vm0, %v4261_v31  ;;  %v3611_v58 = vpop.permute.xlu2 %3610 }
 0x6ac   : > { %4309 = vst.msk [vmem:[%s7911_s16 + $0xa8] sm:$0xff] %vm279_vm0, %v4277_v16  ;;  %v3609_v63 = vpop.permute.xlu1 %3608 }
 0x6ad   : > { %v3915_v62 = vsel %vm1976_vm8, %v3883_v29, %v3609_v63 }
 0x6ae   : > { %4429 = vmatmul.msk.f32.gmra.mxu1 %vm2018_vm10, %v3915_v62  ;;  %v3387_v40 = vpop.permute.xlu0 %3386 }
 0x6af   : > { %v3868_v52 = vsel %vm1910_vm7, %v3836_v23, %v3387_v40 }
 0x6b0   : > { %v3900_v47 = vsel %vm1943_vm9, %v3868_v52, %v3515_v43 }
 0x6b2   : > { %v4074_v6 = vpop.f32.mrf.mxu1 }
 0x6b3   : > { %v4162_v22 = vmul.f32 %v7882_v59, %v4074_v6  ;;  %v4122_v39 = vpop.f32.mrf.mxu3  ;;  %v3357_v42 = vpop.permute.xlu2 %3356 }
 0x6b4   : > { %v4178_v19 = vmul.f32 %v7882_v59, %v4122_v39  ;;  %v3355_v50 = vpop.permute.xlu1 %3354  ;;  %v3853_v16 = vsel %vm1910_vm7, %v7536_v60, %v3357_v42 }
 0x6b5   : > { %v4198_v5 = vadd.f32 %v7893_v36, %v4162_v22  ;;  %v3852_v17 = vsel %vm1910_vm7, %v8914_v55, %v3355_v50  ;;  %v8921_v22 = vld [vmem:[#allocation13_spill] sm:$0xff] }
 0x6b6   : > { %v4214_v1 = vadd.f32 %v7893_v36, %v4178_v19  ;;  %v3643_v14 = vpop.permute.xlu0 %3642  ;;  %v8922_v19 = vld [vmem:[#allocation27_spill] sm:$0xff] }
 0x6b7   : > { %v4230_v10 = vadd.f32 %v4198_v5, %v8912_v48  ;;  %v3932_v32 = vsel %vm1976_vm8, %v3900_v47, %v3643_v14 }
 0x6b8   : > { %v4246_v26 = vadd.f32 %v4214_v1, %v8913_v12  ;;  %4446 = vmatmul.msk.f32.gmra.mxu3 %vm2018_vm10, %v3932_v32  ;;  %v8923_v12 = vld [vmem:[#allocation12_spill] sm:$0xff] }
 0x6b9   : > { %v4262_v0 = vmax.f32 %v4230_v10, 0.0 }
 0x6ba   : > { %v4278_v49 = vmax.f32 %v4246_v26, 0.0 }
 0x6bb   : > { %4294 = vst.msk [vmem:[%s7911_s16 + $0x30] sm:$0xff] %vm279_vm0, %v4262_v0  ;;  %v8924_v0 = vld [vmem:[#allocation29_spill] sm:$0xff] }
 0x6bc   : > { %4310 = vst.msk [vmem:[%s7911_s16 + $0xb0] sm:$0xff] %vm279_vm0, %v4278_v49  ;;  %v3389_v25 = vpop.permute.xlu1 %3388 }
 0x6bd   : > { %v3869_v8 = vsel %vm1910_vm7, %v3837_v45, %v3389_v25 }
 0x6be   : > { %v3483_v41 = vpop.permute.xlu0 %3482 }
 0x6bf   : > { %v3884_v57 = vsel %vm1943_vm9, %v3852_v17, %v3483_v41 }
 0x6c0   : > { %v3916_v15 = vsel %vm1976_vm8, %v3884_v57, %v3611_v58 }
 0x6c1   : > { %4430 = vmatmul.msk.f32.gmra.mxu1 %vm2018_vm10, %v3916_v15 }
 0x6c2   : > { %v4077_v3 = vpop.f32.mrf.mxu1 }
 0x6c3   : > { %v4163_v53 = vmul.f32 %v7882_v59, %v4077_v3  ;;  %v4125_v13 = vpop.f32.mrf.mxu3 }
 0x6c4   : > { %v4179_v56 = vmul.f32 %v7882_v59, %v4125_v13  ;;  %v3645_v51 = vpop.permute.xlu1 %3644 }
 0x6c5   : > { %v4199_v9 = vadd.f32 %v7893_v36, %v4163_v53 }
 0x6c6   : > { %v4215_v35 = vadd.f32 %v7893_v36, %v4179_v56  ;;  %v3517_v46 = vpop.permute.xlu0 %3516  ;;  %v8927_v56 = vld [vmem:[#allocation30_spill] sm:$0xff] }
 0x6c7   : > { %v4231_v21 = vadd.f32 %v4199_v9, %v8919_v11  ;;  %v3901_v61 = vsel %vm1943_vm9, %v3869_v8, %v3517_v46  ;;  %v8928_v8 = vld [vmem:[#allocation16_spill] sm:$0xff] }
 0x6c8   : > { %v4247_v2 = vadd.f32 %v4215_v35, %v8920_v34  ;;  %v3933_v33 = vsel %vm1976_vm8, %v3901_v61, %v3645_v51  ;;  %v8929_v34 = vld [vmem:[#allocation32_spill] sm:$0xff] }
 0x6c9   : > { %v4263_v24 = vmax.f32 %v4231_v21, 0.0  ;;  %4447 = vmatmul.msk.f32.gmra.mxu3 %vm2018_vm10, %v3933_v33 }
 0x6ca   : > { %v4279_v31 = vmax.f32 %v4247_v2, 0.0 }
 0x6cb   : > { %4295 = vst.msk [vmem:[%s7911_s16 + $0x38] sm:$0xff] %vm279_vm0, %v4263_v24 }
 0x6cc   : > { %4311 = vst.msk [vmem:[%s7911_s16 + $0xb8] sm:$0xff] %vm279_vm0, %v4279_v31  ;;  %v3613_v63 = vpop.permute.xlu1 %3612 }
 0x6ce   : > { %v3485_v43 = vpop.permute.xlu0 %3484 }
 0x6cf   : > { %v3885_v29 = vsel %vm1943_vm9, %v3853_v16, %v3485_v43  ;;  %v8930_v16 = vld [vmem:[#allocation15_spill] sm:$0xff] }
 0x6d0   : > { %v3917_v62 = vsel %vm1976_vm8, %v3885_v29, %v3613_v63 }
 0x6d1   : > { %4431 = vmatmul.msk.f32.gmra.mxu1 %vm2018_vm10, %v3917_v62 }
 0x6d3   : > { %v4080_v40 = vpop.f32.mrf.mxu1  ;;  %v4128_v30 = vpop.f32.mrf.mxu3 }
 0x6d4   : > { %v4164_v23 = vmul.f32 %v7882_v59, %v4080_v40  ;;  %v4180_v6 = vmul.f32 %v7882_v59, %v4128_v30  ;;  %v8931_v30 = vld [vmem:[#allocation33_spill] sm:$0xff] }
 0x6d6   : > { %v4200_v52 = vadd.f32 %v7893_v36, %v4164_v23  ;;  %v4216_v60 = vadd.f32 %v7893_v36, %v4180_v6 }
 0x6d8   : > { %v4232_v39 = vadd.f32 %v4200_v52, %v8921_v22  ;;  %v4248_v50 = vadd.f32 %v4216_v60, %v8922_v19 }
 0x6da   : > { %v4264_v27 = vmax.f32 %v4232_v39, 0.0  ;;  %v4280_v5 = vmax.f32 %v4248_v50, 0.0  ;;  %v8932_v39 = vld [vmem:[#allocation17_spill] sm:$0xff] }
 0x6dc   : > { %4296 = vst.msk [vmem:[%s7911_s16 + $0x40] sm:$0xff] %vm279_vm0, %v4264_v27 }
 0x6dd   : > { %4312 = vst.msk [vmem:[%s7911_s16 + $0xc0] sm:$0xff] %vm279_vm0, %v4280_v5 }
 0x6e3   : > { %v4083_v1 = vpop.f32.mrf.mxu1  ;;  %v4131_v14 = vpop.f32.mrf.mxu3 }
 0x6e4   : > { %v4165_v47 = vmul.f32 %v7882_v59, %v4083_v1  ;;  %v4181_v48 = vmul.f32 %v7882_v59, %v4131_v14 }
 0x6e6   : > { %v4201_v10 = vadd.f32 %v7893_v36, %v4165_v47  ;;  %v4217_v32 = vadd.f32 %v7893_v36, %v4181_v48  ;;  %v8933_v48 = vld [vmem:[#allocation88_spill] sm:$0xff] }
 0x6e8   : > { %v4233_v26 = vadd.f32 %v4201_v10, %v8923_v12  ;;  %v4249_v49 = vadd.f32 %v4217_v32, %v8924_v0 }
 0x6ea   : > { %v4265_v25 = vmax.f32 %v4233_v26, 0.0  ;;  %v4281_v55 = vmax.f32 %v4249_v49, 0.0  ;;  %v8934_v26 = vld [vmem:[#allocation19_spill] sm:$0xff] }
 0x6ec   : > { %4297 = vst.msk [vmem:[%s7911_s16 + $0x48] sm:$0xff] %vm279_vm0, %v4265_v25 }
 0x6ed   : > { %4313 = vst.msk [vmem:[%s7911_s16 + $0xc8] sm:$0xff] %vm279_vm0, %v4281_v55 }
 0x6f3   : > { %v4086_v17 = vpop.f32.mrf.mxu1  ;;  %v4134_v41 = vpop.f32.mrf.mxu3 }
 0x6f4   : > { %v4166_v58 = vmul.f32 %v7882_v59, %v4086_v17  ;;  %v4182_v57 = vmul.f32 %v7882_v59, %v4134_v41 }
 0x6f6   : > { %v4202_v15 = vadd.f32 %v7893_v36, %v4166_v58  ;;  %v4218_v38 = vadd.f32 %v7893_v36, %v4182_v57  ;;  %v8935_v57 = vld [vmem:[#allocation89_spill] sm:$0xff] }
 0x6f8   : > { %v4234_v20 = vadd.f32 %v4202_v15, %v8925_v44  ;;  %v4250_v54 = vadd.f32 %v4218_v38, %v8926_v7 }
 0x6fa   : > { %v4266_v3 = vmax.f32 %v4234_v20, 0.0  ;;  %v4282_v4 = vmax.f32 %v4250_v54, 0.0  ;;  %v8936_v20 = vld [vmem:[#allocation18_spill] sm:$0xff] }
 0x6fc   : > { %4298 = vst.msk [vmem:[%s7911_s16 + $0x50] sm:$0xff] %vm279_vm0, %v4266_v3 }
 0x6fd   : > { %4314 = vst.msk [vmem:[%s7911_s16 + $0xd0] sm:$0xff] %vm279_vm0, %v4282_v4 }
 0x703   : > { %v4137_v28 = vpop.f32.mrf.mxu3 }
 0x704   : > { %v4183_v53 = vmul.f32 %v7882_v59, %v4137_v28 }
 0x706   : > { %v4219_v13 = vadd.f32 %v7893_v36, %v4183_v53  ;;  %v4089_v37 = vpop.f32.mrf.mxu1 }
 0x707   : > { %v4167_v18 = vmul.f32 %v7882_v59, %v4089_v37 }
 0x708   : > { %v4251_v45 = vadd.f32 %v4219_v13, %v8927_v56 }
 0x709   : > { %v4203_v9 = vadd.f32 %v7893_v36, %v4167_v18 }
 0x70a   : > { %v4283_v51 = vmax.f32 %v4251_v45, 0.0 }
 0x70b   : > { %v4235_v35 = vadd.f32 %v4203_v9, %v8928_v8 }
 0x70c   : > { %4315 = vst.msk [vmem:[%s7911_s16 + $0xd8] sm:$0xff] %vm279_vm0, %v4283_v51 }
 0x70d   : > { %v4267_v46 = vmax.f32 %v4235_v35, 0.0 }
 0x70f   : > { %4299 = vst.msk [vmem:[%s7911_s16 + $0x58] sm:$0xff] %vm279_vm0, %v4267_v46 }
 0x714   : > { %v4140_v11 = vpop.f32.mrf.mxu3 }
 0x715   : > { %v4184_v21 = vmul.f32 %v7882_v59, %v4140_v11 }
 0x717   : > { %v4220_v61 = vadd.f32 %v7893_v36, %v4184_v21 }
 0x719   : > { %v4252_v2 = vadd.f32 %v4220_v61, %v8929_v34 }
 0x71b   : > { %v4284_v33 = vmax.f32 %v4252_v2, 0.0 }
 0x71d   : > { %4316 = vst.msk [vmem:[%s7911_s16 + $0xe0] sm:$0xff] %vm279_vm0, %v4284_v33  ;;  %v4092_v24 = vpop.f32.mrf.mxu1 }
 0x71e   : > { %v4168_v31 = vmul.f32 %v7882_v59, %v4092_v24 }
 0x720   : > { %v4204_v42 = vadd.f32 %v7893_v36, %v4168_v31 }
 0x722   : > { %v4236_v43 = vadd.f32 %v4204_v42, %v8930_v16  ;;  %v4143_v63 = vpop.f32.mrf.mxu3 }
 0x723   : > { %v4185_v29 = vmul.f32 %v7882_v59, %v4143_v63 }
 0x724   : > { %v4268_v62 = vmax.f32 %v4236_v43, 0.0 }
 0x725   : > { %v4221_v40 = vadd.f32 %v7893_v36, %v4185_v29 }
 0x726   : > { %4300 = vst.msk [vmem:[%s7911_s16 + $0x60] sm:$0xff] %vm279_vm0, %v4268_v62 }
 0x727   : > { %v4253_v23 = vadd.f32 %v4221_v40, %v8931_v30 }
 0x729   : > { %v4285_v6 = vmax.f32 %v4253_v23, 0.0 }
 0x72b   : > { %4317 = vst.msk [vmem:[%s7911_s16 + $0xe8] sm:$0xff] %vm279_vm0, %v4285_v6  ;;  %v4095_v52 = vpop.f32.mrf.mxu1 }
 0x72c   : > { %v4169_v60 = vmul.f32 %v7882_v59, %v4095_v52 }
 0x72e   : > { %v4205_v22 = vadd.f32 %v7893_v36, %v4169_v60 }
 0x730   : > { %v4237_v19 = vadd.f32 %v4205_v22, %v8932_v39 }
 0x732   : > { %v4269_v50 = vmax.f32 %v4237_v19, 0.0 }
 0x734   : > { %4301 = vst.msk [vmem:[%s7911_s16 + $0x68] sm:$0xff] %vm279_vm0, %v4269_v50 }
 0x73b   : > { %v4146_v27 = vpop.f32.mrf.mxu3 }
 0x73c   : > { %v4186_v5 = vmul.f32 %v7882_v59, %v4146_v27 }
 0x73e   : > { %v4222_v1 = vadd.f32 %v7893_v36, %v4186_v5  ;;  %v4098_v14 = vpop.f32.mrf.mxu1 }
 0x73f   : > { %v4170_v47 = vmul.f32 %v7882_v59, %v4098_v14 }
 0x740   : > { %v4254_v10 = vadd.f32 %v4222_v1, %v8933_v48 }
 0x741   : > { %v4206_v32 = vadd.f32 %v7893_v36, %v4170_v47 }
 0x742   : > { %v4286_v12 = vmax.f32 %v4254_v10, 0.0 }
 0x743   : > { %v4238_v0 = vadd.f32 %v4206_v32, %v8934_v26 }
 0x744   : > { %4318 = vst.msk [vmem:[%s7911_s16 + $0xf0] sm:$0xff] %vm279_vm0, %v4286_v12 }
 0x745   : > { %v4270_v49 = vmax.f32 %v4238_v0, 0.0 }
 0x747   : > { %4302 = vst.msk [vmem:[%s7911_s16 + $0x70] sm:$0xff] %vm279_vm0, %v4270_v49 }
 0x74c   : > { %v4149_v25 = vpop.f32.mrf.mxu3 }
 0x74d   : > { %v4187_v55 = vmul.f32 %v7882_v59, %v4149_v25 }
 0x74e   : > { %v4101_v17 = vpop.f32.mrf.mxu1 }
 0x74f   : > { %v4223_v41 = vadd.f32 %v7893_v36, %v4187_v55  ;;  %v4171_v58 = vmul.f32 %v7882_v59, %v4101_v17 }
 0x751   : > { %v4255_v15 = vadd.f32 %v4223_v41, %v8935_v57  ;;  %v4207_v38 = vadd.f32 %v7893_v36, %v4171_v58 }
 0x753   : > { %v4287_v44 = vmax.f32 %v4255_v15, 0.0  ;;  %v4239_v7 = vadd.f32 %v4207_v38, %v8936_v20 }
 0x755   : > { %4319 = vst.msk [vmem:[%s7911_s16 + $0xf8] sm:$0xff] %vm279_vm0, %v4287_v44  ;;  %v4271_v54 = vmax.f32 %v4239_v7, 0.0 }
 0x757   : > { %4303 = vst.msk [vmem:[%s7911_s16 + $0x78] sm:$0xff] %vm279_vm0, %v4271_v54 }
 0x758 PF: > { %s17_s24 = sadd.s32 1, %s4540_s24  }
 0x759   : > { %p14_p4 = scmp.ge.s32.totalorder %s17_s24, 4  }
 0x75b   :  { %16 = sbr.rel (!%p14_p4) target bundleno = 1 (0x1), region = 84 }

</bundles_post_ra>
